<compile_context>
chip_gen: v7x
topology: tpu7x:2x2x1
jax: 0.10.0
libtpu: 0.0.40
codegen_flags: <defaults>
</compile_context>

<pallas_src>
import functools
import numpy as np
import jax
import jax.numpy as jnp
from jax.experimental import pallas as pl
from jax.experimental.pallas import tpu as pltpu


def _silu(a):
    # SiLU = a * sigmoid(a); the reciprocal runs on the EUP slot (free next to MXU work).
    return a * pl.reciprocal(1.0 + jnp.exp(-a), approx=True)


def _crossconv_kernel(x_ref, w1_ref, b1_ref, w2_ref, b2_ref, o_ref,
                      xpad_ref, a1pad_ref, *, k, pad, add):
    # x_ref    : (1, H, W, c1)      f32   input block (the only HBM input stream)
    # w1_ref   : (k, c1, c_)        bf16  cv1 weights, BN scale folded in
    # b1_ref   : (1, c_)            f32   cv1 folded BN bias
    # w2_ref   : (k, c_, c2)        bf16  cv2 weights, BN scale folded in
    # b2_ref   : (1, c2)            f32   cv2 folded BN bias
    # o_ref    : (1, H, W, c2)      f32
    # xpad_ref : (H, W + 2*pad, c1) bf16  VMEM scratch: W-halo for the 1 x k conv
    # a1pad_ref: (H + 2*pad, W, c_) bf16  VMEM scratch: H-halo for the k x 1 conv
    H, W, c1 = x_ref.shape[1], x_ref.shape[2], x_ref.shape[3]
    c_ = w1_ref.shape[2]
    c2 = w2_ref.shape[2]

    # Zero only the halo borders (tiny); the interiors are fully overwritten below.
    if pad > 0:
        xpad_ref[:, 0:pad, :] = jnp.zeros((H, pad, c1), xpad_ref.dtype)
        xpad_ref[:, pad + W:pad + W + pad, :] = jnp.zeros((H, pad, c1), xpad_ref.dtype)
        a1pad_ref[0:pad, :, :] = jnp.zeros((pad, W, c_), a1pad_ref.dtype)
        a1pad_ref[pad + H:pad + H + pad, :, :] = jnp.zeros((pad, W, c_), a1pad_ref.dtype)

    # Stage the input once into the W-padded scratch (single bf16 cast).
    xpad_ref[:, pad:pad + W, :] = x_ref[0].astype(xpad_ref.dtype)

    # --- cv1: 1 x k conv along W as k shifted taps (ref-sliced), bf16 MXU, f32 acc ---
    acc1 = jnp.zeros((H * W, c_), jnp.float32)
    for dw in range(k):                                   # static, unrolled
        xs = xpad_ref[:, dw:dw + W, :].reshape(H * W, c1)
        acc1 = acc1 + jnp.dot(xs, w1_ref[dw], preferred_element_type=jnp.float32)
    a1 = _silu(acc1 + b1_ref[...])

    # Stage the activation into the H-padded scratch for the k x 1 conv.
    a1pad_ref[pad:pad + H, :, :] = a1.reshape(H, W, c_).astype(a1pad_ref.dtype)

    # --- cv2: k x 1 conv along H as k shifted taps (ref-sliced), bf16 MXU, f32 acc ---
    acc2 = jnp.zeros((H * W, c2), jnp.float32)
    for dh in range(k):
        ss = a1pad_ref[dh:dh + H, :, :].reshape(H * W, c_)
        acc2 = acc2 + jnp.dot(ss, w2_ref[dh], preferred_element_type=jnp.float32)
    y = _silu(acc2 + b2_ref[...]).reshape(1, H, W, c2)

    if add:                                               # shortcut (c1 == c2)
        y = y + x_ref[...]
    o_ref[...] = y.astype(o_ref.dtype)


def cross_conv_pallas(x_nchw, params, *, k=3, s=1, g=1, shortcut=False, eps=1e-5):
    """CrossConv forward. x_nchw: (N, c1, H, W) float32, params in torch layout."""
    assert s == 1 and g == 1  # TODO(synk): stride > 1 and grouped cv2 (g > 1) not implemented
    (w1, g1, be1, m1, v1, w2, g2, be2, m2, v2) = params
    N, c1, H, W = x_nchw.shape
    c_ = w1.shape[0]
    c2 = w2.shape[0]
    pad = k // 2
    add = bool(shortcut and c1 == c2)

    # Fold eval-mode BatchNorm into conv weights / bias (fold in f32, then cast to bf16).
    s1 = g1 / jnp.sqrt(v1 + eps)
    b1 = (be1 - m1 * s1).reshape(1, c_).astype(jnp.float32)
    w1k = (jnp.transpose(w1[:, :, 0, :], (2, 1, 0)) * s1[None, None, :]).astype(jnp.bfloat16)
    s2 = g2 / jnp.sqrt(v2 + eps)
    b2 = (be2 - m2 * s2).reshape(1, c2).astype(jnp.float32)
    w2k = (jnp.transpose(w2[:, :, :, 0], (2, 1, 0)) * s2[None, None, :]).astype(jnp.bfloat16)

    # Single NHWC input stream: no HBM pad materialization, no duplicate shortcut input.
    x_nhwc = jnp.transpose(x_nchw, (0, 2, 3, 1)).astype(jnp.float32)

    kern = functools.partial(_crossconv_kernel, k=k, pad=pad, add=add)
    out_nhwc = pl.pallas_call(
        kern,
        out_shape=jax.ShapeDtypeStruct((N, H, W, c2), jnp.float32),
        grid_spec=pltpu.PrefetchScalarGridSpec(
            num_scalar_prefetch=0,
            grid=(N,),
            in_specs=[
                pl.BlockSpec((1, H, W, c1), lambda n: (n, 0, 0, 0)),
                pl.BlockSpec((k, c1, c_), lambda n: (0, 0, 0)),
                pl.BlockSpec((1, c_), lambda n: (0, 0)),
                pl.BlockSpec((k, c_, c2), lambda n: (0, 0, 0)),
                pl.BlockSpec((1, c2), lambda n: (0, 0)),
            ],
            out_specs=pl.BlockSpec((1, H, W, c2), lambda n: (n, 0, 0, 0)),
            scratch_shapes=[
                pltpu.VMEM((H, W + 2 * pad, c1), jnp.bfloat16),
                pltpu.VMEM((H + 2 * pad, W, c_), jnp.bfloat16),
            ],
        ),
        compiler_params=pltpu.CompilerParams(
            dimension_semantics=("parallel",),
            vmem_limit_bytes=64 * 1024 * 1024,
        ),
    )(x_nhwc, w1k, b1, w2k, b2)

    # TODO(synk): for large YOLO feature maps (v7x: 64 MiB VMEM, 2 TCs) add an H-tile grid
    # axis with halo rows (manual DMA double-buffer or pl.BoundedSlice overlapped windows)
    # so per-step blocks stay under the scoped VMEM limit and both v7x cores run at N == 1.
    # TODO(synk): tiny channel counts (c2 << 128) leave most MXU / vreg lanes idle; a
    # lane-dense re-layout (fold W into the lane axis) is needed to recover that for c = 4.

    return jnp.transpose(out_nhwc, (0, 3, 1, 2))          # back to NCHW


def cross_conv_ref(x, params, *, k=3, shortcut=False, eps=1e-5):
    """Pure-JAX reference (mirrors PyTorch CrossConv, eval-mode BN)."""
    (w1, g1, be1, m1, v1, w2, g2, be2, m2, v2) = params

    def conv_bn_silu(x, w, gamma, beta, mean, var, pad):
        y = jax.lax.conv_general_dilated(
            x, w, window_strides=(1, 1),
            padding=[(pad[0], pad[0]), (pad[1], pad[1])],
            dimension_numbers=('NCHW', 'OIHW', 'NCHW'),
            precision=jax.lax.Precision.HIGHEST)
        scale = gamma / jnp.sqrt(var + eps)
        bias = beta - mean * scale
        y = y * scale[None, :, None, None] + bias[None, :, None, None]
        return y * jax.nn.sigmoid(y)

    y = conv_bn_silu(x, w1, g1, be1, m1, v1, (0, k // 2))
    y = conv_bn_silu(y, w2, g2, be2, m2, v2, (k // 2, 0))
    add = shortcut and x.shape[1] == w2.shape[0]
    return x + y if add else y


if __name__ == "__main__":
    # CrossConv(c1=4, c2=4, k=3, s=1, g=1, e=1.0, shortcut=True)
    N, c1, H, W = 2, 4, 16, 16
    c2, k, e, shortcut = 4, 3, 1.0, True
    c_ = int(c2 * e)

    keys = jax.random.split(jax.random.PRNGKey(0), 11)
    x   = jax.random.normal(keys[0], (N, c1, H, W), jnp.float32)
    w1  = 0.3 * jax.random.normal(keys[1], (c_, c1, 1, k), jnp.float32)
    g1  = 1.0 + 0.1 * jax.random.normal(keys[2], (c_,), jnp.float32)
    be1 = 0.1 * jax.random.normal(keys[3], (c_,), jnp.float32)
    m1  = 0.1 * jax.random.normal(keys[4], (c_,), jnp.float32)
    v1  = jax.random.uniform(keys[5], (c_,), jnp.float32, 0.5, 1.5)
    w2  = 0.3 * jax.random.normal(keys[6], (c2, c_, k, 1), jnp.float32)
    g2  = 1.0 + 0.1 * jax.random.normal(keys[7], (c2,), jnp.float32)
    be2 = 0.1 * jax.random.normal(keys[8], (c2,), jnp.float32)
    m2  = 0.1 * jax.random.normal(keys[9], (c2,), jnp.float32)
    v2  = jax.random.uniform(keys[10], (c2,), jnp.float32, 0.5, 1.5)
    params = (w1, g1, be1, m1, v1, w2, g2, be2, m2, v2)

    out = cross_conv_pallas(x, params, k=k, s=1, g=1, shortcut=shortcut)
    out = jax.block_until_ready(out)

    ref = cross_conv_ref(x, params, k=k, shortcut=shortcut)
    np.testing.assert_allclose(np.asarray(out), np.asarray(ref), rtol=2e-2, atol=2e-2)

    print("KERNEL_OK")
</pallas_src>

<mosaic_0001>
module attributes {stable_mosaic.version = 11 : i64} {
  func.func @_crossconv_kernel(%arg0: i32, %arg1: memref<1x16x16x4xf32, #tpu.memory_space<vmem>>, %arg2: memref<3x4x4xbf16, #tpu.memory_space<vmem>>, %arg3: memref<1x4xf32, #tpu.memory_space<vmem>>, %arg4: memref<3x4x4xbf16, #tpu.memory_space<vmem>>, %arg5: memref<1x4xf32, #tpu.memory_space<vmem>>, %arg6: memref<1x16x16x4xf32, #tpu.memory_space<vmem>>, %arg7: memref<16x18x4xbf16, #tpu.memory_space<vmem>>, %arg8: memref<18x16x4xbf16, #tpu.memory_space<vmem>>) attributes {dimension_semantics = [#tpu.dimension_semantics<parallel>], iteration_bounds = array<i64: 2>, scalar_prefetch = 0 : i64, scratch_operands = 2 : i64, tpu.core_type = #tpu.core_type<tc>, window_params = [{transform_indices = @transform_0, window_bounds = array<i64: 1, 16, 16, 4>}, {pipeline_mode = #tpu.pipeline_mode<synchronous>, transform_indices = @transform_1, window_bounds = array<i64: 3, 4, 4>}, {pipeline_mode = #tpu.pipeline_mode<synchronous>, transform_indices = @transform_2, window_bounds = array<i64: 1, 4>}, {pipeline_mode = #tpu.pipeline_mode<synchronous>, transform_indices = @transform_3, window_bounds = array<i64: 3, 4, 4>}, {pipeline_mode = #tpu.pipeline_mode<synchronous>, transform_indices = @transform_4, window_bounds = array<i64: 1, 4>}, {transform_indices = @transform_5, window_bounds = array<i64: 1, 16, 16, 4>}]} {
    %cst = arith.constant 0.000000e+00 : bf16
    %0 = vector.broadcast %cst : bf16 to vector<16x1x4xbf16>
    %c0 = arith.constant 0 : index
    %c0_0 = arith.constant 0 : index
    %c0_1 = arith.constant 0 : index
    %1 = vector.load %arg7[%c0, %c0_0, %c0_1] : memref<16x18x4xbf16, #tpu.memory_space<vmem>>, vector<16x1x4xbf16>
    tpu.vector_store %arg7[%c0, %c0_0, %c0_1], %0 {strides = array<i32>} : memref<16x18x4xbf16, #tpu.memory_space<vmem>>, vector<16x1x4xbf16>,
    %cst_2 = arith.constant 0.000000e+00 : bf16
    %2 = vector.broadcast %cst_2 : bf16 to vector<16x1x4xbf16>
    %c0_3 = arith.constant 0 : index
    %c17 = arith.constant 17 : index
    %c0_4 = arith.constant 0 : index
    %3 = vector.load %arg7[%c0_3, %c17, %c0_4] : memref<16x18x4xbf16, #tpu.memory_space<vmem>>, vector<16x1x4xbf16>
    tpu.vector_store %arg7[%c0_3, %c17, %c0_4], %2 {strides = array<i32>} : memref<16x18x4xbf16, #tpu.memory_space<vmem>>, vector<16x1x4xbf16>,
    %cst_5 = arith.constant 0.000000e+00 : bf16
    %4 = vector.broadcast %cst_5 : bf16 to vector<1x16x4xbf16>
    %c0_6 = arith.constant 0 : index
    %c0_7 = arith.constant 0 : index
    %c0_8 = arith.constant 0 : index
    %5 = vector.load %arg8[%c0_6, %c0_7, %c0_8] : memref<18x16x4xbf16, #tpu.memory_space<vmem>>, vector<1x16x4xbf16>
    tpu.vector_store %arg8[%c0_6, %c0_7, %c0_8], %4 {strides = array<i32>} : memref<18x16x4xbf16, #tpu.memory_space<vmem>>, vector<1x16x4xbf16>,
    %cst_9 = arith.constant 0.000000e+00 : bf16
    %6 = vector.broadcast %cst_9 : bf16 to vector<1x16x4xbf16>
    %c17_10 = arith.constant 17 : index
    %c0_11 = arith.constant 0 : index
    %c0_12 = arith.constant 0 : index
    %7 = vector.load %arg8[%c17_10, %c0_11, %c0_12] : memref<18x16x4xbf16, #tpu.memory_space<vmem>>, vector<1x16x4xbf16>
    tpu.vector_store %arg8[%c17_10, %c0_11, %c0_12], %6 {strides = array<i32>} : memref<18x16x4xbf16, #tpu.memory_space<vmem>>, vector<1x16x4xbf16>,
    %c0_13 = arith.constant 0 : index
    %c0_14 = arith.constant 0 : index
    %c0_15 = arith.constant 0 : index
    %c0_16 = arith.constant 0 : index
    %8 = vector.load %arg1[%c0_13, %c0_14, %c0_15, %c0_16] : memref<1x16x16x4xf32, #tpu.memory_space<vmem>>, vector<1x16x16x4xf32>
    %9 = vector.shape_cast %8 : vector<1x16x16x4xf32> to vector<16x16x4xf32>
    %10 = arith.truncf %9 : vector<16x16x4xf32> to vector<16x16x4xbf16>
    %c0_17 = arith.constant 0 : index
    %c1 = arith.constant 1 : index
    %c0_18 = arith.constant 0 : index
    %11 = vector.load %arg7[%c0_17, %c1, %c0_18] : memref<16x18x4xbf16, #tpu.memory_space<vmem>>, vector<16x16x4xbf16>
    tpu.vector_store %arg7[%c0_17, %c1, %c0_18], %10 {strides = array<i32>} : memref<16x18x4xbf16, #tpu.memory_space<vmem>>, vector<16x16x4xbf16>,
    %cst_19 = arith.constant 0.000000e+00 : f32
    %12 = vector.broadcast %cst_19 : f32 to vector<256x4xf32>
    %c0_20 = arith.constant 0 : index
    %c0_21 = arith.constant 0 : index
    %c0_22 = arith.constant 0 : index
    %13 = vector.load %arg7[%c0_20, %c0_21, %c0_22] : memref<16x18x4xbf16, #tpu.memory_space<vmem>>, vector<16x16x4xbf16>
    %14 = vector.shape_cast %13 : vector<16x16x4xbf16> to vector<256x4xbf16>
    %c0_23 = arith.constant 0 : index
    %c0_24 = arith.constant 0 : index
    %c0_25 = arith.constant 0 : index
    %15 = vector.load %arg2[%c0_23, %c0_24, %c0_25] : memref<3x4x4xbf16, #tpu.memory_space<vmem>>, vector<1x4x4xbf16>
    %16 = vector.shape_cast %15 : vector<1x4x4xbf16> to vector<4x4xbf16>
    %cst_26 = arith.constant dense<0.000000e+00> : vector<256x4xf32>
    %17 = tpu.matmul %14, %16, %cst_26 {dimension_numbers = #tpu.dot_dimension_numbers<[1], [0], [0], [1], [0, 0, 1, 1], [], []>} : vector<256x4xbf16>, vector<4x4xbf16>, vector<256x4xf32> -> vector<256x4xf32>
    %18 = arith.addf %12, %17 : vector<256x4xf32>
    %c0_27 = arith.constant 0 : index
    %c1_28 = arith.constant 1 : index
    %c0_29 = arith.constant 0 : index
    %19 = vector.load %arg7[%c0_27, %c1_28, %c0_29] : memref<16x18x4xbf16, #tpu.memory_space<vmem>>, vector<16x16x4xbf16>
    %20 = vector.shape_cast %19 : vector<16x16x4xbf16> to vector<256x4xbf16>
    %c1_30 = arith.constant 1 : index
    %c0_31 = arith.constant 0 : index
    %c0_32 = arith.constant 0 : index
    %21 = vector.load %arg2[%c1_30, %c0_31, %c0_32] : memref<3x4x4xbf16, #tpu.memory_space<vmem>>, vector<1x4x4xbf16>
    %22 = vector.shape_cast %21 : vector<1x4x4xbf16> to vector<4x4xbf16>
    %cst_33 = arith.constant dense<0.000000e+00> : vector<256x4xf32>
    %23 = tpu.matmul %20, %22, %cst_33 {dimension_numbers = #tpu.dot_dimension_numbers<[1], [0], [0], [1], [0, 0, 1, 1], [], []>} : vector<256x4xbf16>, vector<4x4xbf16>, vector<256x4xf32> -> vector<256x4xf32>
    %24 = arith.addf %18, %23 : vector<256x4xf32>
    %c0_34 = arith.constant 0 : index
    %c2 = arith.constant 2 : index
    %c0_35 = arith.constant 0 : index
    %25 = vector.load %arg7[%c0_34, %c2, %c0_35] : memref<16x18x4xbf16, #tpu.memory_space<vmem>>, vector<16x16x4xbf16>
    %26 = vector.shape_cast %25 : vector<16x16x4xbf16> to vector<256x4xbf16>
    %c2_36 = arith.constant 2 : index
    %c0_37 = arith.constant 0 : index
    %c0_38 = arith.constant 0 : index
    %27 = vector.load %arg2[%c2_36, %c0_37, %c0_38] : memref<3x4x4xbf16, #tpu.memory_space<vmem>>, vector<1x4x4xbf16>
    %28 = vector.shape_cast %27 : vector<1x4x4xbf16> to vector<4x4xbf16>
    %cst_39 = arith.constant dense<0.000000e+00> : vector<256x4xf32>
    %29 = tpu.matmul %26, %28, %cst_39 {dimension_numbers = #tpu.dot_dimension_numbers<[1], [0], [0], [1], [0, 0, 1, 1], [], []>} : vector<256x4xbf16>, vector<4x4xbf16>, vector<256x4xf32> -> vector<256x4xf32>
    %30 = arith.addf %24, %29 : vector<256x4xf32>
    %c0_40 = arith.constant 0 : index
    %c0_41 = arith.constant 0 : index
    %31 = vector.load %arg3[%c0_40, %c0_41] : memref<1x4xf32, #tpu.memory_space<vmem>>, vector<1x4xf32>
    %32 = vector.broadcast %31 : vector<1x4xf32> to vector<256x4xf32>
    %33 = arith.addf %30, %32 : vector<256x4xf32>
    %cst_42 = arith.constant 0.000000e+00 : f32
    %34 = vector.broadcast %cst_42 : f32 to vector<256x4xf32>
    %35 = arith.subf %34, %33 : vector<256x4xf32>
    %36 = math.exp %35 : vector<256x4xf32>
    %cst_43 = arith.constant 1.000000e+00 : f32
    %37 = vector.broadcast %cst_43 : f32 to vector<256x4xf32>
    %38 = arith.addf %37, %36 : vector<256x4xf32>
    %39 = tpu.reciprocal %38 {approx = true} : vector<256x4xf32> -> vector<256x4xf32>
    %40 = arith.mulf %33, %39 : vector<256x4xf32>
    %41 = vector.shape_cast %40 : vector<256x4xf32> to vector<16x16x4xf32>
    %42 = arith.truncf %41 : vector<16x16x4xf32> to vector<16x16x4xbf16>
    %c1_44 = arith.constant 1 : index
    %c0_45 = arith.constant 0 : index
    %c0_46 = arith.constant 0 : index
    %43 = vector.load %arg8[%c1_44, %c0_45, %c0_46] : memref<18x16x4xbf16, #tpu.memory_space<vmem>>, vector<16x16x4xbf16>
    tpu.vector_store %arg8[%c1_44, %c0_45, %c0_46], %42 {strides = array<i32>} : memref<18x16x4xbf16, #tpu.memory_space<vmem>>, vector<16x16x4xbf16>,
    %cst_47 = arith.constant 0.000000e+00 : f32
    %44 = vector.broadcast %cst_47 : f32 to vector<256x4xf32>
    %c0_48 = arith.constant 0 : index
    %c0_49 = arith.constant 0 : index
    %c0_50 = arith.constant 0 : index
    %45 = vector.load %arg8[%c0_48, %c0_49, %c0_50] : memref<18x16x4xbf16, #tpu.memory_space<vmem>>, vector<16x16x4xbf16>
    %46 = vector.shape_cast %45 : vector<16x16x4xbf16> to vector<256x4xbf16>
    %c0_51 = arith.constant 0 : index
    %c0_52 = arith.constant 0 : index
    %c0_53 = arith.constant 0 : index
    %47 = vector.load %arg4[%c0_51, %c0_52, %c0_53] : memref<3x4x4xbf16, #tpu.memory_space<vmem>>, vector<1x4x4xbf16>
    %48 = vector.shape_cast %47 : vector<1x4x4xbf16> to vector<4x4xbf16>
    %cst_54 = arith.constant dense<0.000000e+00> : vector<256x4xf32>
    %49 = tpu.matmul %46, %48, %cst_54 {dimension_numbers = #tpu.dot_dimension_numbers<[1], [0], [0], [1], [0, 0, 1, 1], [], []>} : vector<256x4xbf16>, vector<4x4xbf16>, vector<256x4xf32> -> vector<256x4xf32>
    %50 = arith.addf %44, %49 : vector<256x4xf32>
    %c1_55 = arith.constant 1 : index
    %c0_56 = arith.constant 0 : index
    %c0_57 = arith.constant 0 : index
    %51 = vector.load %arg8[%c1_55, %c0_56, %c0_57] : memref<18x16x4xbf16, #tpu.memory_space<vmem>>, vector<16x16x4xbf16>
    %52 = vector.shape_cast %51 : vector<16x16x4xbf16> to vector<256x4xbf16>
    %c1_58 = arith.constant 1 : index
    %c0_59 = arith.constant 0 : index
    %c0_60 = arith.constant 0 : index
    %53 = vector.load %arg4[%c1_58, %c0_59, %c0_60] : memref<3x4x4xbf16, #tpu.memory_space<vmem>>, vector<1x4x4xbf16>
    %54 = vector.shape_cast %53 : vector<1x4x4xbf16> to vector<4x4xbf16>
    %cst_61 = arith.constant dense<0.000000e+00> : vector<256x4xf32>
    %55 = tpu.matmul %52, %54, %cst_61 {dimension_numbers = #tpu.dot_dimension_numbers<[1], [0], [0], [1], [0, 0, 1, 1], [], []>} : vector<256x4xbf16>, vector<4x4xbf16>, vector<256x4xf32> -> vector<256x4xf32>
    %56 = arith.addf %50, %55 : vector<256x4xf32>
    %c2_62 = arith.constant 2 : index
    %c0_63 = arith.constant 0 : index
    %c0_64 = arith.constant 0 : index
    %57 = vector.load %arg8[%c2_62, %c0_63, %c0_64] : memref<18x16x4xbf16, #tpu.memory_space<vmem>>, vector<16x16x4xbf16>
    %58 = vector.shape_cast %57 : vector<16x16x4xbf16> to vector<256x4xbf16>
    %c2_65 = arith.constant 2 : index
    %c0_66 = arith.constant 0 : index
    %c0_67 = arith.constant 0 : index
    %59 = vector.load %arg4[%c2_65, %c0_66, %c0_67] : memref<3x4x4xbf16, #tpu.memory_space<vmem>>, vector<1x4x4xbf16>
    %60 = vector.shape_cast %59 : vector<1x4x4xbf16> to vector<4x4xbf16>
    %cst_68 = arith.constant dense<0.000000e+00> : vector<256x4xf32>
    %61 = tpu.matmul %58, %60, %cst_68 {dimension_numbers = #tpu.dot_dimension_numbers<[1], [0], [0], [1], [0, 0, 1, 1], [], []>} : vector<256x4xbf16>, vector<4x4xbf16>, vector<256x4xf32> -> vector<256x4xf32>
    %62 = arith.addf %56, %61 : vector<256x4xf32>
    %c0_69 = arith.constant 0 : index
    %c0_70 = arith.constant 0 : index
    %63 = vector.load %arg5[%c0_69, %c0_70] : memref<1x4xf32, #tpu.memory_space<vmem>>, vector<1x4xf32>
    %64 = vector.broadcast %63 : vector<1x4xf32> to vector<256x4xf32>
    %65 = arith.addf %62, %64 : vector<256x4xf32>
    %cst_71 = arith.constant 0.000000e+00 : f32
    %66 = vector.broadcast %cst_71 : f32 to vector<256x4xf32>
    %67 = arith.subf %66, %65 : vector<256x4xf32>
    %68 = math.exp %67 : vector<256x4xf32>
    %cst_72 = arith.constant 1.000000e+00 : f32
    %69 = vector.broadcast %cst_72 : f32 to vector<256x4xf32>
    %70 = arith.addf %69, %68 : vector<256x4xf32>
    %71 = tpu.reciprocal %70 {approx = true} : vector<256x4xf32> -> vector<256x4xf32>
    %72 = arith.mulf %65, %71 : vector<256x4xf32>
    %73 = vector.shape_cast %72 : vector<256x4xf32> to vector<1x16x16x4xf32>
    %c0_73 = arith.constant 0 : index
    %c0_74 = arith.constant 0 : index
    %c0_75 = arith.constant 0 : index
    %c0_76 = arith.constant 0 : index
    %74 = vector.load %arg1[%c0_73, %c0_74, %c0_75, %c0_76] : memref<1x16x16x4xf32, #tpu.memory_space<vmem>>, vector<1x16x16x4xf32>
    %75 = arith.addf %73, %74 : vector<1x16x16x4xf32>
    %c0_77 = arith.constant 0 : index
    %c0_78 = arith.constant 0 : index
    %c0_79 = arith.constant 0 : index
    %c0_80 = arith.constant 0 : index
    %76 = vector.load %arg6[%c0_77, %c0_78, %c0_79, %c0_80] : memref<1x16x16x4xf32, #tpu.memory_space<vmem>>, vector<1x16x16x4xf32>
    tpu.vector_store %arg6[%c0_77, %c0_78, %c0_79, %c0_80], %75 {strides = array<i32>} : memref<1x16x16x4xf32, #tpu.memory_space<vmem>>, vector<1x16x16x4xf32>,
    return
  }
  func.func @transform_0(%arg0: i32) -> (i32, i32, i32, i32) {
    %c0_i32 = arith.constant 0 : i32
    %c0_i32_0 = arith.constant 0 : i32
    %c0_i32_1 = arith.constant 0 : i32
    %c0_i32_2 = arith.constant 0 : i32
    return %arg0, %c0_i32, %c0_i32_0, %c0_i32_1 : i32, i32, i32, i32
  }
  func.func @transform_1(%arg0: i32) -> (i32, i32, i32) {
    %c0_i32 = arith.constant 0 : i32
    %c0_i32_0 = arith.constant 0 : i32
    %c0_i32_1 = arith.constant 0 : i32
    %c0_i32_2 = arith.constant 0 : i32
    return %c0_i32, %c0_i32_0, %c0_i32_1 : i32, i32, i32
  }
  func.func @transform_2(%arg0: i32) -> (i32, i32) {
    %c0_i32 = arith.constant 0 : i32
    %c0_i32_0 = arith.constant 0 : i32
    %c0_i32_1 = arith.constant 0 : i32
    return %c0_i32, %c0_i32_0 : i32, i32
  }
  func.func @transform_3(%arg0: i32) -> (i32, i32, i32) {
    %c0_i32 = arith.constant 0 : i32
    %c0_i32_0 = arith.constant 0 : i32
    %c0_i32_1 = arith.constant 0 : i32
    %c0_i32_2 = arith.constant 0 : i32
    return %c0_i32, %c0_i32_0, %c0_i32_1 : i32, i32, i32
  }
  func.func @transform_4(%arg0: i32) -> (i32, i32) {
    %c0_i32 = arith.constant 0 : i32
    %c0_i32_0 = arith.constant 0 : i32
    %c0_i32_1 = arith.constant 0 : i32
    return %c0_i32, %c0_i32_0 : i32, i32
  }
  func.func @transform_5(%arg0: i32) -> (i32, i32, i32, i32) {
    %c0_i32 = arith.constant 0 : i32
    %c0_i32_0 = arith.constant 0 : i32
    %c0_i32_1 = arith.constant 0 : i32
    %c0_i32_2 = arith.constant 0 : i32
    return %arg0, %c0_i32, %c0_i32_0, %c0_i32_1 : i32, i32, i32, i32
  }
}

</mosaic_0001>

<bundles_post_ra>
// kernel: tpu_custom_call.1
= control target key start
LH: loop header
LB: loop body
LE: loop exit
PB: predicated region body
PF: predicated region fallthrough
CT: control target
= control target key end

     0   :  { %10 = vsyncpa [#allocation5], 0  ;;  %s6711_s0 = inlined_call_operand.hbm [shape: f32[2,16,16,4], index: 0, kind: input, shape index: {}]   ;;  %s6712_s1 = inlined_call_operand.hbm [shape: bf16[3,4,4], index: 1, kind: input, shape index: {}]   ;;  %s6713_s2 = inlined_call_operand.hbm [shape: f32[1,4], index: 2, kind: input, shape index: {}]   ;;  %s6714_s3 = inlined_call_operand.hbm [shape: bf16[3,4,4], index: 3, kind: input, shape index: {}]   ;;  %s6715_s4 = inlined_call_operand.hbm [shape: f32[1,4], index: 4, kind: input, shape index: {}]   ;;  %s6716_s5 = inlined_call_operand.hbm [shape: f32[2,16,16,4], index: 5, kind: output, shape index: {}]  }
   0x1   :  { %12 = vsyncpa [#allocation5 + $0x1], 0 }
   0x2   :  { %13 = vsyncpa [#allocation8], 0 }
   0x3   :  { %14 = vsyncpa [#allocation11], 0 }
   0x4   :  { %15 = vsyncpa [#allocation6], 0 }
   0x5   :  { %17 = vsyncpa [#allocation6 + $0x1], 0  ;;  %s5179_s18 = smov 0   ;;  %s5181_s19 = smov 0  }
   0x6   :  { %s5183_s20 = smov 0   ;;  %s5185_s21 = smov 0  }
   0x7 LB: > { %s5200_s22 = sadd.s32 4294967295, %s5134_s21   ;;  %s3854_s23 = sadd.s32 4294967294, %s5134_s21   ;;  %s5134_s21 = sphi %s5185_s21, %s6751_s21   ;;  %s5130_s20 = sphi %s5183_s20, %s6750_s20   ;;  %s5126_s19 = sphi %s5181_s19, %s6749_s19   ;;  %s5122_s18 = sphi %s5179_s18, %s6748_s18  }
   0x8   : > { %p43_p0 = scmp.ne.s32.totalorder %s5126_s19, %s5122_s18  ;;  %p6717_p1 = scmp.eq.s32.totalorder %s5200_s22, 0 }
   0x9   : > { %p157_p3 = scmp.eq.s32.totalorder %s3854_s23, 1  ;;  %p3855_p5 = scmp.ge.s32.totalorder %s5134_s21, 1 }
   0xa   : > { %p5209_p4 = por %p6717_p1, %p43_p0  ;;  %p164_p7 = scmp.lt.s32.totalorder %s5134_s21, 3 }
   0xb   : > { %p5214_p6 = por %p157_p3, %p43_p0  ;;  %s5136_s27 = smov [#allocation7]  }
   0xc   : > { %s6720_s24 = scalar_select %p5209_p4, 1, 0 }
   0xd   : > { %s6721_s25 = scalar_select %p5214_p6, 1, 0 }
   0xe   : > { %p5219_p8 = pnand %p3855_p5, %p164_p7  ;;  %s176_s28 = sshll.u32 %s5136_s27, 4  ;;  %s5223_s28 = int_to_ptr.vmem [resolvable:$true] %s176_s28 }
   0xf   : > { %s5137_s30 = smov [#allocation10]   ;;  %s5138_s7 = smov [#allocation9]  }
  0x10   : > { %s6722_s26 = scalar_select %p5219_p8, 1, 0 }
  0x11   : > { %p4564_p9 = pneg %p5219_p8  ;;  %s200_s6 = sshll.u32 %s5137_s30, 4  ;;  %s5234_s6 = int_to_ptr.vmem [resolvable:$true] %s200_s6 }
  0x12   : > { %s5236_s8 = sshll.u32 %s5138_s7, 4  ;;  %s4918_s11 = scalar_lea.hbm %s6712_s1, 96  ;;  %s191_s8 = int_to_ptr.vmem [resolvable:$true] %s5236_s8 }
  0x13   : > { %p5230_p11 = pnand %p4564_p9, %p6717_p1  ;;  %p4919_p12 = scmp.ne.s32.totalorder %s6712_s1, %s4918_s11 }
  0x14   : > { %p4925_p5 = scmp.lt.u32.totalorder %s4918_s11, %s6712_s1 }
  0x15   : > { %p5246_p13 = pneg %p5230_p11 }
  0x17   : > { %p4921_p0 = pnand %p5246_p13, %p4919_p12 }
  0x19   : > { %p4922_p3 = pneg %p4921_p0 }
  0x1b   : > { %p4927_p7 = pnand %p4925_p5, %p4922_p3 }
  0x1d   : > { %4930 = shalt.err (!%p4927_p7)
}
  0x1e   : > { %s4931_s17 = scalar_lea.vmem %s5223_s28, 96  ;;  %p4939_p2 = scmp.lt.s32.totalorder %s5223_s28, %s5223_s28 }
  0x1f   : > { %p4932_p9 = scmp.ne.s32.totalorder %s5223_s28, %s4931_s17  ;;  %p4940_p6 = scmp.lt.s32.totalorder %s4931_s17, %s4931_s17 }
  0x21   : > { %p4934_p10 = pnand %p4932_p9, %p5246_p13  ;;  %p4941_p12 = por %p4940_p6, %p4939_p2 }
  0x23   : > { %p4935_p1 = pneg %p4934_p10 }
  0x25   : > { %p4942_p0 = pnand %p4941_p12, %p4935_p1 }
  0x27   : > { %4945 = shalt.err (!%p4942_p0)
}
  0x28   : > { %s5139_s23 = smov 32   ;;  %s5140_s27 = smov 2  }
  0x29   : > { %4567 = dma.hbm_to_vmem [thread:$0]  (!%p5230_p11), %s6712_s1, 96, %s5223_s28, [#allocation8], %s5139_s23, %s5139_s23, %s5140_s27  }
  0x2a   : > { %s4946_s11 = scalar_lea.hbm %s6714_s3, 96 }
  0x2b   : > { %p4947_p2 = scmp.ne.s32.totalorder %s6714_s3, %s4946_s11  ;;  %p4953_p10 = scmp.lt.u32.totalorder %s4946_s11, %s6714_s3 }
  0x2d   : > { %p4949_p1 = pnand %p4947_p2, %p5246_p13 }
  0x2f   : > { %p4950_p6 = pneg %p4949_p1 }
  0x31   : > { %p4955_p3 = pnand %p4953_p10, %p4950_p6 }
  0x33   : > { %4958 = shalt.err (!%p4955_p3)
}
  0x34   : > { %s4959_s28 = scalar_lea.vmem %s5234_s6, 96  ;;  %p4967_p12 = scmp.lt.s32.totalorder %s5234_s6, %s5234_s6 }
  0x35   : > { %p4960_p5 = scmp.ne.s32.totalorder %s5234_s6, %s4959_s28  ;;  %p4968_p0 = scmp.lt.s32.totalorder %s4959_s28, %s4959_s28 }
  0x37   : > { %p4962_p7 = pnand %p4960_p5, %p5246_p13  ;;  %p4969_p2 = por %p4968_p0, %p4967_p12 }
  0x39   : > { %p4963_p9 = pneg %p4962_p7 }
  0x3b   : > { %p4970_p1 = pnand %p4969_p2, %p4963_p9 }
  0x3d   : > { %4973 = shalt.err (!%p4970_p1)
}
  0x3e   : > { %4573 = dma.hbm_to_vmem [thread:$0]  (!%p5230_p11), %s6714_s3, 96, %s5234_s6, [#allocation11], %s5139_s23, %s5139_s23, %s5140_s27  }
  0x3f   : > { %s4974_s10 = scalar_lea.hbm %s6713_s2, 16 }
  0x40   : > { %p4975_p6 = scmp.ne.s32.totalorder %s6713_s2, %s4974_s10  ;;  %p4981_p5 = scmp.lt.u32.totalorder %s4974_s10, %s6713_s2 }
  0x42   : > { %p4977_p10 = pnand %p4975_p6, %p5246_p13 }
  0x44   : > { %p4978_p3 = pneg %p4977_p10 }
  0x46   : > { %p4983_p7 = pnand %p4981_p5, %p4978_p3 }
  0x48   : > { %4986 = shalt.err (!%p4983_p7)
}
  0x49   : > { %s4987_s16 = scalar_lea.vmem %s191_s8, 16  ;;  %s4994_s6 = scalar_lea.vmem %s191_s8, 32 }
  0x4a   : > { %p4988_p9 = scmp.ne.s32.totalorder %s191_s8, %s4987_s16  ;;  %p4995_p2 = scmp.lt.s32.totalorder %s191_s8, %s191_s8 }
  0x4b   : > { %p4996_p1 = scmp.lt.s32.totalorder %s4994_s6, %s4987_s16 }
  0x4c   : > { %p4990_p12 = pnand %p4988_p9, %p5246_p13 }
  0x4d   : > { %p4997_p4 = por %p4996_p1, %p4995_p2 }
  0x4e   : > { %p4991_p0 = pneg %p4990_p12 }
  0x50   : > { %p4998_p8 = pnand %p4997_p4, %p4991_p0 }
  0x52   : > { %5001 = shalt.err (!%p4998_p8)
}
  0x53   : > { %4570 = dma.hbm_to_vmem [thread:$0]  (!%p5230_p11), %s6713_s2, 16, %s191_s8, [#allocation8]  }
  0x54   : > { %s5141_s28 = smov [#allocation12]   ;;  %s5002_s9 = scalar_lea.hbm %s6715_s4, 16 }
  0x55   : > { %s214_s17 = sshll.u32 %s5141_s28, 4  ;;  %p5003_p6 = scmp.ne.s32.totalorder %s6715_s4, %s5002_s9  ;;  %s215_s17 = int_to_ptr.vmem [resolvable:$true] %s214_s17 }
  0x56   : > { %p5009_p10 = scmp.lt.u32.totalorder %s5002_s9, %s6715_s4 }
  0x57   : > { %p5005_p4 = pnand %p5003_p6, %p5246_p13 }
  0x59   : > { %p5006_p8 = pneg %p5005_p4 }
  0x5b   : > { %p5011_p3 = pnand %p5009_p10, %p5006_p8 }
  0x5d   : > { %5014 = shalt.err (!%p5011_p3)
}
  0x5e   : > { %s5015_s8 = scalar_lea.vmem %s215_s17, 16  ;;  %s5022_s15 = scalar_lea.vmem %s215_s17, 32 }
  0x5f   : > { %p5016_p5 = scmp.ne.s32.totalorder %s215_s17, %s5015_s8  ;;  %p5023_p12 = scmp.lt.s32.totalorder %s215_s17, %s215_s17 }
  0x60   : > { %p5024_p0 = scmp.lt.s32.totalorder %s5022_s15, %s5015_s8 }
  0x61   : > { %p5018_p7 = pnand %p5016_p5, %p5246_p13 }
  0x62   : > { %p5025_p2 = por %p5024_p0, %p5023_p12 }
  0x63   : > { %p5019_p9 = pneg %p5018_p7 }
  0x65   : > { %p5026_p1 = pnand %p5025_p2, %p5019_p9 }
  0x67   : > { %5029 = shalt.err (!%p5026_p1)
}
  0x68   : > { %4576 = dma.hbm_to_vmem [thread:$0]  (!%p5230_p11), %s6715_s4, 16, %s215_s17, [#allocation11]  }
  0x69   : > { %s5328_s14 = sadd.s32 1, %s5134_s21   ;;  %s30_s23 = sadd.s32 1, %s5130_s20 }
  0x6a   : > { %s27_s29 = ssub.s32 %s5134_s21, %s5328_s14  ;;  %p37_p13 = scmp.ne.s32.totalorder %s5130_s20, %s5126_s19 }
  0x6b   : > { %p28_p6 = scmp.eq.s32.totalorder %s27_s29, 0  ;;  %p38_p4 = scmp.eq.s32.totalorder %s5134_s21, 0 }
  0x6c   : > { %p6725_p8 = scmp.eq.s32.totalorder %s5200_s22, 1  ;;  %p4589_p3 = scmp.lt.s32.totalorder %s5134_s21, 2 }
  0x6d   : > { %s5344_s28 = scalar_select %p28_p6, %s5130_s20, %s30_s23  }
  0x6e   : > { %p5338_p10 = por %p6725_p8, %p37_p13  ;;  %p39_p5 = por %p38_p4, %p37_p13 }
  0x6f   : > { %s225_s30 = sand.u32 1, %s5130_s20   ;;  %s4070_s17 = sshll.u32 %s5134_s21, 12 }
  0x70   : > { %s3861_s7 = sshll.u32 %s225_s30, 8  ;;  %s5351_s11 = scalar_lea.hbm %s6711_s0, %s4070_s17 }
  0x71   : > { %s229_s12 = scalar_lea.vmem [#allocation4], %s3861_s7  ;;  %p5355_p11 = pnand %p4589_p3, %p39_p5 }
  0x72   : > { %s236_s13 = sshll.u32 %s229_s12, 4  ;;  %s5359_s15 = scalar_lea.sflag [#allocation5], %s225_s30  ;;  %s5353_s13 = int_to_ptr.vmem [resolvable:$true] %s236_s13 }
  0x73   : > { %s5030_s16 = scalar_lea.hbm %s5351_s11, 4096  ;;  %p5032_p9 = pneg %p5355_p11 }
  0x74   : > { %p5031_p7 = scmp.ne.s32.totalorder %s5351_s11, %s5030_s16  ;;  %s5035_s29 = scalar_lea.hbm %s6711_s0, 8192 }
  0x75   : > { %p5036_p2 = scmp.lt.u32.totalorder %s5351_s11, %s6711_s0  ;;  %p5037_p1 = scmp.lt.u32.totalorder %s5035_s29, %s5030_s16 }
  0x76   : > { %p5033_p12 = pnand %p5032_p9, %p5031_p7  ;;  %p5039_p6 = scmp.lt.u32.totalorder %s5030_s16, %s5351_s11 }
  0x77   : > { %p5038_p13 = por %p5037_p1, %p5036_p2 }
  0x78   : > { %p5034_p0 = pneg %p5033_p12 }
  0x79   : > { %p5040_p4 = por %p5039_p6, %p5038_p13 }
  0x7b   : > { %p5041_p8 = pnand %p5040_p4, %p5034_p0 }
  0x7d   : > { %5044 = shalt.err (!%p5041_p8)
}
  0x7e   : > { %s5045_s30 = scalar_lea.vmem %s5353_s13, 4096  ;;  %s5142_s9 = smov [#allocation4]  }
  0x7f   : > { %p5046_p3 = scmp.ne.s32.totalorder %s5353_s13, %s5045_s30  ;;  %s5050_s10 = sshll.u32 %s5142_s9, 4  ;;  %s5051_s10 = int_to_ptr.vmem [resolvable:$false] %s5050_s10 }
  0x80   : > { %s5052_s12 = scalar_lea.vmem %s5051_s10, 8192  ;;  %p5053_p12 = scmp.lt.s32.totalorder %s5353_s13, %s5051_s10 }
  0x81   : > { %p5048_p5 = pnand %p5046_p3, %p5032_p9  ;;  %p5054_p2 = scmp.lt.s32.totalorder %s5052_s12, %s5045_s30 }
  0x83   : > { %p5049_p7 = pneg %p5048_p5  ;;  %p5055_p1 = por %p5054_p2, %p5053_p12 }
  0x85   : > { %p5056_p13 = pnand %p5055_p1, %p5049_p7 }
  0x87   : > { %5059 = shalt.err (!%p5056_p13)
}
  0x88   : > { %s5143_s16 = smov 128   ;;  %s5144_s6 = smov 8  }
  0x89   : > { %4580 = dma.hbm_to_vmem [thread:$0]  (!%p5355_p11), %s5351_s11, 4096, %s5353_s13, %s5359_s15, %s5143_s16, %s5143_s16, %s5144_s6  }
  0x8a   : > { %p6728_p9 = scmp.ne.s32.totalorder %s6722_s26, 0 }
  0x8b   : > { %s5390_s23 = sand.u32 (!%p6728_p9), 1, %s5126_s19   ;;  %p6729_p0 = scmp.ne.s32.totalorder (!%p6728_p9), %s6720_s24, 0 }
  0x8c   : > { %248 = sbr.rel (%p6728_p9) target bundleno = 1097 (0x449), region = 40  ;;  %s3865_s29 = sshll.u32 (!%p6728_p9), %s5390_s23, 8 }
  0x8d   : > { %s251_s7 = scalar_lea.sflag (!%p6728_p9), [#allocation5], %s5390_s23  ;;  %s5396_s17 = scalar_lea.vmem (!%p6728_p9), [#allocation4], %s3865_s29 }
  0x93   : > { %5105 = dma.done.wait (%p6729_p0), %s251_s7, 4096  }
  0x94   : > { %5107 = vsyncadd (%p6729_p0), %s251_s7, 4294963200  ;;  %p6730_p11 = scmp.eq.s32.totalorder %s5200_s22, 0 }
  0x96   : > { %5109 = dma.done.wait (%p6730_p11), [#allocation8], 112   ;;  %p6731_p6 = pmov %p6730_p11 }
  0x98   : > { %5111 = vsyncadd (%p6731_p6), [#allocation8], 4294967184  ;;  %p6732_p4 = pmov %p6731_p6 }
  0x9a   : > { %5113 = dma.done.wait (%p6732_p4), [#allocation11], 112   ;;  %p6733_p8 = pmov %p6732_p4 }
  0x9b   : > { %vm298_vm0 = vcmask 24576   ;;  %vm299_vm1 = vsmask.f32 256  ;;  %vm349_vm2 = vsmask.f32 7938  ;;  %vm1502_vm4 = vcmask 1041408  }
  0x9c   : > { %5115 = vsyncadd (%p6733_p8), [#allocation11], 4294967184  ;;  %vm531_vm6 = vsmask.f32 4368  ;;  %v1405_v2 = vld [vmem:[#allocation7 + $0x2] sm:$0x3] }
  0x9d   : > { %vm5411_vm3 = vmand %vm298_vm0, %vm299_vm1  ;;  %v301_v3 = vld [vmem:[#allocation2] sm:$0x1]  ;;  %v351_v4 = vld [vmem:[#allocation2 + $0x8] sm:$0x1]  ;;  %4538 = vmatprep.subr.msk.bf16.mxu0 %vm1502_vm4, %v1405_v2  ;;  %v1504_v5 = vsel %vm1502_vm4, %v1405_v2, 0  ;;  %vm853_vm7 = vcmask 27648  }
  0x9e   : > { %vm5416_vm5 = vmand %vm298_vm0, %vm349_vm2  ;;  %v302_v6 = vsel %vm5411_vm3, 0, %v301_v3  ;;  %v403_v8 = vld [vmem:[%s5396_s17] sm:$0xff]  ;;  %v404_v9 = vld [vmem:[%s5396_s17 + $0x8] sm:$0xff]  ;;  %4207 = vmatpush3.bf16.msra.mxu0 %v1504_v5  ;;  %vm1017_vm10 = vsmask.f32 3328  ;;  %vm399_vm12 = vcmask 31744  }
  0x9f   : > { %v352_v7 = vsel %vm5416_vm5, 0, %v351_v4  ;;  %v405_v10 = vld [vmem:[%s5396_s17 + $0x10] sm:$0xff]  ;;  %303 = vst [vmem:[#allocation2] sm:$0x1] %v302_v6  ;;  %v4071_v11 = vpack.c.bf16 %v403_v8, %v403_v8  ;;  %v4072_v12 = vpack.c.bf16 %v404_v9, %v404_v9  ;;  %v5429_v13 = vld [vmem:[#allocation7] sm:$0x3]  ;;  %vm5444_vm8 = vmor %vm299_vm1, %vm531_vm6 }
  0xa0   : > { %353 = vst [vmem:[#allocation2 + $0x8] sm:$0x1] %v352_v7  ;;  %v304_v14 = vld [vmem:[#allocation2 + $0xc] sm:$0x1]  ;;  %v354_v15 = vld [vmem:[#allocation2 + $0x14] sm:$0x1]  ;;  %v4073_v16 = vpack.c.bf16 %v405_v10, %v405_v10  ;;  %4539 = vmatprep.subr.msk.bf16.mxu0 %vm1502_vm4, %v5429_v13  ;;  %vm5453_vm9 = vmand %vm853_vm7, %vm349_vm2 }
  0xa1   : > { %v305_v17 = vsel %vm5411_vm3, 0, %v304_v14  ;;  %v355_v18 = vsel %vm5416_vm5, 0, %v354_v15  ;;  %v406_v19 = vld [vmem:[%s5396_s17 + $0x18] sm:$0xff]  ;;  %v307_v20 = vld [vmem:[#allocation2 + $0x18] sm:$0x1]  ;;  %v534_v21 = vshrl.u32 %v4071_v11, 16 }
  0xa2   : > { %v537_v22 = vshll.u32 %v4071_v11, 16  ;;  %v542_v23 = vshrl.u32 %v4072_v12, 16  ;;  %v545_v24 = vshll.u32 %v4072_v12, 16  ;;  %306 = vst [vmem:[#allocation2 + $0xc] sm:$0x1] %v305_v17  ;;  %v4074_v26 = vpack.c.bf16 %v406_v19, %v406_v19  ;;  %v407_v30 = vld [vmem:[%s5396_s17 + $0x20] sm:$0xff] }
  0xa3   : > { %356 = vst [vmem:[#allocation2 + $0x14] sm:$0x1] %v355_v18  ;;  %v357_v25 = vld [vmem:[#allocation2 + $0x20] sm:$0x1]  ;;  %v551_v27 = vshrl.u32 %v4073_v16, 16  ;;  %v554_v28 = vshll.u32 %v4073_v16, 16  ;;  %v4075_v36 = vpack.c.bf16 %v407_v30, %v407_v30 }
  0xa4   : > { %v308_v29 = vsel %vm5411_vm3, 0, %v307_v20  ;;  %v408_v31 = vld [vmem:[%s5396_s17 + $0x28] sm:$0xff]  ;;  %v536_v33 = vrot.slane %v534_v21, 7  ;;  %v544_v34 = vrot.slane %v542_v23, 7  ;;  %v358_v35 = vsel %vm5416_vm5, 0, %v357_v25  ;;  %v409_v37 = vld [vmem:[%s5396_s17 + $0x30] sm:$0xff] }
  0xa5   : > { %309 = vst [vmem:[#allocation2 + $0x18] sm:$0x1] %v308_v29  ;;  %v553_v39 = vrot.slane %v551_v27, 7  ;;  %v559_v40 = vshrl.u32 %v4074_v26, 16  ;;  %v562_v41 = vshll.u32 %v4074_v26, 16  ;;  %v4076_v42 = vpack.c.bf16 %v408_v31, %v408_v31  ;;  %v410_v47 = vld [vmem:[%s5396_s17 + $0x38] sm:$0xff] }
  0xa6   : > { %359 = vst [vmem:[#allocation2 + $0x20] sm:$0x1] %v358_v35  ;;  %v539_v43 = vor.u32 %v537_v22, %v536_v33  ;;  %v540_v44 = vrot.slane %v536_v33, 4  ;;  %v547_v45 = vor.u32 %v545_v24, %v544_v34  ;;  %v549_v46 = vrot.slane %v544_v34, 4  ;;  %v855_v48 = vld [vmem:[#allocation2] sm:$0xf] }
  0xa7   : > { %v860_v49 = vld [vmem:[#allocation2 + $0x8] sm:$0x1]  ;;  %v556_v50 = vor.u32 %v554_v28, %v553_v39  ;;  %v557_v51 = vrot.slane %v553_v39, 4  ;;  %v561_v52 = vrot.slane %v559_v40, 7  ;;  %v5458_v53 = vpack.c.bf16 %v409_v37, %v409_v37  ;;  %v310_v58 = vld [vmem:[#allocation2 + $0x24] sm:$0x1] }
  0xa8   : > { %v548_v54 = vsel %vm5444_vm8, %v540_v44, %v547_v45  ;;  %v856_v55 = vsel %vm5453_vm9, %v539_v43, %v855_v48  ;;  %v861_v56 = vsel %vm5411_vm3, %v549_v46, %v860_v49  ;;  %v568_v57 = vshrl.u32 %v4075_v36, 16  ;;  %v360_v59 = vld [vmem:[#allocation2 + $0x2c] sm:$0x1]  ;;  %v313_v8 = vld [vmem:[#allocation2 + $0x30] sm:$0x1]  ;;  %v412_v34 = vld [vmem:[%s5396_s17 + $0x48] sm:$0xff] }
  0xa9   : > { %857 = vst [vmem:[#allocation2] sm:$0xf] %v856_v55  ;;  %859 = vst.msk [vmem:[#allocation2 + $0x4] sm:$0xf] %vm853_vm7, %v548_v54  ;;  %v564_v60 = vor.u32 %v562_v41, %v561_v52  ;;  %v566_v61 = vrot.slane %v561_v52, 4  ;;  %v571_v2 = vshll.u32 %v4075_v36, 16  ;;  %v4078_v3 = vpack.c.bf16 %v410_v47, %v410_v47 }
  0xaa   : > { %862 = vst [vmem:[#allocation2 + $0x8] sm:$0x1] %v861_v56  ;;  %v863_v62 = vld [vmem:[#allocation2 + $0xc] sm:$0xf]  ;;  %v867_v63 = vld [vmem:[#allocation2 + $0x14] sm:$0x1]  ;;  %v5502_v49 = vpack.c.bf16 %v412_v34, %v412_v34 }
  0xab   : > { %v864_v4 = vsel %vm5453_vm9, %v556_v50, %v863_v62  ;;  %v570_v5 = vrot.slane %v568_v57, 7  ;;  %v576_v6 = vshrl.u32 %v4076_v42, 16  ;;  %v579_v7 = vshll.u32 %v4076_v42, 16  ;;  %v363_v19 = vld [vmem:[#allocation2 + $0x38] sm:$0x1]  ;;  %v411_v24 = vld [vmem:[%s5396_s17 + $0x40] sm:$0xff] }
  0xac   : > { %vm1018_vm11 = vsmask.f32 7440  ;;  %v565_v9 = vsel %vm5444_vm8, %v557_v51, %v564_v60  ;;  %865 = vst [vmem:[#allocation2 + $0xc] sm:$0xf] %v864_v4  ;;  %v868_v10 = vsel %vm5411_vm3, %v566_v61, %v867_v63  ;;  %v870_v11 = vld [vmem:[#allocation2 + $0x18] sm:$0xf]  ;;  %v5498_v40 = vpack.c.bf16 %v411_v24, %v411_v24 }
  0xad   : > { %v311_v12 = vsel %vm5411_vm3, 0, %v310_v58  ;;  %v361_v14 = vsel %vm5416_vm5, 0, %v360_v59  ;;  %866 = vst.msk [vmem:[#allocation2 + $0x10] sm:$0xf] %vm853_vm7, %v565_v9  ;;  %869 = vst [vmem:[#allocation2 + $0x14] sm:$0x1] %v868_v10  ;;  %v573_v15 = vor.u32 %v571_v2, %v570_v5 }
  0xae   : > { %v574_v16 = vrot.slane %v570_v5, 4  ;;  %v578_v17 = vrot.slane %v576_v6, 7  ;;  %312 = vst [vmem:[#allocation2 + $0x24] sm:$0x1] %v311_v12  ;;  %362 = vst [vmem:[#allocation2 + $0x2c] sm:$0x1] %v361_v14 }
  0xaf   : > { %v585_v18 = vshrl.u32 %v5458_v53, 16  ;;  %v874_v20 = vld [vmem:[#allocation2 + $0x20] sm:$0x1]  ;;  %v593_v21 = vshrl.u32 %v4078_v3, 16  ;;  %v596_v22 = vshll.u32 %v4078_v3, 16  ;;  %v314_v23 = vsel %vm5411_vm3, 0, %v313_v8  ;;  %vm5507_vm13 = vmor %vm1017_vm10, %vm1018_vm11 }
  0xb0   : > { %v581_v25 = vor.u32 %v579_v7, %v578_v17  ;;  %v583_v26 = vrot.slane %v578_v17, 4  ;;  %v871_v27 = vsel %vm5453_vm9, %v573_v15, %v870_v11  ;;  %315 = vst [vmem:[#allocation2 + $0x30] sm:$0x1] %v314_v23  ;;  %v5486_v29 = vsel %vm1502_vm4, %v5429_v13, 0  ;;  %v968_v35 = vld [vmem:[#allocation2] sm:$0xf] }
  0xb1   : > { %v587_v28 = vrot.slane %v585_v18, 7  ;;  %872 = vst [vmem:[#allocation2 + $0x18] sm:$0xf] %v871_v27  ;;  %v588_v30 = vshll.u32 %v5458_v53, 16  ;;  %v5489_v31 = vrot.slane %v593_v21, 7  ;;  %v364_v33 = vsel %vm5416_vm5, 0, %v363_v19 }
  0xb2   : > { %v969_v36 = vld [vmem:[#allocation2 + $0x4] sm:$0xf]  ;;  %v1001_v37 = vld [vmem:[#allocation2 + $0x8] sm:$0x1]  ;;  %v582_v39 = vsel %vm5444_vm8, %v574_v16, %v581_v25  ;;  %v875_v13 = vsel %vm5411_vm3, %v583_v26, %v874_v20  ;;  %365 = vst [vmem:[#allocation2 + $0x38] sm:$0x1] %v364_v33 }
  0xb3   : > { %v1021_v41 = vshrl.u32 %v968_v35, 16  ;;  %v1024_v42 = vshll.u32 %v968_v35, 16  ;;  %v1030_v43 = vshll.u32 %v969_v36, 16  ;;  %v1034_v44 = vshrl.u32 %v969_v36, 16  ;;  %873 = vst.msk [vmem:[#allocation2 + $0x1c] sm:$0xf] %vm853_vm7, %v582_v39 }
  0xb4   : > { %876 = vst [vmem:[#allocation2 + $0x20] sm:$0x1] %v875_v13  ;;  %v1040_v45 = vshll.u32 %v1001_v37, 16  ;;  %v970_v46 = vld [vmem:[#allocation2 + $0xc] sm:$0xf]  ;;  %v591_v47 = vrot.slane %v587_v28, 4  ;;  %v598_v48 = vor.u32 %v596_v22, %v5489_v31  ;;  %v590_v8 = vor.u32 %v588_v30, %v587_v28 }
  0xb5   : > { %v413_v50 = vld [vmem:[%s5396_s17 + $0x50] sm:$0xff]  ;;  %v1023_v51 = vrot.slane %v1021_v41, 4  ;;  %v1026_v52 = vrot.slane %v1024_v42, 5  ;;  %v1032_v53 = vrot.slane %v1030_v43, 5  ;;  %v1036_v54 = vrot.slane %v1034_v44, 4  ;;  %s6480_s24 = scalar_lea.vmem [#allocation13], %s3865_s29 }
  0xb6   : > { %v971_v55 = vld [vmem:[#allocation2 + $0x10] sm:$0xf]  ;;  %v1042_v56 = vrot.slane %v1040_v45, 5  ;;  %v1002_v57 = vld [vmem:[#allocation2 + $0x14] sm:$0x1]  ;;  %v1045_v58 = vshrl.u32 %v970_v46, 16  ;;  %v5511_v12 = vpack.c.bf16 %v413_v50, %v413_v50  ;;  %v599_v19 = vsel %vm5444_vm8, %v591_v47, %v598_v48 }
  0xb7   : > { %v1048_v59 = vshll.u32 %v970_v46, 16  ;;  %v1054_v60 = vshll.u32 %v971_v55, 16  ;;  %v1027_v61 = vor.u32 %v1026_v52, %v1023_v51  ;;  %v1037_v62 = vor.u32 %v1036_v54, %v1032_v53  ;;  %v877_v24 = vld [vmem:[#allocation2 + $0x24] sm:$0xf]  ;;  %880 = vst.msk [vmem:[#allocation2 + $0x28] sm:$0xf] %vm853_vm7, %v599_v19 }
  0xb8   : > { %v1058_v63 = vshrl.u32 %v971_v55, 16  ;;  %v1064_v2 = vshll.u32 %v1002_v57, 16  ;;  %v1047_v4 = vrot.slane %v1045_v58, 4  ;;  %v972_v7 = vld [vmem:[#allocation2 + $0x18] sm:$0xf]  ;;  %v600_v13 = vrot.slane %v5489_v31, 4 }
  0xb9   : > { %v1050_v5 = vrot.slane %v1048_v59, 5  ;;  %v1056_v6 = vrot.slane %v1054_v60, 5  ;;  %v1028_v9 = vrot.slane %v1027_v61, 4  ;;  %v1038_v10 = vrot.slane %v1037_v62, 4  ;;  %v881_v36 = vld [vmem:[#allocation2 + $0x2c] sm:$0x1] }
  0xba   : > { %v1060_v11 = vrot.slane %v1058_v63, 4  ;;  %v1066_v15 = vrot.slane %v1064_v2, 5  ;;  %v973_v16 = vld [vmem:[#allocation2 + $0x1c] sm:$0xf]  ;;  %v1069_v18 = vshrl.u32 %v972_v7, 16  ;;  %v1072_v23 = vshll.u32 %v972_v7, 16 }
  0xbb   : > { %v1051_v14 = vor.u32 %v1050_v5, %v1047_v4  ;;  %v1003_v17 = vld [vmem:[#allocation2 + $0x20] sm:$0x1]  ;;  %v1033_v20 = vsel %vm5507_vm13, %v1028_v9, %v1032_v53  ;;  %v1043_v21 = vsel %vm5507_vm13, %v1038_v10, %v1042_v56  ;;  %v1078_v28 = vshll.u32 %v973_v16, 16  ;;  %v316_v42 = vld [vmem:[#allocation2 + $0x3c] sm:$0x1]  ;;  %v414_v48 = vld [vmem:[%s5396_s17 + $0x58] sm:$0xff] }
  0xbc   : > { %v1061_v22 = vor.u32 %v1060_v11, %v1056_v6  ;;  %v3903_v25 = vcombine.low %v1033_v20, %v1043_v21  ;;  %v1071_v27 = vrot.slane %v1069_v18, 4  ;;  %v1074_v33 = vrot.slane %v1072_v23, 5  ;;  %v366_v47 = vld [vmem:[#allocation2 + $0x44] sm:$0x1]  ;;  %v888_v10 = vld [vmem:[#allocation2 + $0x38] sm:$0x1] }
  0xbd   : > { %v1052_v26 = vrot.slane %v1051_v14, 4  ;;  %v1082_v34 = vshrl.u32 %v973_v16, 16  ;;  %v1088_v35 = vshll.u32 %v1003_v17, 16  ;;  %v1080_v39 = vrot.slane %v1078_v28, 5  ;;  %v319_v23 = vld [vmem:[#allocation2 + $0x48] sm:$0x1] }
  0xbe   : > { %v1062_v30 = vrot.slane %v1061_v22, 4  ;;  %4208 = vmatprep.mubr.msk.bf16.mxu0 %vm399_vm12, %v3903_v25  ;;  %v878_v41 = vsel %vm5453_vm9, %v590_v8, %v877_v24  ;;  %v1075_v44 = vor.u32 %v1074_v33, %v1071_v27  ;;  %v882_v51 = vsel %vm5411_vm3, %v600_v13, %v881_v36  ;;  %v975_v57 = vld [vmem:[#allocation2 + $0x28] sm:$0xf]  ;;  %v415_v24 = vld [vmem:[%s5396_s17 + $0x60] sm:$0xff]  ;;  %s4103_s26 = sshll.u32 %s5200_s22, 12  ;;  %s3743_s11 = sshll.u32 %s6480_s24, 4  ;;  %s6661_s11 = int_to_ptr.vmem [resolvable:$true] %s3743_s11 }
  0xbf   : > { %v1057_v37 = vsel %vm5507_vm13, %v1052_v26, %v1056_v6  ;;  %v1084_v45 = vrot.slane %v1082_v34, 4  ;;  %v1090_v46 = vrot.slane %v1088_v35, 5  ;;  %879 = vst [vmem:[#allocation2 + $0x24] sm:$0xf] %v878_v41  ;;  %v602_v52 = vshrl.u32 %v5498_v40, 16  ;;  %s6659_s15 = scalar_lea.hbm %s6716_s5, %s4103_s26  ;;  %s3730_s22 = scalar_lea.sflag [#allocation6], %s5390_s23 }
  0xc0   : > { %v1067_v43 = vsel %vm5507_vm13, %v1062_v30, %v1066_v15  ;;  %v605_v31 = vshll.u32 %v5498_v40, 16  ;;  %v1076_v53 = vrot.slane %v1075_v44, 4  ;;  %883 = vst [vmem:[#allocation2 + $0x2c] sm:$0x1] %v882_v51  ;;  %v610_v55 = vshrl.u32 %v5502_v49, 16  ;;  %s5060_s30 = scalar_lea.vmem %s6661_s11, 4096 }
  0xc1   : > { %v3904_v50 = vcombine.low %v1057_v37, %v1067_v43  ;;  %v1085_v54 = vor.u32 %v1084_v45, %v1080_v39  ;;  %v613_v56 = vshll.u32 %v5502_v49, 16  ;;  %v604_v58 = vrot.slane %v602_v52, 7  ;;  %v884_v49 = vld [vmem:[#allocation2 + $0x30] sm:$0xf]  ;;  %v416_v37 = vld [vmem:[%s5396_s17 + $0x68] sm:$0xff]  ;;  %p5061_p3 = scmp.ne.s32.totalorder %s6661_s11, %s5060_s30  ;;  %s5146_s9 = smov [#allocation13]  }
  0xc2   : > { %v317_v59 = vsel %vm5411_vm3, 0, %v316_v42  ;;  %v367_v60 = vsel %vm5416_vm5, 0, %v366_v47  ;;  %v4082_v61 = vpack.c.bf16 %v414_v48, %v414_v48  ;;  %v1081_v40 = vsel %vm5507_vm13, %v1076_v53, %v1080_v39  ;;  %v369_v30 = vld [vmem:[#allocation2 + $0x50] sm:$0x1]  ;;  %s5064_s10 = sshll.u32 %s5146_s9, 4  ;;  %s5065_s10 = int_to_ptr.vmem [resolvable:$false] %s5064_s10 }
  0xc3   : > { %4209 = vmatmul.mubr.msk.bf16.vlgmr.msra.gmra.mrb[0].mxu0 %vm399_vm12, %v3904_v50  ;;  %v1086_v62 = vrot.slane %v1085_v54, 4  ;;  %v1102_v63 = vshll.u32 %v975_v57, 16  ;;  %v1106_v2 = vshrl.u32 %v975_v57, 16  ;;  %318 = vst [vmem:[#allocation2 + $0x3c] sm:$0x1] %v317_v59  ;;  %v607_v4 = vor.u32 %v605_v31, %v604_v58  ;;  %v417_v59 = vld [vmem:[%s5396_s17 + $0x70] sm:$0xff]  ;;  %p5062_p5 = pnand %p5061_p3, %p5338_p10  ;;  %p5067_p12 = scmp.lt.s32.totalorder %s6661_s11, %s5065_s10 }
  0xc4   : > { %4241 = vmatpush3.bf16.msra.mxu0 %v5486_v29  ;;  %368 = vst [vmem:[#allocation2 + $0x44] sm:$0x1] %v367_v60  ;;  %v608_v5 = vrot.slane %v604_v58, 4  ;;  %v612_v6 = vrot.slane %v610_v55, 7  ;;  %v619_v7 = vshrl.u32 %v5511_v12, 16  ;;  %v622_v11 = vshll.u32 %v5511_v12, 16 }
  0xc5   : > { %v1091_v8 = vsel %vm5507_vm13, %v1086_v62, %v1090_v46  ;;  %v5546_v9 = vrot.slane %v1102_v63, 5  ;;  %v1108_v29 = vrot.slane %v1106_v2, 4  ;;  %v885_v18 = vsel %vm5453_vm9, %v607_v4, %v884_v49  ;;  %v2123_v50 = vld [vmem:[#allocation7 + $0x4] sm:$0x3]  ;;  %p5063_p7 = pneg %p5062_p5  ;;  %s5066_s12 = scalar_lea.vmem %s5065_s10, 8192 }
  0xc6   : > { %v3905_v14 = vcombine.low %v1081_v40, %v1091_v8  ;;  %v974_v15 = vld [vmem:[#allocation2 + $0x24] sm:$0xf]  ;;  %v615_v16 = vor.u32 %v613_v56, %v612_v6  ;;  %v617_v17 = vrot.slane %v612_v6, 4  ;;  %886 = vst [vmem:[#allocation2 + $0x30] sm:$0xf] %v885_v18  ;;  %v621_v22 = vrot.slane %v619_v7, 7  ;;  %4540 = vmatprep.subr.msk.bf16.mxu0 %vm1502_vm4, %v2123_v50  ;;  %p5068_p2 = scmp.lt.s32.totalorder %s5066_s12, %s5060_s30 }
  0xc7   : > { %v1093_v19 = vshrl.u32 %v974_v15, 16  ;;  %v1096_v20 = vshll.u32 %v974_v15, 16  ;;  %v1109_v21 = vor.u32 %v1108_v29, %v5546_v9  ;;  %v1004_v25 = vld [vmem:[#allocation2 + $0x2c] sm:$0x1]  ;;  %v627_v27 = vshrl.u32 %v4082_v61, 16 }
  0xc8   : > { %4212 = vmatprep.mubr.msk.bf16.mxu0 %vm399_vm12, %v3905_v14  ;;  %v616_v12 = vsel %vm5444_vm8, %v608_v5, %v615_v16  ;;  %v889_v26 = vsel %vm5411_vm3, %v617_v17, %v888_v10  ;;  %v630_v28 = vshll.u32 %v4082_v61, 16  ;;  %v1112_v36 = vshll.u32 %v1004_v25, 16  ;;  %v322_v58 = vld [vmem:[#allocation2 + $0x54] sm:$0x1]  ;;  %p5069_p1 = por %p5068_p2, %p5067_p12 }
  0xc9   : > { %v1095_v33 = vrot.slane %v1093_v19, 4  ;;  %v1098_v34 = vrot.slane %v1096_v20, 5  ;;  %v1110_v35 = vrot.slane %v1109_v21, 4  ;;  %887 = vst.msk [vmem:[#allocation2 + $0x34] sm:$0xf] %vm853_vm7, %v616_v12  ;;  %v624_v39 = vor.u32 %v622_v11, %v621_v22 }
  0xca   : > { %890 = vst [vmem:[#allocation2 + $0x38] sm:$0x1] %v889_v26  ;;  %v625_v13 = vrot.slane %v621_v22, 4  ;;  %v629_v41 = vrot.slane %v627_v27, 7  ;;  %v891_v42 = vld [vmem:[#allocation2 + $0x3c] sm:$0xf]  ;;  %v4083_v44 = vpack.c.bf16 %v415_v24, %v415_v24  ;;  %v4084_v53 = vpack.c.bf16 %v416_v37, %v416_v37  ;;  %p5070_p13 = pnand %p5069_p1, %p5063_p7 }
  0xcb   : > { %v895_v43 = vld [vmem:[#allocation2 + $0x44] sm:$0x1]  ;;  %v1099_v45 = vor.u32 %v1098_v34, %v1095_v33  ;;  %v1114_v46 = vrot.slane %v1112_v36, 5  ;;  %v320_v47 = vsel %vm5411_vm3, 0, %v319_v23  ;;  %v370_v48 = vsel %vm5416_vm5, 0, %v369_v30  ;;  %v418_v26 = vld [vmem:[%s5396_s17 + $0x78] sm:$0xff] }
  0xcc   : > { %v632_v51 = vor.u32 %v630_v28, %v629_v41  ;;  %v634_v52 = vrot.slane %v629_v41, 4  ;;  %v892_v31 = vsel %vm5453_vm9, %v624_v39, %v891_v42  ;;  %321 = vst [vmem:[#allocation2 + $0x48] sm:$0x1] %v320_v47  ;;  %371 = vst [vmem:[#allocation2 + $0x50] sm:$0x1] %v370_v48  ;;  %v636_v56 = vshrl.u32 %v4083_v44, 16 }
  0xcd   : > { %v1100_v54 = vrot.slane %v1099_v45, 4  ;;  %v1115_v55 = vsel %vm5507_vm13, %v1110_v35, %v1114_v46  ;;  %893 = vst [vmem:[#allocation2 + $0x3c] sm:$0xf] %v892_v31  ;;  %v639_v57 = vshll.u32 %v4083_v44, 16  ;;  %v976_v60 = vld [vmem:[#allocation2 + $0x30] sm:$0xf]  ;;  %v4085_v11 = vpack.c.bf16 %v417_v59, %v417_v59 }
  0xce   : > { %v633_v61 = vsel %vm5444_vm8, %v625_v13, %v632_v51  ;;  %v896_v40 = vsel %vm5411_vm3, %v634_v52, %v895_v43  ;;  %v644_v62 = vshrl.u32 %v4084_v53, 16  ;;  %v647_v63 = vshll.u32 %v4084_v53, 16  ;;  %v419_v59 = vld [vmem:[%s5396_s17 + $0x80] sm:$0xff] }
  0xcf   : > { %v1105_v2 = vsel %vm5507_vm13, %v1100_v54, %v5546_v9  ;;  %v1117_v49 = vshrl.u32 %v976_v60, 16  ;;  %v1120_v4 = vshll.u32 %v976_v60, 16  ;;  %894 = vst.msk [vmem:[#allocation2 + $0x40] sm:$0xf] %vm853_vm7, %v633_v61  ;;  %897 = vst [vmem:[#allocation2 + $0x44] sm:$0x1] %v896_v40  ;;  %v4086_v44 = vpack.c.bf16 %v418_v26, %v418_v26 }
  0xd0   : > { %v638_v5 = vrot.slane %v636_v56, 7  ;;  %v3906_v6 = vcombine.low %v1105_v2, %v1115_v55  ;;  %v977_v7 = vld [vmem:[#allocation2 + $0x34] sm:$0xf]  ;;  %v646_v29 = vrot.slane %v644_v62, 7  ;;  %v323_v10 = vsel %vm5411_vm3, 0, %v322_v58  ;;  %v420_v60 = vld [vmem:[%s5396_s17 + $0x88] sm:$0xff] }
  0xd1   : > { %v1005_v8 = vld [vmem:[#allocation2 + $0x38] sm:$0x1]  ;;  %v1119_v14 = vrot.slane %v1117_v49, 4  ;;  %v1122_v15 = vrot.slane %v1120_v4, 5  ;;  %v1126_v16 = vshll.u32 %v977_v7, 16  ;;  %v1130_v17 = vshrl.u32 %v977_v7, 16 }
  0xd2   : > { %324 = vst [vmem:[#allocation2 + $0x54] sm:$0x1] %v323_v10  ;;  %v372_v9 = vld [vmem:[#allocation2 + $0x5c] sm:$0x1]  ;;  %4213 = vmatmul.mubr.msk.bf16.gmra.mrb[4].mxu0 %vm399_vm12, %v3906_v6  ;;  %v1136_v18 = vshll.u32 %v1005_v8, 16  ;;  %v641_v19 = vor.u32 %v639_v57, %v638_v5  ;;  %v642_v20 = vrot.slane %v638_v5, 4  ;;  %v649_v21 = vor.u32 %v647_v63, %v646_v29 }
  0xd3   : > { %v1123_v22 = vor.u32 %v1122_v15, %v1119_v14  ;;  %v1128_v23 = vrot.slane %v1126_v16, 5  ;;  %v1132_v24 = vrot.slane %v1130_v17, 4  ;;  %v651_v25 = vrot.slane %v646_v29, 4  ;;  %v898_v12 = vld [vmem:[#allocation2 + $0x48] sm:$0xf]  ;;  %v421_v61 = vld [vmem:[%s5396_s17 + $0x90] sm:$0xff] }
  0xd4   : > { %v1138_v27 = vrot.slane %v1136_v18, 5  ;;  %v978_v28 = vld [vmem:[#allocation2 + $0x3c] sm:$0xf]  ;;  %v650_v30 = vsel %vm5444_vm8, %v642_v20, %v649_v21  ;;  %v899_v33 = vsel %vm5453_vm9, %v641_v19, %v898_v12  ;;  %v902_v34 = vld [vmem:[#allocation2 + $0x50] sm:$0x1]  ;;  %v373_v35 = vsel %vm5416_vm5, 0, %v372_v9 }
  0xd5   : > { %v1124_v36 = vrot.slane %v1123_v22, 4  ;;  %v1133_v37 = vor.u32 %v1132_v24, %v1128_v23  ;;  %v1141_v39 = vshrl.u32 %v978_v28, 16  ;;  %v1144_v13 = vshll.u32 %v978_v28, 16  ;;  %900 = vst [vmem:[#allocation2 + $0x48] sm:$0xf] %v899_v33 }
  0xd6   : > { %901 = vst.msk [vmem:[#allocation2 + $0x4c] sm:$0xf] %vm853_vm7, %v650_v30  ;;  %374 = vst [vmem:[#allocation2 + $0x5c] sm:$0x1] %v373_v35  ;;  %v979_v41 = vld [vmem:[#allocation2 + $0x40] sm:$0xf]  ;;  %v903_v43 = vsel %vm5411_vm3, %v651_v25, %v902_v34  ;;  %v4088_v14 = vpack.c.bf16 %v420_v60, %v420_v60  ;;  %v5603_v15 = vpack.c.bf16 %v421_v61, %v421_v61 }
  0xd7   : > { %v1006_v42 = vld [vmem:[#allocation2 + $0x44] sm:$0x1]  ;;  %v653_v45 = vshrl.u32 %v4085_v11, 16  ;;  %v656_v46 = vshll.u32 %v4085_v11, 16  ;;  %v1129_v47 = vsel %vm5507_vm13, %v1124_v36, %v1128_v23  ;;  %v1134_v48 = vrot.slane %v1133_v37, 4  ;;  %v423_v61 = vld [vmem:[%s5396_s17 + $0xa0] sm:$0xff] }
  0xd8   : > { %v1143_v50 = vrot.slane %v1141_v39, 4  ;;  %v1146_v51 = vrot.slane %v1144_v13, 5  ;;  %904 = vst [vmem:[#allocation2 + $0x50] sm:$0x1] %v903_v43  ;;  %v1150_v52 = vshll.u32 %v979_v41, 16  ;;  %v1154_v31 = vshrl.u32 %v979_v41, 16 }
  0xd9   : > { %v1160_v53 = vshll.u32 %v1006_v42, 16  ;;  %v655_v54 = vrot.slane %v653_v45, 7  ;;  %v1139_v55 = vsel %vm5507_vm13, %v1134_v48, %v1138_v27  ;;  %v661_v57 = vshrl.u32 %v4086_v44, 16  ;;  %v905_v10 = vld [vmem:[#allocation2 + $0x54] sm:$0xf]  ;;  %v422_v48 = vld [vmem:[%s5396_s17 + $0x98] sm:$0xff] }
  0xda   : > { %v1147_v56 = vor.u32 %v1146_v51, %v1143_v50  ;;  %v664_v58 = vshll.u32 %v4086_v44, 16  ;;  %v3907_v40 = vcombine.low %v1129_v47, %v1139_v55  ;;  %v1152_v62 = vrot.slane %v1150_v52, 5  ;;  %v325_v20 = vld [vmem:[#allocation2 + $0x60] sm:$0x1]  ;;  %v375_v30 = vld [vmem:[#allocation2 + $0x68] sm:$0x1] }
  0xdb   : > { %v1156_v63 = vrot.slane %v1154_v31, 4  ;;  %v1162_v2 = vrot.slane %v1160_v53, 5  ;;  %v658_v4 = vor.u32 %v656_v46, %v655_v54  ;;  %v659_v5 = vrot.slane %v655_v54, 4  ;;  %v328_v42 = vld [vmem:[#allocation2 + $0x6c] sm:$0x1] }
  0xdc   : > { %v1148_v49 = vrot.slane %v1147_v56, 4  ;;  %v663_v6 = vrot.slane %v661_v57, 7  ;;  %4216 = vmatprep.mubr.msk.bf16.mxu0 %vm399_vm12, %v3907_v40  ;;  %v5599_v8 = vld [vmem:[#allocation2 + $0x48] sm:$0xf]  ;;  %v4087_v11 = vpack.c.bf16 %v419_v59, %v419_v59  ;;  %v378_v43 = vld [vmem:[#allocation2 + $0x74] sm:$0x1]  ;;  %v4090_v59 = vpack.c.bf16 %v422_v48, %v422_v48 }
  0xdd   : > { %v1157_v7 = vor.u32 %v1156_v63, %v1152_v62  ;;  %v5601_v29 = vld [vmem:[#allocation2 + $0x4c] sm:$0xf]  ;;  %v1165_v17 = vshrl.u32 %v5599_v8, 16  ;;  %v1168_v9 = vshll.u32 %v5599_v8, 16  ;;  %v909_v19 = vld [vmem:[#allocation2 + $0x5c] sm:$0x1]  ;;  %v906_v36 = vsel %vm5453_vm9, %v658_v4, %v905_v10 }
  0xde   : > { %v1153_v16 = vsel %vm5507_vm13, %v1148_v49, %v1152_v62  ;;  %v1174_v18 = vshll.u32 %v5601_v29, 16  ;;  %v1178_v23 = vshrl.u32 %v5601_v29, 16  ;;  %v666_v24 = vor.u32 %v664_v58, %v663_v6  ;;  %907 = vst [vmem:[#allocation2 + $0x54] sm:$0xf] %v906_v36  ;;  %v424_v40 = vld [vmem:[%s5396_s17 + $0xa8] sm:$0xff] }
  0xdf   : > { %v1158_v21 = vrot.slane %v1157_v7, 4  ;;  %v1007_v22 = vld [vmem:[#allocation2 + $0x50] sm:$0x1]  ;;  %v668_v25 = vrot.slane %v663_v6, 4  ;;  %v1167_v12 = vrot.slane %v1165_v17, 4  ;;  %v1170_v26 = vrot.slane %v1168_v9, 5 }
  0xe0   : > { %v1176_v27 = vrot.slane %v1174_v18, 5  ;;  %v1184_v28 = vshll.u32 %v1007_v22, 16  ;;  %v1180_v34 = vrot.slane %v1178_v23, 4  ;;  %v667_v35 = vsel %vm5444_vm8, %v659_v5, %v666_v24  ;;  %v331_v17 = vld [vmem:[#allocation2 + $0x78] sm:$0x1] }
  0xe1   : > { %v1163_v33 = vsel %vm5507_vm13, %v1158_v21, %v1162_v2  ;;  %v1171_v39 = vor.u32 %v1170_v26, %v1167_v12  ;;  %908 = vst.msk [vmem:[#allocation2 + $0x58] sm:$0xf] %vm853_vm7, %v667_v35  ;;  %v910_v41 = vsel %vm5411_vm3, %v668_v25, %v909_v19  ;;  %v326_v45 = vsel %vm5411_vm3, 0, %v325_v20  ;;  %v381_v35 = vld [vmem:[#allocation2 + $0x80] sm:$0x1] }
  0xe2   : > { %v3908_v37 = vcombine.low %v1153_v16, %v1163_v33  ;;  %v1186_v13 = vrot.slane %v1184_v28, 5  ;;  %v1181_v44 = vor.u32 %v1180_v34, %v1176_v27  ;;  %911 = vst [vmem:[#allocation2 + $0x5c] sm:$0x1] %v910_v41  ;;  %v376_v46 = vsel %vm5416_vm5, 0, %v375_v30  ;;  %327 = vst [vmem:[#allocation2 + $0x60] sm:$0x1] %v326_v45 }
  0xe3   : > { %v670_v47 = vshrl.u32 %v4087_v11, 16  ;;  %v1172_v50 = vrot.slane %v1171_v39, 4  ;;  %377 = vst [vmem:[#allocation2 + $0x68] sm:$0x1] %v376_v46  ;;  %v673_v51 = vshll.u32 %v4087_v11, 16  ;;  %v678_v52 = vshrl.u32 %v4088_v14, 16 }
  0xe4   : > { %4217 = vmatmul.mubr.msk.bf16.gmra.mrb[8].mxu0 %vm399_vm12, %v3908_v37  ;;  %v681_v31 = vshll.u32 %v4088_v14, 16  ;;  %v1182_v53 = vrot.slane %v1181_v44, 4  ;;  %v329_v55 = vsel %vm5411_vm3, 0, %v328_v42  ;;  %v379_v56 = vsel %vm5416_vm5, 0, %v378_v43 }
  0xe5   : > { %v672_v54 = vrot.slane %v670_v47, 7  ;;  %v1177_v57 = vsel %vm5507_vm13, %v1172_v50, %v1176_v27  ;;  %v680_v58 = vrot.slane %v678_v52, 7  ;;  %330 = vst [vmem:[#allocation2 + $0x6c] sm:$0x1] %v329_v55  ;;  %380 = vst [vmem:[#allocation2 + $0x74] sm:$0x1] %v379_v56  ;;  %v4091_v9 = vpack.c.bf16 %v423_v61, %v423_v61 }
  0xe6   : > { %v687_v60 = vshrl.u32 %v5603_v15, 16  ;;  %v1187_v62 = vsel %vm5507_vm13, %v1182_v53, %v1186_v13  ;;  %v690_v49 = vshll.u32 %v5603_v15, 16  ;;  %v5638_v10 = vld [vmem:[#allocation2 + $0x54] sm:$0xf]  ;;  %v695_v14 = vshrl.u32 %v4090_v59, 16  ;;  %v425_v61 = vld [vmem:[%s5396_s17 + $0xb0] sm:$0xff] }
  0xe7   : > { %v675_v63 = vor.u32 %v673_v51, %v672_v54  ;;  %v676_v2 = vrot.slane %v672_v54, 4  ;;  %v3909_v4 = vcombine.low %v1177_v57, %v1187_v62  ;;  %v683_v5 = vor.u32 %v681_v31, %v680_v58  ;;  %v334_v52 = vld [vmem:[#allocation2 + $0x84] sm:$0x1]  ;;  %v384_v56 = vld [vmem:[#allocation2 + $0x8c] sm:$0x1] }
  0xe8   : > { %v685_v6 = vrot.slane %v680_v58, 4  ;;  %v689_v7 = vrot.slane %v687_v60, 7  ;;  %v5640_v11 = vld [vmem:[#allocation2 + $0x58] sm:$0xf]  ;;  %v698_v16 = vshll.u32 %v4090_v59, 16  ;;  %v5642_v18 = vpack.c.bf16 %v424_v40, %v424_v40  ;;  %v426_v40 = vld [vmem:[%s5396_s17 + $0xb8] sm:$0xff] }
  0xe9   : > { %4220 = vmatprep.mubr.msk.bf16.mxu0 %vm399_vm12, %v3909_v4  ;;  %v1008_v19 = vld [vmem:[#allocation2 + $0x5c] sm:$0x1]  ;;  %v1189_v20 = vshrl.u32 %v5638_v10, 16  ;;  %v1192_v15 = vshll.u32 %v5638_v10, 16  ;;  %v1198_v21 = vshll.u32 %v5640_v11, 16  ;;  %v1202_v22 = vshrl.u32 %v5640_v11, 16 }
  0xea   : > { %v1208_v23 = vshll.u32 %v1008_v19, 16  ;;  %v684_v24 = vsel %vm5444_vm8, %v676_v2, %v683_v5  ;;  %v912_v25 = vld [vmem:[#allocation2 + $0x60] sm:$0xf]  ;;  %v916_v12 = vld [vmem:[#allocation2 + $0x68] sm:$0x1]  ;;  %v692_v26 = vor.u32 %v690_v49, %v689_v7  ;;  %v693_v27 = vrot.slane %v689_v7, 4 }
  0xeb   : > { %v1191_v28 = vrot.slane %v1189_v20, 4  ;;  %v1194_v30 = vrot.slane %v1192_v15, 5  ;;  %v1200_v33 = vrot.slane %v1198_v21, 5  ;;  %v1204_v34 = vrot.slane %v1202_v22, 4  ;;  %915 = vst.msk [vmem:[#allocation2 + $0x64] sm:$0xf] %vm853_vm7, %v684_v24 }
  0xec   : > { %v1210_v36 = vrot.slane %v1208_v23, 5  ;;  %v913_v37 = vsel %vm5453_vm9, %v675_v63, %v912_v25  ;;  %v917_v39 = vsel %vm5411_vm3, %v685_v6, %v916_v12  ;;  %v697_v13 = vrot.slane %v695_v14, 7  ;;  %v919_v41 = vld [vmem:[#allocation2 + $0x6c] sm:$0xf]  ;;  %v923_v45 = vld [vmem:[#allocation2 + $0x74] sm:$0x1] }
  0xed   : > { %v1195_v42 = vor.u32 %v1194_v30, %v1191_v28  ;;  %v1205_v43 = vor.u32 %v1204_v34, %v1200_v33  ;;  %914 = vst [vmem:[#allocation2 + $0x60] sm:$0xf] %v913_v37  ;;  %918 = vst [vmem:[#allocation2 + $0x68] sm:$0x1] %v917_v39  ;;  %v920_v44 = vsel %vm5453_vm9, %v692_v26, %v919_v41  ;;  %v332_v46 = vsel %vm5411_vm3, 0, %v331_v17  ;;  %v427_v15 = vld [vmem:[%s5396_s17 + $0xc0] sm:$0xff] }
  0xee   : > { %v700_v47 = vor.u32 %v698_v16, %v697_v13  ;;  %v702_v48 = vrot.slane %v697_v13, 4  ;;  %921 = vst [vmem:[#allocation2 + $0x6c] sm:$0xf] %v920_v44  ;;  %333 = vst [vmem:[#allocation2 + $0x78] sm:$0x1] %v332_v46  ;;  %v382_v50 = vsel %vm5416_vm5, 0, %v381_v35  ;;  %v4093_v23 = vpack.c.bf16 %v425_v61, %v425_v61 }
  0xef   : > { %v704_v51 = vshrl.u32 %v4091_v9, 16  ;;  %v1196_v31 = vrot.slane %v1195_v42, 4  ;;  %v1206_v53 = vrot.slane %v1205_v43, 4  ;;  %383 = vst [vmem:[#allocation2 + $0x80] sm:$0x1] %v382_v50  ;;  %v707_v54 = vshll.u32 %v4091_v9, 16 }
  0xf0   : > { %v712_v55 = vshrl.u32 %v5642_v18, 16  ;;  %v701_v57 = vsel %vm5444_vm8, %v693_v27, %v700_v47  ;;  %v924_v58 = vsel %vm5411_vm3, %v702_v48, %v923_v45  ;;  %v715_v60 = vshll.u32 %v5642_v18, 16  ;;  %v337_v4 = vld [vmem:[#allocation2 + $0x90] sm:$0x1]  ;;  %v387_v5 = vld [vmem:[#allocation2 + $0x98] sm:$0x1] }
  0xf1   : > { %v706_v59 = vrot.slane %v704_v51, 7  ;;  %v1201_v62 = vsel %vm5507_vm13, %v1196_v31, %v1200_v33  ;;  %v1211_v63 = vsel %vm5507_vm13, %v1206_v53, %v1210_v36  ;;  %922 = vst.msk [vmem:[#allocation2 + $0x70] sm:$0xf] %vm853_vm7, %v701_v57  ;;  %925 = vst [vmem:[#allocation2 + $0x74] sm:$0x1] %v924_v58  ;;  %v335_v49 = vsel %vm5411_vm3, 0, %v334_v52 }
  0xf2   : > { %v714_v2 = vrot.slane %v712_v55, 7  ;;  %v3910_v6 = vcombine.low %v1201_v62, %v1211_v63  ;;  %v5677_v7 = vld [vmem:[#allocation2 + $0x64] sm:$0xf]  ;;  %336 = vst [vmem:[#allocation2 + $0x84] sm:$0x1] %v335_v49  ;;  %v385_v17 = vsel %vm5416_vm5, 0, %v384_v56  ;;  %v5689_v24 = vpack.c.bf16 %v426_v40, %v426_v40 }
  0xf3   : > { %v709_v14 = vor.u32 %v707_v54, %v706_v59  ;;  %v710_v16 = vrot.slane %v706_v59, 4  ;;  %v1222_v9 = vshll.u32 %v5677_v7, 16  ;;  %v1226_v18 = vshrl.u32 %v5677_v7, 16  ;;  %386 = vst [vmem:[#allocation2 + $0x8c] sm:$0x1] %v385_v17  ;;  %v428_v59 = vld [vmem:[%s5396_s17 + $0xc8] sm:$0xff] }
  0xf4   : > { %v717_v19 = vor.u32 %v715_v60, %v714_v2  ;;  %v719_v20 = vrot.slane %v714_v2, 4  ;;  %4221 = vmatmul.mubr.msk.bf16.gmra.mrb[12].mxu0 %vm399_vm12, %v3910_v6  ;;  %v5685_v21 = vld [vmem:[#allocation2 + $0x60] sm:$0xf]  ;;  %v5687_v22 = vld [vmem:[#allocation2 + $0x68] sm:$0x1]  ;;  %v338_v25 = vsel %vm5411_vm3, 0, %v337_v4  ;;  %v5713_v51 = vpack.c.bf16 %v427_v15, %v427_v15 }
  0xf5   : > { %v388_v12 = vsel %vm5416_vm5, 0, %v387_v5  ;;  %v1213_v26 = vshrl.u32 %v5685_v21, 16  ;;  %v1216_v27 = vshll.u32 %v5685_v21, 16  ;;  %v1224_v28 = vrot.slane %v1222_v9, 5  ;;  %v5697_v33 = vld [vmem:[#allocation2 + $0x6c] sm:$0xf] }
  0xf6   : > { %v1228_v30 = vrot.slane %v1226_v18, 4  ;;  %339 = vst [vmem:[#allocation2 + $0x90] sm:$0x1] %v338_v25  ;;  %389 = vst [vmem:[#allocation2 + $0x98] sm:$0x1] %v388_v12  ;;  %v1232_v34 = vshll.u32 %v5687_v22, 16  ;;  %v718_v37 = vsel %vm5444_vm8, %v710_v16, %v717_v19  ;;  %v5725_v17 = vpack.c.bf16 %v428_v59, %v428_v59 }
  0xf7   : > { %v1237_v35 = vshrl.u32 %v5697_v33, 16  ;;  %v1240_v36 = vshll.u32 %v5697_v33, 16  ;;  %v926_v39 = vld [vmem:[#allocation2 + $0x78] sm:$0xf]  ;;  %v1215_v13 = vrot.slane %v1213_v26, 4  ;;  %v1218_v41 = vrot.slane %v1216_v27, 5 }
  0xf8   : > { %v1229_v42 = vor.u32 %v1228_v30, %v1224_v28  ;;  %v927_v43 = vsel %vm5453_vm9, %v709_v14, %v926_v39  ;;  %929 = vst.msk [vmem:[#allocation2 + $0x7c] sm:$0xf] %vm853_vm7, %v718_v37  ;;  %v930_v44 = vld [vmem:[#allocation2 + $0x80] sm:$0x1]  ;;  %v1234_v45 = vrot.slane %v1232_v34, 5  ;;  %v721_v57 = vshrl.u32 %v4093_v23, 16 }
  0xf9   : > { %v5707_v46 = vld [vmem:[#allocation2 + $0x70] sm:$0xf]  ;;  %v5709_v47 = vld [vmem:[#allocation2 + $0x74] sm:$0x1]  ;;  %v1239_v48 = vrot.slane %v1237_v35, 4  ;;  %v931_v50 = vsel %vm5411_vm3, %v719_v20, %v930_v44  ;;  %v1219_v52 = vor.u32 %v1218_v41, %v1215_v13  ;;  %v1242_v53 = vrot.slane %v1240_v36, 5 }
  0xfa   : > { %928 = vst [vmem:[#allocation2 + $0x78] sm:$0xf] %v927_v43  ;;  %v1230_v31 = vrot.slane %v1229_v42, 4  ;;  %v1246_v54 = vshll.u32 %v5707_v46, 16  ;;  %932 = vst [vmem:[#allocation2 + $0x80] sm:$0x1] %v931_v50 }
  0xfb   : > { %v1250_v55 = vshrl.u32 %v5707_v46, 16  ;;  %v1256_v56 = vshll.u32 %v5709_v47, 16  ;;  %v724_v58 = vshll.u32 %v4093_v23, 16  ;;  %v1220_v60 = vrot.slane %v1219_v52, 4  ;;  %v933_v16 = vld [vmem:[#allocation2 + $0x84] sm:$0xf] }
  0xfc   : > { %v1235_v61 = vsel %vm5507_vm13, %v1230_v31, %v1234_v45  ;;  %v1243_v40 = vor.u32 %v1242_v53, %v1239_v48  ;;  %v1248_v62 = vrot.slane %v1246_v54, 5  ;;  %v723_v49 = vrot.slane %v721_v57, 7  ;;  %v937_v41 = vld [vmem:[#allocation2 + $0x8c] sm:$0x1]  ;;  %v340_v48 = vld [vmem:[#allocation2 + $0x9c] sm:$0x1] }
  0xfd   : > { %v1252_v63 = vrot.slane %v1250_v55, 4  ;;  %v1258_v2 = vrot.slane %v1256_v56, 5  ;;  %v729_v4 = vshrl.u32 %v5689_v24, 16  ;;  %v1225_v5 = vsel %vm5507_vm13, %v1220_v60, %v1224_v28  ;;  %v390_v54 = vld [vmem:[#allocation2 + $0xa4] sm:$0x1]  ;;  %v430_v60 = vld [vmem:[%s5396_s17 + $0xd8] sm:$0xff] }
  0xfe   : > { %v1244_v6 = vrot.slane %v1243_v40, 4  ;;  %v732_v14 = vshll.u32 %v5689_v24, 16  ;;  %v3911_v9 = vcombine.low %v1225_v5, %v1235_v61  ;;  %v726_v20 = vor.u32 %v724_v58, %v723_v49  ;;  %v429_v55 = vld [vmem:[%s5396_s17 + $0xd0] sm:$0xff]  ;;  %v343_v61 = vld [vmem:[#allocation2 + $0xa8] sm:$0x1] }
  0xff   : > { %v1253_v18 = vor.u32 %v1252_v63, %v1248_v62  ;;  %v5727_v19 = vld [vmem:[#allocation2 + $0x7c] sm:$0xf]  ;;  %v727_v15 = vrot.slane %v723_v49, 4  ;;  %v731_v27 = vrot.slane %v729_v4, 7  ;;  %v738_v58 = vshrl.u32 %v5713_v51, 16 }
 0x100   : > { %v1249_v23 = vsel %vm5507_vm13, %v1244_v6, %v1248_v62  ;;  %v1270_v12 = vshll.u32 %v5727_v19, 16  ;;  %v1274_v26 = vshrl.u32 %v5727_v19, 16  ;;  %4224 = vmatprep.mubr.msk.bf16.mxu0 %vm399_vm12, %v3911_v9  ;;  %v934_v35 = vsel %vm5453_vm9, %v726_v20, %v933_v16  ;;  %v940_v16 = vld [vmem:[#allocation2 + $0x90] sm:$0xf] }
 0x101   : > { %v5731_v25 = vld [vmem:[#allocation2 + $0x78] sm:$0xf]  ;;  %v1254_v24 = vrot.slane %v1253_v18, 4  ;;  %v5736_v28 = vld [vmem:[#allocation2 + $0x80] sm:$0x1]  ;;  %v734_v13 = vor.u32 %v732_v14, %v731_v27  ;;  %v736_v45 = vrot.slane %v731_v27, 4  ;;  %v4098_v9 = vpack.c.bf16 %v430_v60, %v430_v60 }
 0x102   : > { %v1261_v30 = vshrl.u32 %v5731_v25, 16  ;;  %v1264_v34 = vshll.u32 %v5731_v25, 16  ;;  %v1272_v36 = vrot.slane %v1270_v12, 5  ;;  %v1276_v37 = vrot.slane %v1274_v26, 4  ;;  %935 = vst [vmem:[#allocation2 + $0x84] sm:$0xf] %v934_v35 }
 0x103   : > { %v1280_v39 = vshll.u32 %v5736_v28, 16  ;;  %v1259_v42 = vsel %vm5507_vm13, %v1254_v24, %v1258_v2  ;;  %v735_v53 = vsel %vm5444_vm8, %v727_v15, %v734_v13  ;;  %v938_v57 = vsel %vm5411_vm3, %v736_v45, %v937_v41  ;;  %v393_v13 = vld [vmem:[#allocation2 + $0xb0] sm:$0x1] }
 0x104   : > { %v1263_v43 = vrot.slane %v1261_v30, 4  ;;  %v1266_v44 = vrot.slane %v1264_v34, 5  ;;  %v3912_v50 = vcombine.low %v1249_v23, %v1259_v42  ;;  %v1277_v52 = vor.u32 %v1276_v37, %v1272_v36  ;;  %936 = vst.msk [vmem:[#allocation2 + $0x88] sm:$0xf] %vm853_vm7, %v735_v53  ;;  %939 = vst [vmem:[#allocation2 + $0x8c] sm:$0x1] %v938_v57 }
 0x105   : > { %v1282_v31 = vrot.slane %v1280_v39, 5  ;;  %v741_v59 = vshll.u32 %v5713_v51, 16  ;;  %v746_v62 = vshrl.u32 %v5725_v17, 16  ;;  %v749_v63 = vshll.u32 %v5725_v17, 16  ;;  %v944_v34 = vld [vmem:[#allocation2 + $0x98] sm:$0x1] }
 0x106   : > { %v1267_v56 = vor.u32 %v1266_v44, %v1263_v43  ;;  %4225 = vmatmul.mubr.msk.bf16.gmra.mrb[16].mxu0 %vm399_vm12, %v3912_v50  ;;  %v1278_v40 = vrot.slane %v1277_v52, 4  ;;  %v341_v2 = vsel %vm5411_vm3, 0, %v340_v48  ;;  %v740_v4 = vrot.slane %v738_v58, 7  ;;  %v431_v48 = vld [vmem:[%s5396_s17 + $0xe0] sm:$0xff] }
 0x107   : > { %342 = vst [vmem:[#allocation2 + $0x9c] sm:$0x1] %v341_v2  ;;  %v391_v5 = vsel %vm5416_vm5, 0, %v390_v54  ;;  %v4097_v51 = vpack.c.bf16 %v429_v55, %v429_v55  ;;  %v748_v14 = vrot.slane %v746_v62, 7  ;;  %v344_v17 = vsel %vm5411_vm3, 0, %v343_v61 }
 0x108   : > { %v1268_v49 = vrot.slane %v1267_v56, 4  ;;  %v1283_v6 = vsel %vm5507_vm13, %v1278_v40, %v1282_v31  ;;  %392 = vst [vmem:[#allocation2 + $0xa4] sm:$0x1] %v391_v5  ;;  %v743_v15 = vor.u32 %v741_v59, %v740_v4  ;;  %v744_v23 = vrot.slane %v740_v4, 4  ;;  %345 = vst [vmem:[#allocation2 + $0xa8] sm:$0x1] %v344_v17 }
 0x109   : > { %v5767_v20 = vld [vmem:[#allocation2 + $0x84] sm:$0xf]  ;;  %v755_v12 = vshrl.u32 %v4097_v51, 16  ;;  %v751_v30 = vor.u32 %v749_v63, %v748_v14  ;;  %v753_v35 = vrot.slane %v748_v14, 4  ;;  %v763_v45 = vshrl.u32 %v4098_v9, 16  ;;  %v432_v40 = vld [vmem:[%s5396_s17 + $0xe8] sm:$0xff] }
 0x10a   : > { %v1273_v18 = vsel %vm5507_vm13, %v1268_v49, %v1272_v36  ;;  %v1285_v27 = vshrl.u32 %v5767_v20, 16  ;;  %v1288_v24 = vshll.u32 %v5767_v20, 16  ;;  %v941_v37 = vsel %vm5453_vm9, %v743_v15, %v940_v16  ;;  %v346_v55 = vld [vmem:[#allocation2 + $0xb4] sm:$0x1]  ;;  %v396_v56 = vld [vmem:[#allocation2 + $0xbc] sm:$0x1] }
 0x10b   : > { %v3913_v26 = vcombine.low %v1273_v18, %v1283_v6  ;;  %v757_v39 = vrot.slane %v755_v12, 7  ;;  %v758_v36 = vshll.u32 %v4097_v51, 16  ;;  %v5774_v41 = vld [vmem:[#allocation2 + $0x88] sm:$0xf]  ;;  %v752_v44 = vsel %vm5444_vm8, %v744_v23, %v751_v30  ;;  %942 = vst [vmem:[#allocation2 + $0x90] sm:$0xf] %v941_v37 }
 0x10c   : > { %v1287_v42 = vrot.slane %v1285_v27, 4  ;;  %v1290_v43 = vrot.slane %v1288_v24, 5  ;;  %v5779_v50 = vld [vmem:[#allocation2 + $0x8c] sm:$0x1]  ;;  %v1294_v52 = vshll.u32 %v5774_v41, 16  ;;  %v1298_v31 = vshrl.u32 %v5774_v41, 16 }
 0x10d   : > { %4228 = vmatprep.mubr.msk.bf16.mxu0 %vm399_vm12, %v3913_v26  ;;  %943 = vst.msk [vmem:[#allocation2 + $0x94] sm:$0xf] %vm853_vm7, %v752_v44  ;;  %v945_v53 = vsel %vm5411_vm3, %v753_v35, %v944_v34  ;;  %v760_v54 = vor.u32 %v758_v36, %v757_v39  ;;  %v1304_v58 = vshll.u32 %v5779_v50, 16  ;;  %v761_v59 = vrot.slane %v757_v39, 4 }
 0x10e   : > { %v1291_v57 = vor.u32 %v1290_v43, %v1287_v42  ;;  %946 = vst [vmem:[#allocation2 + $0x98] sm:$0x1] %v945_v53  ;;  %v765_v60 = vrot.slane %v763_v45, 7  ;;  %v947_v61 = vld [vmem:[#allocation2 + $0x9c] sm:$0xf]  ;;  %v1296_v62 = vrot.slane %v1294_v52, 5  ;;  %v4099_v18 = vpack.c.bf16 %v431_v48, %v431_v48 }
 0x10f   : > { %v1300_v63 = vrot.slane %v1298_v31, 4  ;;  %v766_v2 = vshll.u32 %v4098_v9, 16  ;;  %v948_v49 = vsel %vm5453_vm9, %v760_v54, %v947_v61  ;;  %v951_v4 = vld [vmem:[#allocation2 + $0xa4] sm:$0x1]  ;;  %v1306_v51 = vrot.slane %v1304_v58, 5 }
 0x110   : > { %v1292_v5 = vrot.slane %v1291_v57, 4  ;;  %v770_v6 = vrot.slane %v765_v60, 4  ;;  %949 = vst [vmem:[#allocation2 + $0x9c] sm:$0xf] %v948_v49  ;;  %v394_v14 = vsel %vm5416_vm5, 0, %v393_v13  ;;  %v4100_v15 = vpack.c.bf16 %v432_v40, %v432_v40  ;;  %v434_v40 = vld [vmem:[%s5396_s17 + $0xf8] sm:$0xff] }
 0x111   : > { %v1301_v16 = vor.u32 %v1300_v63, %v1296_v62  ;;  %v768_v17 = vor.u32 %v766_v2, %v765_v60  ;;  %395 = vst [vmem:[#allocation2 + $0xb0] sm:$0x1] %v394_v14  ;;  %v347_v12 = vsel %vm5411_vm3, 0, %v346_v55  ;;  %v397_v26 = vsel %vm5416_vm5, 0, %v396_v56  ;;  %v954_v55 = vld [vmem:[#allocation2 + $0xa8] sm:$0xf] }
 0x112   : > { %v1297_v23 = vsel %vm5507_vm13, %v1292_v5, %v1296_v62  ;;  %v952_v9 = vsel %vm5411_vm3, %v770_v6, %v951_v4  ;;  %v5800_v24 = vld [vmem:[#allocation2 + $0x90] sm:$0xf]  ;;  %v772_v34 = vshrl.u32 %v4099_v18, 16  ;;  %v775_v35 = vshll.u32 %v4099_v18, 16  ;;  %348 = vst [vmem:[#allocation2 + $0xb4] sm:$0x1] %v347_v12 }
 0x113   : > { %v1302_v27 = vrot.slane %v1301_v16, 4  ;;  %v769_v30 = vsel %vm5444_vm8, %v761_v59, %v768_v17  ;;  %953 = vst [vmem:[#allocation2 + $0xa4] sm:$0x1] %v952_v9  ;;  %398 = vst [vmem:[#allocation2 + $0xbc] sm:$0x1] %v397_v26  ;;  %v1309_v39 = vshrl.u32 %v5800_v24, 16  ;;  %v3946_v0 = vcombine.low %v5767_v20, %v5774_v41 }
 0x114   : > { %v5804_v37 = vld [vmem:[#allocation2 + $0x94] sm:$0xf]  ;;  %v1312_v36 = vshll.u32 %v5800_v24, 16  ;;  %950 = vst.msk [vmem:[#allocation2 + $0xa0] sm:$0xf] %vm853_vm7, %v769_v30  ;;  %v780_v1 = vshrl.u32 %v4100_v15, 16 }
 0x115   : > { %v783_v13 = vshll.u32 %v4100_v15, 16  ;;  %v1307_v42 = vsel %vm5507_vm13, %v1302_v27, %v1306_v51  ;;  %v5811_v43 = vld [vmem:[#allocation2 + $0x98] sm:$0x1]  ;;  %v1318_v44 = vshll.u32 %v5804_v37, 16  ;;  %v1322_v45 = vshrl.u32 %v5804_v37, 16  ;;  %v433_v56 = vld [vmem:[%s5396_s17 + $0xf0] sm:$0xff] }
 0x116   : > { %v774_v48 = vrot.slane %v772_v34, 7  ;;  %v3914_v52 = vcombine.low %v1297_v23, %v1307_v42  ;;  %v1311_v31 = vrot.slane %v1309_v39, 4  ;;  %v1314_v53 = vrot.slane %v1312_v36, 5 }
 0x117   : > { %v1328_v54 = vshll.u32 %v5811_v43, 16  ;;  %v1320_v57 = vrot.slane %v1318_v44, 5  ;;  %v1324_v58 = vrot.slane %v1322_v45, 4  ;;  %v5817_v59 = vld [vmem:[#allocation2 + $0x9c] sm:$0xf]  ;;  %v782_v5 = vrot.slane %v780_v1, 7 }
 0x118   : > { %v777_v60 = vor.u32 %v775_v35, %v774_v48  ;;  %v778_v61 = vrot.slane %v774_v48, 4  ;;  %4229 = vmatmul.mubr.msk.bf16.gmra.mrb[20].mxu0 %vm399_vm12, %v3914_v52  ;;  %v1315_v62 = vor.u32 %v1314_v53, %v1311_v31  ;;  %v1333_v2 = vshrl.u32 %v5817_v59, 16  ;;  %v958_v6 = vld [vmem:[#allocation2 + $0xb0] sm:$0x1] }
 0x119   : > { %v1330_v63 = vrot.slane %v1328_v54, 5  ;;  %v1336_v49 = vshll.u32 %v5817_v59, 16  ;;  %v1325_v4 = vor.u32 %v1324_v58, %v1320_v57  ;;  %v4101_v14 = vpack.c.bf16 %v433_v56, %v433_v56 }
 0x11a   : > { %v955_v51 = vsel %vm5453_vm9, %v777_v60, %v954_v55  ;;  %v1316_v16 = vrot.slane %v1315_v62, 4  ;;  %v5825_v17 = vld [vmem:[#allocation2 + $0xa4] sm:$0x1]  ;;  %v1335_v18 = vrot.slane %v1333_v2, 4  ;;  %v4102_v23 = vpack.c.bf16 %v434_v40, %v434_v40  ;;  %v961_v40 = vld [vmem:[#allocation2 + $0xb4] sm:$0xf] }
 0x11b   : > { %v1338_v15 = vrot.slane %v1336_v49, 5  ;;  %956 = vst [vmem:[#allocation2 + $0xa8] sm:$0xf] %v955_v51  ;;  %v1326_v9 = vrot.slane %v1325_v4, 4  ;;  %v5827_v12 = vld [vmem:[#allocation2 + $0xa0] sm:$0xf]  ;;  %v785_v27 = vor.u32 %v783_v13, %v782_v5 }
 0x11c   : > { %v1352_v26 = vshll.u32 %v5825_v17, 16  ;;  %v787_v30 = vrot.slane %v782_v5, 4  ;;  %v1321_v34 = vsel %vm5507_vm13, %v1316_v16, %v1320_v57  ;;  %v1342_v39 = vshll.u32 %v5827_v12, 16  ;;  %v965_v4 = vld [vmem:[#allocation2 + $0xbc] sm:$0x1] }
 0x11d   : > { %v1339_v35 = vor.u32 %v1338_v15, %v1335_v18  ;;  %v1346_v36 = vshrl.u32 %v5827_v12, 16  ;;  %v1331_v1 = vsel %vm5507_vm13, %v1326_v9, %v1330_v63  ;;  %v786_v42 = vsel %vm5444_vm8, %v778_v61, %v785_v27 }
 0x11e   : > { %v959_v44 = vsel %vm5411_vm3, %v787_v30, %v958_v6  ;;  %v3915_v45 = vcombine.low %v1321_v34, %v1331_v1  ;;  %v1344_v48 = vrot.slane %v1342_v39, 5  ;;  %957 = vst.msk [vmem:[#allocation2 + $0xac] sm:$0xf] %vm853_vm7, %v786_v42  ;;  %v789_v31 = vshrl.u32 %v4101_v14, 16 }
 0x11f   : > { %v1340_v13 = vrot.slane %v1339_v35, 4  ;;  %v1348_v52 = vrot.slane %v1346_v36, 4  ;;  %960 = vst [vmem:[#allocation2 + $0xb0] sm:$0x1] %v959_v44  ;;  %v792_v53 = vshll.u32 %v4101_v14, 16  ;;  %v797_v54 = vshrl.u32 %v4102_v23, 16 }
 0x120   : > { %v800_v55 = vshll.u32 %v4102_v23, 16  ;;  %4232 = vmatprep.mubr.msk.bf16.mxu0 %vm399_vm12, %v3915_v45  ;;  %v1354_v57 = vrot.slane %v1352_v26, 5  ;;  %v791_v60 = vrot.slane %v789_v31, 7  ;;  %v3947_v44 = vcombine.low %v5800_v24, %v5804_v37 }
 0x121   : > { %v1349_v56 = vor.u32 %v1348_v52, %v1344_v48  ;;  %v799_v61 = vrot.slane %v797_v54, 7  ;;  %v1345_v62 = vsel %vm5507_vm13, %v1340_v13, %v1344_v48  ;;  %v3948_v48 = vcombine.low %v5817_v59, %v5827_v12  ;;  %v4909_v59 = vld [vmem:[#allocation2 + $0x14] sm:$0x1] }
 0x122   : > { %v5842_v58 = vld [vmem:[#allocation2 + $0xa8] sm:$0xf]  ;;  %v794_v5 = vor.u32 %v792_v53, %v791_v60  ;;  %v795_v51 = vrot.slane %v791_v60, 4  ;;  %vm2007_vm14 = vcmask 1042432   ;;  %vm2008_vm15 = vcmask 1046532  }
 0x123   : > { %v1350_v63 = vrot.slane %v1349_v56, 4  ;;  %v1357_v2 = vshrl.u32 %v5842_v58, 16  ;;  %v1360_v49 = vshll.u32 %v5842_v58, 16  ;;  %v802_v6 = vor.u32 %v800_v55, %v799_v61  ;;  %vm5910_vm0 = vmor %vm2007_vm14, %vm2008_vm15 }
 0x124   : > { %v804_v14 = vrot.slane %v799_v61, 4  ;;  %v962_v30 = vsel %vm5453_vm9, %v794_v5, %v961_v40 }
 0x125   : > { %v1355_v16 = vsel %vm5507_vm13, %v1350_v63, %v1354_v57  ;;  %v1359_v18 = vrot.slane %v1357_v2, 4  ;;  %v1362_v15 = vrot.slane %v1360_v49, 5  ;;  %v5850_v9 = vld [vmem:[#allocation2 + $0xac] sm:$0xf]  ;;  %v803_v27 = vsel %vm5444_vm8, %v795_v51, %v802_v6  ;;  %963 = vst [vmem:[#allocation2 + $0xb4] sm:$0xf] %v962_v30 }
 0x126   : > { %v3916_v23 = vcombine.low %v1345_v62, %v1355_v16  ;;  %v5852_v26 = vld [vmem:[#allocation2 + $0xb0] sm:$0x1]  ;;  %v966_v34 = vsel %vm5411_vm3, %v804_v14, %v965_v4  ;;  %v1366_v39 = vshll.u32 %v5850_v9, 16  ;;  %v1370_v36 = vshrl.u32 %v5850_v9, 16  ;;  %964 = vst.msk [vmem:[#allocation2 + $0xb8] sm:$0xf] %vm853_vm7, %v803_v27 }
 0x127   : > { %v1363_v35 = vor.u32 %v1362_v15, %v1359_v18  ;;  %v1376_v1 = vshll.u32 %v5852_v26, 16  ;;  %967 = vst [vmem:[#allocation2 + $0xbc] sm:$0x1] %v966_v34  ;;  %v3949_v52 = vcombine.low %v5842_v58, %v5850_v9  ;;  %v4895_v34 = vld [vmem:[#allocation2] sm:$0xf] }
 0x128   : > { %4233 = vmatmul.mubr.msk.bf16.gmra.mrb[24].mxu0 %vm399_vm12, %v3916_v23  ;;  %v1368_v42 = vrot.slane %v1366_v39, 5  ;;  %v1372_v38 = vrot.slane %v1370_v36, 4  ;;  %v4910_v58 = vld [vmem:[#allocation2 + $0x20] sm:$0x1] }
 0x129   : > { %v1364_v32 = vrot.slane %v1363_v35, 4  ;;  %v1378_v13 = vrot.slane %v1376_v1, 5  ;;  %v5895_v35 = vld [vmem:[#allocation2 + $0x4] sm:$0xf]  ;;  %v4897_v1 = vld [vmem:[#allocation2 + $0xc] sm:$0xf] }
 0x12a   : > { %v1373_v45 = vor.u32 %v1372_v38, %v1368_v42  ;;  %v3935_v39 = vcombine.low %v4895_v34, %v5895_v35  ;;  %v1970_v38 = vld [vmem:[#allocation2 + $0x84] sm:$0xe] }
 0x12b   : > { %v1369_v31 = vsel %vm5507_vm13, %v1364_v32, %v1368_v42  ;;  %v5900_v32 = vld [vmem:[#allocation2 + $0x10] sm:$0xf] }
 0x12c   : > { %v1374_v53 = vrot.slane %v1373_v45, 4  ;;  %v5875_v54 = vld [vmem:[#allocation2 + $0xb4] sm:$0xf]  ;;  %v3936_v42 = vcombine.low %v4897_v1, %v5900_v32  ;;  %v4899_v45 = vld [vmem:[#allocation2 + $0x18] sm:$0xf]  ;;  %v2019_v20 = vrot.slane %v5900_v32, 5 }
 0x12d   : > { %v5877_v55 = vld [vmem:[#allocation2 + $0xb8] sm:$0xf]  ;;  %v1381_v60 = vshrl.u32 %v5875_v54, 16  ;;  %v1384_v61 = vshll.u32 %v5875_v54, 16 }
 0x12e   : > { %v5879_v56 = vld [vmem:[#allocation2 + $0xbc] sm:$0x1]  ;;  %v1379_v57 = vsel %vm5507_vm13, %v1374_v53, %v1378_v13  ;;  %v1390_v40 = vshll.u32 %v5877_v55, 16  ;;  %v1394_v63 = vshrl.u32 %v5877_v55, 16  ;;  %v3950_v49 = vcombine.low %v5875_v54, %v5877_v55 }
 0x12f   : > { %v3917_v62 = vcombine.low %v1369_v31, %v1379_v57  ;;  %v1400_v2 = vshll.u32 %v5879_v56, 16  ;;  %v1383_v4 = vrot.slane %v1381_v60, 4  ;;  %v1386_v5 = vrot.slane %v1384_v61, 5  ;;  %v5903_v13 = vld [vmem:[#allocation2 + $0x1c] sm:$0xf] }
 0x130   : > { %v1392_v51 = vrot.slane %v1390_v40, 5  ;;  %v1396_v6 = vrot.slane %v1394_v63, 4  ;;  %v3937_v3 = vcombine.low %v4899_v45, %v5903_v13  ;;  %v4901_v31 = vld [vmem:[#allocation7 + $0x4] sm:$0x3]  ;;  %v1971_v57 = vld [vmem:[#allocation2 + $0x90] sm:$0xe] }
 0x131   : > { %4236 = vmatprep.mubr.msk.bf16.mxu0 %vm399_vm12, %v3917_v62  ;;  %v1387_v14 = vor.u32 %v1386_v5, %v1383_v4  ;;  %v1402_v18 = vrot.slane %v1400_v2, 5  ;;  %v2221_v53 = vsel %vm1502_vm4, %v4901_v31, 0  ;;  %v3978_v60 = vrot.slane %v1970_v38, 9  ;;  %v1972_v40 = vld [vmem:[#allocation2 + $0x9c] sm:$0xe] }
 0x132   : > { %v1397_v16 = vor.u32 %v1396_v6, %v1392_v51  ;;  %v2089_v61 = vrot.slane %v5774_v41, 5  ;;  %v2092_v63 = vrot.slane %v5779_v50, 5  ;;  %v3979_v2 = vrot.slane %v1971_v57, 9  ;;  %v1973_v6 = vld [vmem:[#allocation2 + $0xa8] sm:$0xe] }
 0x133   : > { %v1388_v15 = vrot.slane %v1387_v14, 4  ;;  %v5920_v14 = vld [vmem:[#allocation2 + $0x28] sm:$0xf]  ;;  %v5924_v50 = vld [vmem:[#allocation2 + $0x34] sm:$0xf]  ;;  %v2106_v38 = vrot.slane %v5825_v17, 5 }
 0x134   : > { %v1398_v23 = vrot.slane %v1397_v16, 4  ;;  %v5917_v4 = vsel %vm5910_vm0, %v3978_v60, %v2089_v61  ;;  %v2091_v5 = vrot.slane %v2089_v61, 4  ;;  %v4903_v16 = vld [vmem:[#allocation2 + $0x24] sm:$0xf]  ;;  %v3981_v45 = vrot.slane %v1973_v6, 9 }
 0x135   : > { %v1393_v27 = vsel %vm5507_vm13, %v1388_v15, %v1392_v51  ;;  %v2096_v51 = vrot.slane %v5804_v37, 5  ;;  %v2099_v15 = vrot.slane %v5811_v43, 5  ;;  %v2103_v43 = vrot.slane %v5827_v12, 5  ;;  %v1960_v37 = vld [vmem:[#allocation2 + $0xc] sm:$0xe] }
 0x136   : > { %v1403_v30 = vsel %vm5507_vm13, %v1398_v23, %v1402_v18  ;;  %v3938_v18 = vcombine.low %v4903_v16, %v5920_v14  ;;  %v3980_v23 = vrot.slane %v1972_v40, 9  ;;  %v2110_v31 = vrot.slane %v5850_v9, 5 }
 0x137   : > { %v3918_v36 = vcombine.low %v1393_v27, %v1403_v30  ;;  %v1974_v27 = vld [vmem:[#allocation2 + $0xb4] sm:$0xe]  ;;  %v4904_v30 = vld [vmem:[#allocation2 + $0x30] sm:$0xf]  ;;  %v2098_v1 = vrot.slane %v2096_v51, 4  ;;  %v2105_v40 = vrot.slane %v2103_v43, 4 }
 0x138   : > { %v3939_v34 = vcombine.low %v4904_v30, %v5924_v50  ;;  %v3982_v57 = vrot.slane %v1974_v27, 9  ;;  %v5949_v61 = vsel %vm5910_vm0, %v3980_v23, %v2103_v43  ;;  %v2117_v17 = vrot.slane %v5877_v55, 5  ;;  %v4906_v23 = vld [vmem:[#allocation2 + $0x3c] sm:$0xf]  ;;  %v5979_v27 = vld [vmem:[#allocation2 + $0x40] sm:$0xf] }
 0x139   : > { %4237 = vmatmul.mubr.msk.bf16.gmra.mrb[28].mxu0 %vm399_vm12, %v3918_v36  ;;  %v5933_v36 = vsel %vm5910_vm0, %v3979_v2, %v2096_v51  ;;  %v2112_v2 = vrot.slane %v2110_v31, 4  ;;  %v3940_v30 = vcombine.low %v4906_v23, %v5979_v27  ;;  %v3942_v43 = vcombine.low %v5638_v10, %v5640_v11  ;;  %v1959_v10 = vld [vmem:[#allocation2] sm:$0xe]  ;;  %v4908_v11 = vld [vmem:[#allocation2 + $0x8] sm:$0x1] }
 0x13a   : > { %4242 = vmatprep.mubr.msk.bf16.mxu0 %vm399_vm12, %v3935_v39  ;;  %v5929_v39 = vsel %vm5910_vm0, %v2091_v5, %v2092_v63  ;;  %v5955_v63 = vsel %vm5910_vm0, %v3981_v45, %v2110_v31  ;;  %v5961_v5 = vsel %vm5910_vm0, %v2105_v40, %v2106_v38  ;;  %v5965_v51 = vsel %vm5910_vm0, %v3982_v57, %v2117_v17  ;;  %v1963_v55 = vld [vmem:[#allocation2 + $0x30] sm:$0xe] }
 0x13b   : > { %v2119_v6 = vrot.slane %v2117_v17, 4  ;;  %v3996_v16 = vcombine.low %v5949_v61, %v5961_v5  ;;  %v3943_v38 = vcombine.low %v5685_v21, %v5677_v7  ;;  %v3944_v45 = vcombine.low %v5697_v33, %v5707_v46 }
 0x13c   : > { %v2015_v21 = vrot.slane %v4908_v11, 5  ;;  %v3967_v33 = vrot.slane %v1959_v10, 9  ;;  %v2022_v12 = vrot.slane %v4909_v59, 5  ;;  %v2021_v32 = vrot.slane %v2019_v20, 4 }
 0x13d   : > { %v2029_v9 = vrot.slane %v4910_v58, 5  ;;  %v2033_v57 = vrot.slane %v5920_v14, 5  ;;  %v2040_v54 = vrot.slane %v5924_v50, 5 }
 0x13f   : > { %v2035_v23 = vrot.slane %v2033_v57, 4 }
 0x141   : > { %4243 = vmatmul.mubr.msk.bf16.vlgmr.msra.gmra.mrb[0].mxu0 %vm399_vm12, %v3936_v42  ;;  %v3994_v42 = vcombine.low %v5917_v4, %v5929_v39  ;;  %v6109_v4 = vld [vmem:[#allocation10] sm:$0x3]  ;;  %v5145_v39 = vmov 0  }
 0x142   : > { %4275 = vmatpush3.bf16.msra.mxu0 %v2221_v53  ;;  %4246 = vmatprep.mubr.msk.bf16.mxu0 %vm399_vm12, %v3937_v3  ;;  %v5941_v3 = vsel %vm5910_vm0, %v2098_v1, %v2099_v15  ;;  %v2113_v53 = vrot.slane %v5852_v26, 5  ;;  %v2120_v26 = vrot.slane %v5879_v56, 5  ;;  %v3941_v1 = vcombine.low %v5599_v8, %v5601_v29  ;;  %400 = vst.msk [vmem:[#allocation3] sm:$0xff] %vm399_vm12, %v5145_v39 }
 0x143   : > { %v3995_v60 = vcombine.low %v5933_v36, %v5941_v3  ;;  %v3945_v8 = vcombine.low %v5731_v25, %v5727_v19  ;;  %v2012_v29 = vrot.slane %v5895_v35, 5  ;;  %v3968_v35 = vrot.slane %v1960_v37, 9  ;;  %402 = vst.msk [vmem:[#allocation3 + $0x88] sm:$0xff] %vm399_vm12, %v5145_v39  ;;  %v6115_v36 = vld [vmem:[#allocation9] ss:$0 sm:$0xff] }
 0x144   : > { %v5977_v15 = vsel %vm5910_vm0, %v2119_v6, %v2120_v26 }
 0x145   : > { %v2014_v25 = vrot.slane %v2012_v29, 4  ;;  %v2013_v41 = vsel %vm5910_vm0, %v3967_v33, %v2012_v29  ;;  %v2047_v29 = vrot.slane %v5979_v27, 5  ;;  %v4913_v33 = vld [vmem:[#allocation2 + $0x4c] sm:$0xf] }
 0x147   : > { %v2016_v24 = vsel %vm5910_vm0, %v2014_v25, %v2015_v21  ;;  %v1964_v21 = vld [vmem:[#allocation2 + $0x3c] sm:$0xe]  ;;  %v2054_v25 = vrot.slane %v4913_v33, 5 }
 0x148   : > { %v3972_v37 = vrot.slane %v1964_v21, 9  ;;  %v2078_v21 = vrot.slane %v5709_v47, 5 }
 0x149   : > { %4247 = vmatmul.mubr.msk.bf16.gmra.mrb[4].mxu0 %vm399_vm12, %v3938_v18  ;;  %v5971_v18 = vsel %vm5910_vm0, %v2112_v2, %v2113_v53  ;;  %v1962_v2 = vld [vmem:[#allocation2 + $0x24] sm:$0xe] }
 0x14a   : > { %4250 = vmatprep.mubr.msk.bf16.mxu0 %vm399_vm12, %v3939_v34  ;;  %v3997_v56 = vcombine.low %v5955_v63, %v5971_v18  ;;  %v3998_v34 = vcombine.low %v5965_v51, %v5977_v15  ;;  %v3970_v6 = vrot.slane %v1962_v2, 9 }
 0x151   : > { %4251 = vmatmul.mubr.msk.bf16.gmra.mrb[8].mxu0 %vm399_vm12, %v3940_v30  ;;  %v4911_v30 = vld [vmem:[#allocation2 + $0x2c] sm:$0x1] }
 0x152   : > { %4254 = vmatprep.mubr.msk.bf16.mxu0 %vm399_vm12, %v3941_v1  ;;  %v2036_v1 = vrot.slane %v4911_v30, 5  ;;  %v2071_v30 = vrot.slane %v5687_v22, 5  ;;  %v2082_v22 = vrot.slane %v5727_v19, 5 }
 0x154   : > { %v2037_v50 = vsel %vm5910_vm0, %v2035_v23, %v2036_v1 }
 0x159   : > { %4255 = vmatmul.mubr.msk.bf16.gmra.mrb[12].mxu0 %vm399_vm12, %v3942_v43  ;;  %v3971_v43 = vrot.slane %v1963_v55, 9 }
 0x15a   : > { %4258 = vmatprep.mubr.msk.bf16.mxu0 %vm399_vm12, %v3943_v38  ;;  %v2042_v38 = vrot.slane %v2040_v54, 4 }
 0x15b   : > { %v2041_v10 = vsel %vm5910_vm0, %v3971_v43, %v2040_v54  ;;  %v2075_v43 = vrot.slane %v5707_v46, 5  ;;  %v2085_v46 = vrot.slane %v5736_v28, 5  ;;  %v2714_v28 = vld [vmem:[#allocation10 + $0x2] sm:$0x3] }
 0x15c   : > { %4541 = vmatprep.subr.msk.bf16.mxu1 %vm1502_vm4, %v2714_v28  ;;  %v2764_v62 = vsel %vm1502_vm4, %v2714_v28, 0 }
 0x15d   : > { %4309 = vmatpush3.bf16.msra.mxu1 %v2764_v62 }
 0x15e   : > { %4542 = vmatprep.subr.msk.bf16.mxu1 %vm1502_vm4, %v6109_v4 }
 0x161   : > { %4259 = vmatmul.mubr.msk.bf16.gmra.mrb[16].mxu0 %vm399_vm12, %v3944_v45  ;;  %v4912_v45 = vld [vmem:[#allocation2 + $0x38] sm:$0x1] }
 0x162   : > { %4262 = vmatprep.mubr.msk.bf16.mxu0 %vm399_vm12, %v3945_v8  ;;  %v2043_v14 = vrot.slane %v4912_v45, 5  ;;  %v2034_v8 = vsel %vm5910_vm0, %v3970_v6, %v2033_v57  ;;  %v2068_v57 = vrot.slane %v5677_v7, 5 }
 0x164   : > { %v2044_v11 = vsel %vm5910_vm0, %v2042_v38, %v2043_v14  ;;  %v2070_v23 = vrot.slane %v2068_v57, 4  ;;  %v1968_v14 = vld [vmem:[#allocation2 + $0x6c] sm:$0xe] }
 0x166   : > { %v2072_v45 = vsel %vm5910_vm0, %v2070_v23, %v2071_v30 }
 0x169   : > { %4263 = vmatmul.mubr.msk.bf16.gmra.mrb[20].mxu0 %vm399_vm12, %v3946_v0  ;;  %v2026_v0 = vrot.slane %v5903_v13, 5  ;;  %v2023_v13 = vsel %vm5910_vm0, %v2021_v32, %v2022_v12  ;;  %v2048_v32 = vsel %vm5910_vm0, %v3972_v37, %v2047_v29 }
 0x16a   : > { %4266 = vmatprep.mubr.msk.bf16.mxu0 %vm399_vm12, %v3947_v44  ;;  %v1961_v44 = vld [vmem:[#allocation2 + $0x18] sm:$0xe] }
 0x16b   : > { %v3969_v31 = vrot.slane %v1961_v44, 9  ;;  %v2028_v53 = vrot.slane %v2026_v0, 4  ;;  %v4914_v44 = vld [vmem:[#allocation2 + $0x44] sm:$0x1] }
 0x16c   : > { %v2050_v59 = vrot.slane %v4914_v44, 5 }
 0x16d   : > { %v2027_v40 = vsel %vm5910_vm0, %v3969_v31, %v2026_v0  ;;  %v2030_v17 = vsel %vm5910_vm0, %v2028_v53, %v2029_v9  ;;  %v2049_v0 = vrot.slane %v2047_v29, 4  ;;  %v4916_v53 = vld [vmem:[#allocation2 + $0x58] sm:$0xf] }
 0x16e   : > { %v3985_v26 = vcombine.low %v2027_v40, %v2030_v17  ;;  %v2061_v58 = vrot.slane %v4916_v53, 5  ;;  %v1967_v40 = vld [vmem:[#allocation2 + $0x60] sm:$0xe] }
 0x16f   : > { %v2051_v31 = vsel %vm5910_vm0, %v2049_v0, %v2050_v59  ;;  %v3975_v6 = vrot.slane %v1967_v40, 9 }
 0x170   : > { %v3988_v17 = vcombine.low %v2048_v32, %v2051_v31  ;;  %v2063_v55 = vrot.slane %v2061_v58, 4 }
 0x171   : > { %4267 = vmatmul.mubr.msk.bf16.gmra.mrb[24].mxu0 %vm399_vm12, %v3948_v48  ;;  %v3983_v48 = vcombine.low %v2013_v41, %v2016_v24  ;;  %v3986_v41 = vcombine.low %v2034_v8, %v2037_v50  ;;  %v3987_v24 = vcombine.low %v2041_v10, %v2044_v11  ;;  %v2069_v38 = vsel %vm5910_vm0, %v3975_v6, %v2068_v57  ;;  %v1969_v8 = vld [vmem:[#allocation2 + $0x78] sm:$0xe] }
 0x172   : > { %4270 = vmatprep.mubr.msk.bf16.mxu0 %vm399_vm12, %v3949_v52  ;;  %v2020_v52 = vsel %vm5910_vm0, %v3968_v35, %v2019_v20  ;;  %v1965_v20 = vld [vmem:[#allocation2 + $0x48] sm:$0xe]  ;;  %v4915_v35 = vld [vmem:[#allocation2 + $0x50] sm:$0x1]  ;;  %v3991_v29 = vcombine.low %v2069_v38, %v2072_v45  ;;  %v3976_v10 = vrot.slane %v1968_v14, 9  ;;  %v2077_v11 = vrot.slane %v2075_v43, 4 }
 0x173   : > { %v3973_v12 = vrot.slane %v1965_v20, 9  ;;  %v2057_v27 = vrot.slane %v4915_v35, 5  ;;  %v3977_v33 = vrot.slane %v1969_v8, 9 }
 0x174   : > { %v2076_v20 = vsel %vm5910_vm0, %v3976_v10, %v2075_v43  ;;  %v2079_v19 = vsel %vm5910_vm0, %v2077_v11, %v2078_v21 }
 0x175   : > { %v2055_v9 = vsel %vm5910_vm0, %v3973_v12, %v2054_v25 }
 0x179   : > { %4271 = vmatmul.mubr.msk.bf16.gmra.mrb[28].mxu0 %vm399_vm12, %v3950_v49  ;;  %v3984_v49 = vcombine.low %v2020_v52, %v2023_v13  ;;  %v1966_v13 = vld [vmem:[#allocation2 + $0x54] sm:$0xe] }
 0x17a   : > { %4276 = vmatprep.mubr.msk.bf16.mxu0 %vm399_vm12, %v3983_v48  ;;  %v2056_v48 = vrot.slane %v2054_v25, 4  ;;  %v3974_v54 = vrot.slane %v1966_v13, 9  ;;  %v2084_v25 = vrot.slane %v2082_v22, 4 }
 0x17c   : > { %v2058_v52 = vsel %vm5910_vm0, %v2056_v48, %v2057_v27  ;;  %v2062_v1 = vsel %vm5910_vm0, %v3974_v54, %v2061_v58  ;;  %v2086_v47 = vsel %vm5910_vm0, %v2084_v25, %v2085_v46 }
 0x17d   : > { %v3989_v2 = vcombine.low %v2055_v9, %v2058_v52 }
 0x181   : > { %4277 = vmatmul.mubr.msk.bf16.vlgmr.msra.gmra.mrb[0].mxu0 %vm399_vm12, %v3984_v49  ;;  %v4917_v49 = vld [vmem:[#allocation2 + $0x5c] sm:$0x1] }
 0x182   : > { %4280 = vmatprep.mubr.msk.bf16.mxu0 %vm399_vm12, %v3985_v26  ;;  %v2064_v26 = vrot.slane %v4917_v49, 5 }
 0x184   : > { %v2065_v7 = vsel %vm5910_vm0, %v2063_v55, %v2064_v26 }
 0x185   : > { %v3990_v50 = vcombine.low %v2062_v1, %v2065_v7 }
 0x189   : > { %4281 = vmatmul.mubr.msk.bf16.gmra.mrb[4].mxu0 %vm399_vm12, %v3986_v41  ;;  %v2083_v41 = vsel %vm5910_vm0, %v3977_v33, %v2082_v22 }
 0x18a   : > { %4284 = vmatprep.mubr.msk.bf16.mxu0 %vm399_vm12, %v3987_v24  ;;  %v3992_v24 = vcombine.low %v2076_v20, %v2079_v19  ;;  %v3993_v37 = vcombine.low %v2083_v41, %v2086_v47 }
 0x191   : > { %4285 = vmatmul.mubr.msk.bf16.gmra.mrb[8].mxu0 %vm399_vm12, %v3988_v17 }
 0x192   : > { %4288 = vmatprep.mubr.msk.bf16.mxu0 %vm399_vm12, %v3989_v2 }
 0x199   : > { %4289 = vmatmul.mubr.msk.bf16.gmra.mrb[12].mxu0 %vm399_vm12, %v3990_v50 }
 0x19a   : > { %4292 = vmatprep.mubr.msk.bf16.mxu0 %vm399_vm12, %v3991_v29 }
 0x1a1   : > { %4293 = vmatmul.mubr.msk.bf16.gmra.mrb[16].mxu0 %vm399_vm12, %v3992_v24 }
 0x1a2   : > { %4296 = vmatprep.mubr.msk.bf16.mxu0 %vm399_vm12, %v3993_v37 }
 0x1a9   : > { %4297 = vmatmul.mubr.msk.bf16.gmra.mrb[20].mxu0 %vm399_vm12, %v3994_v42 }
 0x1aa   : > { %4300 = vmatprep.mubr.msk.bf16.mxu0 %vm399_vm12, %v3995_v60 }
 0x1b1   : > { %4301 = vmatmul.mubr.msk.bf16.gmra.mrb[24].mxu0 %vm399_vm12, %v3996_v16 }
 0x1b2   : > { %4304 = vmatprep.mubr.msk.bf16.mxu0 %vm399_vm12, %v3997_v56 }
 0x1b9   : > { %4305 = vmatmul.mubr.msk.bf16.gmra.mrb[28].mxu0 %vm399_vm12, %v3998_v34 }
 0x254   : > { %v4278_v42 = vpop.f32.mrb[0].mxu0 }
 0x255   : > { %v6118_v3 = vadd.f32 %v4278_v42, %v6115_v36  ;;  %v2257_v60 = vpop.f32.mrb[1].mxu0 }
 0x256   : > { %v6121_v61 = vadd.f32 %v6115_v36, %v2257_v60  ;;  %v4279_v63 = vpop.f32.mrb[2].mxu0 }
 0x257   : > { %v2457_v5 = vsub.f32 0.0, %v6118_v3  ;;  %v6125_v51 = vadd.f32 %v4279_v63, %v6115_v36  ;;  %v2260_v16 = vpop.f32.mrb[3].mxu0 }
 0x258   : > { %v2455_v18 = vsub.f32 0.0, %v6121_v61  ;;  %v6129_v56 = vadd.f32 %v6115_v36, %v2260_v16 }
 0x259   : > { %v2491_v15 = vmul.f32 1.442695, %v2457_v5  ;;  %v2458_v34 = vsub.f32 0.0, %v6125_v51 }
 0x25a   : > { %v2487_v0 = vmul.f32 1.442695, %v2455_v18  ;;  %v2456_v44 = vsub.f32 0.0, %v6129_v56 }
 0x25b   : > { %4639 = vpow2.f32 %v2491_v15  ;;  %v2493_v59 = vmul.f32 1.442695, %v2458_v34 }
 0x25c   : > { %4641 = vpow2.f32 %v2487_v0  ;;  %v2489_v12 = vmul.f32 1.442695, %v2456_v44  ;;  %v4282_v48 = vpop.f32.mrb[4].mxu0 }
 0x25d   : > { %4643 = vpow2.f32 %v2493_v59  ;;  %v6134_v35 = vadd.f32 %v4282_v48, %v6115_v36  ;;  %v2273_v27 = vpop.f32.mrb[5].mxu0 }
 0x25e   : > { %4645 = vpow2.f32 %v2489_v12  ;;  %v6137_v32 = vadd.f32 %v6115_v36, %v2273_v27  ;;  %v4283_v31 = vpop.f32.mrb[6].mxu0 }
 0x25f   : > { %v2461_v53 = vsub.f32 0.0, %v6134_v35  ;;  %v6141_v58 = vadd.f32 %v4283_v31, %v6115_v36  ;;  %v2276_v9 = vpop.f32.mrb[7].mxu0 }
 0x260   : > { %v2459_v52 = vsub.f32 0.0, %v6137_v32  ;;  %v6145_v13 = vadd.f32 %v6115_v36, %v2276_v9 }
 0x261   : > { %v2499_v57 = vmul.f32 1.442695, %v2461_v53  ;;  %v2462_v40 = vsub.f32 0.0, %v6141_v58 }
 0x262   : > { %v2495_v17 = vmul.f32 1.442695, %v2459_v52  ;;  %v2460_v2 = vsub.f32 0.0, %v6145_v13 }
 0x263   : > { %4647 = vpow2.f32 %v2499_v57  ;;  %v2501_v54 = vmul.f32 1.442695, %v2462_v40 }
 0x264   : > { %4649 = vpow2.f32 %v2495_v17  ;;  %v2497_v55 = vmul.f32 1.442695, %v2460_v2  ;;  %v4286_v49 = vpop.f32.mrb[8].mxu0 }
 0x265   : > { %v4640_v26 = vpop.eup %4639  ;;  %4651 = vpow2.f32 %v2501_v54  ;;  %v6150_v6 = vadd.f32 %v4286_v49, %v6115_v36  ;;  %v2289_v23 = vpop.f32.mrb[9].mxu0 }
 0x266   : > { %v4642_v30 = vpop.eup %4641  ;;  %v2553_v1 = vadd.f32 1.0, %v4640_v26  ;;  %4653 = vpow2.f32 %v2497_v55  ;;  %v6153_v7 = vadd.f32 %v6115_v36, %v2289_v23  ;;  %v4287_v43 = vpop.f32.mrb[10].mxu0 }
 0x267   : > { %v4644_v38 = vpop.eup %4643  ;;  %v2551_v45 = vadd.f32 1.0, %v4642_v30  ;;  %v2465_v14 = vsub.f32 0.0, %v6150_v6  ;;  %v6157_v22 = vadd.f32 %v4287_v43, %v6115_v36  ;;  %v2292_v8 = vpop.f32.mrb[11].mxu0 }
 0x268   : > { %v4646_v50 = vpop.eup %4645  ;;  %4655 = vrcp.f32 %v2553_v1  ;;  %v2554_v29 = vadd.f32 1.0, %v4644_v38  ;;  %v2463_v10 = vsub.f32 0.0, %v6153_v7  ;;  %v6161_v11 = vadd.f32 %v6115_v36, %v2292_v8 }
 0x269   : > { %4657 = vrcp.f32 %v2551_v45  ;;  %v2552_v21 = vadd.f32 1.0, %v4646_v50  ;;  %v2507_v33 = vmul.f32 1.442695, %v2465_v14  ;;  %v2466_v25 = vsub.f32 0.0, %v6157_v22 }
 0x26a   : > { %4659 = vrcp.f32 %v2554_v29  ;;  %v2503_v46 = vmul.f32 1.442695, %v2463_v10  ;;  %v2464_v20 = vsub.f32 0.0, %v6161_v11 }
 0x26b   : > { %4661 = vrcp.f32 %v2552_v21  ;;  %v2509_v19 = vmul.f32 1.442695, %v2466_v25 }
 0x26c   : > { %4663 = vpow2.f32 %v2507_v33  ;;  %v2505_v41 = vmul.f32 1.442695, %v2464_v20  ;;  %v4290_v47 = vpop.f32.mrb[12].mxu0 }
 0x26d   : > { %v4648_v24 = vpop.eup %4647  ;;  %4665 = vpow2.f32 %v2503_v46  ;;  %v6166_v37 = vadd.f32 %v4290_v47, %v6115_v36  ;;  %v2305_v28 = vpop.f32.mrb[13].mxu0 }
 0x26e   : > { %v4650_v62 = vpop.eup %4649  ;;  %v2557_v39 = vadd.f32 1.0, %v4648_v24  ;;  %4667 = vpow2.f32 %v2509_v19  ;;  %v6169_v42 = vadd.f32 %v6115_v36, %v2305_v28  ;;  %v4291_v60 = vpop.f32.mrb[14].mxu0 }
 0x26f   : > { %v4652_v63 = vpop.eup %4651  ;;  %v2555_v5 = vadd.f32 1.0, %v4650_v62  ;;  %4669 = vpow2.f32 %v2505_v41  ;;  %v2469_v16 = vsub.f32 0.0, %v6166_v37  ;;  %v6173_v18 = vadd.f32 %v4291_v60, %v6115_v36  ;;  %v2308_v15 = vpop.f32.mrb[15].mxu0 }
 0x270   : > { %v4654_v34 = vpop.eup %4653  ;;  %4671 = vrcp.f32 %v2557_v39  ;;  %v2558_v0 = vadd.f32 1.0, %v4652_v63  ;;  %v2467_v44 = vsub.f32 0.0, %v6169_v42  ;;  %v6177_v59 = vadd.f32 %v6115_v36, %v2308_v15 }
 0x271   : > { %4673 = vrcp.f32 %v2555_v5  ;;  %v2556_v12 = vadd.f32 1.0, %v4654_v34  ;;  %v2515_v48 = vmul.f32 1.442695, %v2469_v16  ;;  %v2470_v27 = vsub.f32 0.0, %v6173_v18 }
 0x272   : > { %v4656_v31 = vpop.eup %4655  ;;  %4675 = vrcp.f32 %v2558_v0  ;;  %v2511_v53 = vmul.f32 1.442695, %v2467_v44  ;;  %v2468_v9 = vsub.f32 0.0, %v6177_v59  ;;  %v2976_v16 = vsel %vm1502_vm4, %v6109_v4, 0 }
 0x273   : > { %v4658_v52 = vpop.eup %4657  ;;  %4677 = vrcp.f32 %v2556_v12  ;;  %v2517_v57 = vmul.f32 1.442695, %v2470_v27  ;;  %v2617_v55 = vmul.f32 %v4656_v31, %v6118_v3 }
 0x274   : > { %v4660_v40 = vpop.eup %4659  ;;  %4679 = vpow2.f32 %v2515_v48  ;;  %v2513_v17 = vmul.f32 1.442695, %v2468_v9  ;;  %v4294_v2 = vpop.f32.mrb[16].mxu0  ;;  %v2615_v1 = vmul.f32 %v4658_v52, %v6121_v61 }
 0x275   : > { %v4662_v54 = vpop.eup %4661  ;;  %v2618_v49 = vmul.f32 %v4660_v40, %v6125_v51  ;;  %4681 = vpow2.f32 %v2511_v53  ;;  %v6184_v26 = vadd.f32 %v4294_v2, %v6115_v36  ;;  %v2321_v23 = vpop.f32.mrb[17].mxu0 }
 0x276   : > { %v4664_v30 = vpop.eup %4663  ;;  %v2616_v43 = vmul.f32 %v4662_v54, %v6129_v56  ;;  %4683 = vpow2.f32 %v2517_v57  ;;  %v6189_v38 = vadd.f32 %v6115_v36, %v2321_v23  ;;  %v4295_v45 = vpop.f32.mrb[18].mxu0 }
 0x277   : > { %v4666_v14 = vpop.eup %4665  ;;  %v2648_v8 = vpack.c.bf16 %v2618_v49, %v2617_v55  ;;  %v2561_v3 = vadd.f32 1.0, %v4664_v30  ;;  %4685 = vpow2.f32 %v2513_v17  ;;  %v2473_v51 = vsub.f32 0.0, %v6184_v26  ;;  %v2324_v50 = vpop.f32.mrb[19].mxu0 }
 0x278   : > { %v4668_v29 = vpop.eup %4667  ;;  %v2647_v10 = vpack.c.bf16 %v2616_v43, %v2615_v1  ;;  %v2559_v21 = vadd.f32 1.0, %v4666_v14  ;;  %v2471_v33 = vsub.f32 0.0, %v6189_v38  ;;  %v6194_v61 = vadd.f32 %v4295_v45, %v6115_v36  ;;  %v6231_v14 = vld [vmem:[#allocation10 + $0x4] sm:$0x3] }
 0x279   : > { %v4670_v56 = vpop.eup %4669  ;;  %2665 = vst.msk [vmem:[#allocation3 + $0x10] sm:$0xff] %vm399_vm12, %v2648_v8  ;;  %4687 = vrcp.f32 %v2561_v3  ;;  %v2562_v25 = vadd.f32 1.0, %v4668_v29  ;;  %v2523_v46 = vmul.f32 1.442695, %v2473_v51  ;;  %v6198_v20 = vadd.f32 %v6115_v36, %v2324_v50 }
 0x27a   : > { %v4672_v19 = vpop.eup %4671  ;;  %2664 = vst.msk [vmem:[#allocation3 + $0x8] sm:$0xff] %vm399_vm12, %v2647_v10  ;;  %4689 = vrcp.f32 %v2559_v21  ;;  %v2560_v41 = vadd.f32 1.0, %v4670_v56  ;;  %v2519_v47 = vmul.f32 1.442695, %v2471_v33  ;;  %v2474_v24 = vsub.f32 0.0, %v6194_v61 }
 0x27b   : > { %v4674_v28 = vpop.eup %4673  ;;  %4691 = vrcp.f32 %v2562_v25  ;;  %v2472_v62 = vsub.f32 0.0, %v6198_v20  ;;  %v2621_v60 = vmul.f32 %v4672_v19, %v6134_v35 }
 0x27c   : > { %v4676_v39 = vpop.eup %4675  ;;  %4693 = vrcp.f32 %v2560_v41  ;;  %v2525_v63 = vmul.f32 1.442695, %v2474_v24  ;;  %v4298_v5 = vpop.f32.mrb[20].mxu0  ;;  %v2619_v27 = vmul.f32 %v4674_v28, %v6137_v32 }
 0x27d   : > { %v4678_v15 = vpop.eup %4677  ;;  %v2622_v34 = vmul.f32 %v4676_v39, %v6141_v58  ;;  %4695 = vpow2.f32 %v2523_v46  ;;  %v2521_v0 = vmul.f32 1.442695, %v2472_v62  ;;  %v6208_v44 = vadd.f32 %v4298_v5, %v6115_v36  ;;  %v2337_v12 = vpop.f32.mrb[21].mxu0 }
 0x27e   : > { %v4680_v48 = vpop.eup %4679  ;;  %v2620_v35 = vmul.f32 %v4678_v15, %v6145_v13  ;;  %4697 = vpow2.f32 %v2519_v47  ;;  %v6213_v31 = vadd.f32 %v6115_v36, %v2337_v12  ;;  %v4299_v53 = vpop.f32.mrb[22].mxu0 }
 0x27f   : > { %v4682_v4 = vpop.eup %4681  ;;  %v2650_v9 = vpack.c.bf16 %v2622_v34, %v2621_v60  ;;  %v2565_v52 = vadd.f32 1.0, %v4680_v48  ;;  %4699 = vpow2.f32 %v2525_v63  ;;  %v2477_v58 = vsub.f32 0.0, %v6208_v44  ;;  %v2340_v57 = vpop.f32.mrb[23].mxu0 }
 0x280   : > { %v4684_v40 = vpop.eup %4683  ;;  %v2649_v17 = vpack.c.bf16 %v2620_v35, %v2619_v27  ;;  %v2563_v2 = vadd.f32 1.0, %v4682_v4  ;;  %4701 = vpow2.f32 %v2521_v0  ;;  %v2475_v32 = vsub.f32 0.0, %v6213_v31  ;;  %v6229_v45 = vld [vmem:[#allocation3 + $0x10] sm:$0xff] }
 0x281   : > { %v4686_v54 = vpop.eup %4685  ;;  %2667 = vst.msk [vmem:[#allocation3 + $0x20] sm:$0xff] %vm399_vm12, %v2650_v9  ;;  %4703 = vrcp.f32 %v2565_v52  ;;  %v2566_v13 = vadd.f32 1.0, %v4684_v40  ;;  %v2531_v55 = vmul.f32 1.442695, %v2477_v58  ;;  %v6219_v49 = vadd.f32 %v4299_v53, %v6115_v36  ;;  %v6221_v23 = vld [vmem:[#allocation3 + $0x8] sm:$0xff] }
 0x282   : > { %2666 = vst.msk [vmem:[#allocation3 + $0x18] sm:$0xff] %vm399_vm12, %v2649_v17  ;;  %4705 = vrcp.f32 %v2563_v2  ;;  %v2564_v30 = vadd.f32 1.0, %v4686_v54  ;;  %v2527_v1 = vmul.f32 1.442695, %v2475_v32  ;;  %v6225_v43 = vadd.f32 %v6115_v36, %v2340_v57  ;;  %4310 = vmatprep.mubr.msk.bf16.mxu1 %vm399_vm12, %v6221_v23 }
 0x283   : > { %v4688_v8 = vpop.eup %4687  ;;  %4707 = vrcp.f32 %v2566_v13  ;;  %v2478_v3 = vsub.f32 0.0, %v6219_v49  ;;  %4311 = vmatmul.mubr.msk.bf16.vlgmr.msra.gmra.mrb[0].mxu1 %vm399_vm12, %v6229_v45 }
 0x284   : > { %v4690_v51 = vpop.eup %4689  ;;  %v2625_v50 = vmul.f32 %v4688_v8, %v6150_v6  ;;  %4709 = vrcp.f32 %v2564_v30  ;;  %v2476_v29 = vsub.f32 0.0, %v6225_v43  ;;  %4343 = vmatpush3.bf16.msra.mxu1 %v2976_v16  ;;  %v4302_v10 = vpop.f32.mrb[24].mxu0 }
 0x285   : > { %v4692_v21 = vpop.eup %4691  ;;  %v2623_v33 = vmul.f32 %v4690_v51, %v6153_v7  ;;  %4711 = vpow2.f32 %v2531_v55  ;;  %v2533_v56 = vmul.f32 1.442695, %v2478_v3  ;;  %v6240_v25 = vadd.f32 %v4302_v10, %v6115_v36  ;;  %v2353_v46 = vpop.f32.mrb[25].mxu0  ;;  %4543 = vmatprep.subr.msk.bf16.mxu1 %vm1502_vm4, %v6231_v14 }
 0x286   : > { %v4694_v19 = vpop.eup %4693  ;;  %v2626_v6 = vmul.f32 %v4692_v21, %v6157_v22  ;;  %4713 = vpow2.f32 %v2527_v1  ;;  %v2529_v41 = vmul.f32 1.442695, %v2476_v29  ;;  %v6246_v47 = vadd.f32 %v6115_v36, %v2353_v46  ;;  %v4303_v24 = vpop.f32.mrb[26].mxu0 }
 0x287   : > { %v4696_v28 = vpop.eup %4695  ;;  %v2624_v7 = vmul.f32 %v4694_v19, %v6161_v11  ;;  %4715 = vpow2.f32 %v2533_v56  ;;  %v2481_v62 = vsub.f32 0.0, %v6240_v25  ;;  %v6251_v39 = vadd.f32 %v4303_v24, %v6115_v36  ;;  %v2356_v60 = vpop.f32.mrb[27].mxu0 }
 0x288   : > { %v4698_v63 = vpop.eup %4697  ;;  %v2652_v5 = vpack.c.bf16 %v2626_v6, %v2625_v50  ;;  %v2569_v16 = vadd.f32 1.0, %v4696_v28  ;;  %4717 = vpow2.f32 %v2529_v41  ;;  %v2479_v22 = vsub.f32 0.0, %v6246_v47  ;;  %v6263_v4 = vld [vmem:[#allocation3 + $0x20] sm:$0xff] }
 0x289   : > { %v4700_v15 = vpop.eup %4699  ;;  %v2651_v34 = vpack.c.bf16 %v2624_v7, %v2623_v33  ;;  %v2567_v0 = vadd.f32 1.0, %v4698_v63  ;;  %v2482_v12 = vsub.f32 0.0, %v6251_v39  ;;  %v6255_v48 = vld [vmem:[#allocation3 + $0x18] sm:$0xff]  ;;  %v2539_v35 = vmul.f32 1.442695, %v2481_v62 }
 0x28a   : > { %v4702_v11 = vpop.eup %4701  ;;  %2669 = vst.msk [vmem:[#allocation3 + $0x30] sm:$0xff] %vm399_vm12, %v2652_v5  ;;  %4719 = vrcp.f32 %v2569_v16  ;;  %v2570_v27 = vadd.f32 1.0, %v4700_v15  ;;  %v6259_v53 = vadd.f32 %v6115_v36, %v2356_v60  ;;  %4314 = vmatprep.mubr.msk.bf16.mxu1 %vm399_vm12, %v6255_v48  ;;  %v2535_v58 = vmul.f32 1.442695, %v2479_v22 }
 0x28b   : > { %v4704_v9 = vpop.eup %4703  ;;  %2668 = vst.msk [vmem:[#allocation3 + $0x28] sm:$0xff] %vm399_vm12, %v2651_v34  ;;  %4721 = vrcp.f32 %v2567_v0  ;;  %v2568_v52 = vadd.f32 1.0, %v4702_v11  ;;  %4315 = vmatmul.mubr.msk.bf16.gmra.mrb[4].mxu1 %vm399_vm12, %v6263_v4  ;;  %v2541_v40 = vmul.f32 1.442695, %v2482_v12 }
 0x28c   : > { %v4706_v57 = vpop.eup %4705  ;;  %4723 = vrcp.f32 %v2570_v27  ;;  %v2480_v17 = vsub.f32 0.0, %v6259_v53  ;;  %v4306_v2 = vpop.f32.mrb[28].mxu0  ;;  %v2629_v54 = vmul.f32 %v4704_v9, %v6166_v37 }
 0x28d   : > { %v4708_v32 = vpop.eup %4707  ;;  %v2627_v13 = vmul.f32 %v4706_v57, %v6169_v42  ;;  %4725 = vrcp.f32 %v2568_v52  ;;  %v6272_v55 = vadd.f32 %v4306_v2, %v6115_v36  ;;  %v2369_v30 = vpop.f32.mrb[29].mxu0 }
 0x28e   : > { %v4710_v1 = vpop.eup %4709  ;;  %v2630_v8 = vmul.f32 %v4708_v32, %v6173_v18  ;;  %4727 = vpow2.f32 %v2539_v35  ;;  %v2537_v3 = vmul.f32 1.442695, %v2480_v17  ;;  %v6276_v51 = vadd.f32 %v6115_v36, %v2369_v30  ;;  %v4307_v50 = vpop.f32.mrb[30].mxu0 }
 0x28f   : > { %v4712_v29 = vpop.eup %4711  ;;  %v2628_v10 = vmul.f32 %v4710_v1, %v6177_v59  ;;  %4729 = vpow2.f32 %v2535_v58  ;;  %v2485_v37 = vsub.f32 0.0, %v6272_v55  ;;  %v6281_v42 = vadd.f32 %v4307_v50, %v6115_v36  ;;  %v2372_v21 = vpop.f32.mrb[31].mxu0 }
 0x290   : > { %v4714_v33 = vpop.eup %4713  ;;  %v2654_v56 = vpack.c.bf16 %v2630_v8, %v2629_v54  ;;  %v2573_v46 = vadd.f32 1.0, %v4712_v29  ;;  %4731 = vpow2.f32 %v2541_v40  ;;  %v2483_v18 = vsub.f32 0.0, %v6276_v51 }
 0x291   : > { %v4716_v19 = vpop.eup %4715  ;;  %v2653_v6 = vpack.c.bf16 %v2628_v10, %v2627_v13  ;;  %v2571_v41 = vadd.f32 1.0, %v4714_v33  ;;  %4733 = vpow2.f32 %v2537_v3  ;;  %v2547_v28 = vmul.f32 1.442695, %v2485_v37  ;;  %v6294_v16 = vld [vmem:[#allocation3 + $0x30] sm:$0xff] }
 0x292   : > { %v4718_v24 = vpop.eup %4717  ;;  %2671 = vst.msk [vmem:[#allocation3 + $0x40] sm:$0xff] %vm399_vm12, %v2654_v56  ;;  %4735 = vrcp.f32 %v2573_v46  ;;  %v2574_v59 = vadd.f32 1.0, %v4716_v19  ;;  %v2486_v7 = vsub.f32 0.0, %v6281_v42  ;;  %v6286_v62 = vld [vmem:[#allocation3 + $0x28] sm:$0xff]  ;;  %v2543_v63 = vmul.f32 1.442695, %v2483_v18 }
 0x293   : > { %2670 = vst.msk [vmem:[#allocation3 + $0x38] sm:$0xff] %vm399_vm12, %v2653_v6  ;;  %4737 = vrcp.f32 %v2571_v41  ;;  %v2572_v60 = vadd.f32 1.0, %v4718_v24  ;;  %v6290_v5 = vadd.f32 %v6115_v36, %v2372_v21  ;;  %4318 = vmatprep.mubr.msk.bf16.mxu1 %vm399_vm12, %v6286_v62 }
 0x294   : > { %v4720_v22 = vpop.eup %4719  ;;  %4739 = vrcp.f32 %v2574_v59  ;;  %v2549_v15 = vmul.f32 1.442695, %v2486_v7  ;;  %4319 = vmatmul.mubr.msk.bf16.gmra.mrb[8].mxu1 %vm399_vm12, %v6294_v16 }
 0x295   : > { %v4722_v34 = vpop.eup %4721  ;;  %4741 = vrcp.f32 %v2572_v60  ;;  %v2484_v0 = vsub.f32 0.0, %v6290_v5  ;;  %v2633_v36 = vmul.f32 %v4720_v22, %v6184_v26 }
 0x296   : > { %v4724_v12 = vpop.eup %4723  ;;  %4743 = vpow2.f32 %v2547_v28  ;;  %v2631_v52 = vmul.f32 %v4722_v34, %v6189_v38 }
 0x297   : > { %v4726_v11 = vpop.eup %4725  ;;  %v2634_v27 = vmul.f32 %v4724_v12, %v6194_v61  ;;  %4745 = vpow2.f32 %v2543_v63  ;;  %v2545_v35 = vmul.f32 1.442695, %v2484_v0 }
 0x298   : > { %v4728_v9 = vpop.eup %4727  ;;  %v2632_v58 = vmul.f32 %v4726_v11, %v6198_v20  ;;  %4747 = vpow2.f32 %v2549_v15 }
 0x299   : > { %v4730_v57 = vpop.eup %4729  ;;  %v2656_v40 = vpack.c.bf16 %v2634_v27, %v2633_v36  ;;  %v2577_v17 = vadd.f32 1.0, %v4728_v9  ;;  %4749 = vpow2.f32 %v2545_v35  ;;  %v6308_v38 = vld [vmem:[#allocation3 + $0x40] sm:$0xff] }
 0x29a   : > { %v4732_v2 = vpop.eup %4731  ;;  %v2655_v32 = vpack.c.bf16 %v2632_v58, %v2631_v52  ;;  %v2575_v54 = vadd.f32 1.0, %v4730_v57  ;;  %v6303_v13 = vld [vmem:[#allocation3 + $0x38] sm:$0xff] }
 0x29b   : > { %v4734_v26 = vpop.eup %4733  ;;  %2673 = vst.msk [vmem:[#allocation3 + $0x50] sm:$0xff] %vm399_vm12, %v2656_v40  ;;  %4751 = vrcp.f32 %v2577_v17  ;;  %v2578_v61 = vadd.f32 1.0, %v4732_v2  ;;  %4322 = vmatprep.mubr.msk.bf16.mxu1 %vm399_vm12, %v6303_v13 }
 0x29c   : > { %v4736_v20 = vpop.eup %4735  ;;  %2672 = vst.msk [vmem:[#allocation3 + $0x48] sm:$0xff] %vm399_vm12, %v2655_v32  ;;  %4753 = vrcp.f32 %v2575_v54  ;;  %v2576_v30 = vadd.f32 1.0, %v4734_v26  ;;  %4323 = vmatmul.mubr.msk.bf16.gmra.mrb[12].mxu1 %vm399_vm12, %v6308_v38 }
 0x29d   : > { %v4738_v1 = vpop.eup %4737  ;;  %4755 = vrcp.f32 %v2578_v61  ;;  %v2637_v50 = vmul.f32 %v4736_v20, %v6208_v44 }
 0x29e   : > { %v4740_v8 = vpop.eup %4739  ;;  %4757 = vrcp.f32 %v2576_v30  ;;  %v2635_v37 = vmul.f32 %v4738_v1, %v6213_v31 }
 0x29f   : > { %v4742_v3 = vpop.eup %4741  ;;  %v2638_v29 = vmul.f32 %v4740_v8, %v6219_v49 }
 0x2a0   : > { %v4744_v10 = vpop.eup %4743  ;;  %v2636_v21 = vmul.f32 %v4742_v3, %v6225_v43 }
 0x2a1   : > { %v4746_v33 = vpop.eup %4745  ;;  %v2658_v56 = vpack.c.bf16 %v2638_v29, %v2637_v50  ;;  %v2581_v46 = vadd.f32 1.0, %v4744_v10 }
 0x2a2   : > { %v4748_v18 = vpop.eup %4747  ;;  %v2657_v19 = vpack.c.bf16 %v2636_v21, %v2635_v37  ;;  %v2579_v6 = vadd.f32 1.0, %v4746_v33  ;;  %v6323_v31 = vld [vmem:[#allocation3 + $0x50] sm:$0xff] }
 0x2a3   : > { %v4750_v41 = vpop.eup %4749  ;;  %2675 = vst.msk [vmem:[#allocation3 + $0x60] sm:$0xff] %vm399_vm12, %v2658_v56  ;;  %4759 = vrcp.f32 %v2581_v46  ;;  %v2582_v24 = vadd.f32 1.0, %v4748_v18  ;;  %v6318_v59 = vld [vmem:[#allocation3 + $0x48] sm:$0xff] }
 0x2a4   : > { %2674 = vst.msk [vmem:[#allocation3 + $0x58] sm:$0xff] %vm399_vm12, %v2657_v19  ;;  %4761 = vrcp.f32 %v2579_v6  ;;  %v2580_v44 = vadd.f32 1.0, %v4750_v41  ;;  %4326 = vmatprep.mubr.msk.bf16.mxu1 %vm399_vm12, %v6318_v59 }
 0x2a5   : > { %v4752_v49 = vpop.eup %4751  ;;  %4763 = vrcp.f32 %v2582_v24  ;;  %4327 = vmatmul.mubr.msk.bf16.gmra.mrb[16].mxu1 %vm399_vm12, %v6323_v31 }
 0x2a6   : > { %v4754_v43 = vpop.eup %4753  ;;  %4765 = vrcp.f32 %v2580_v44  ;;  %v2641_v60 = vmul.f32 %v4752_v49, %v6240_v25 }
 0x2a7   : > { %v4756_v28 = vpop.eup %4755  ;;  %v2639_v22 = vmul.f32 %v4754_v43, %v6246_v47 }
 0x2a8   : > { %v4758_v7 = vpop.eup %4757  ;;  %v2642_v63 = vmul.f32 %v4756_v28, %v6251_v39 }
 0x2a9   : > { %v2640_v15 = vmul.f32 %v4758_v7, %v6259_v53 }
 0x2aa   : > { %v2660_v34 = vpack.c.bf16 %v2642_v63, %v2641_v60  ;;  %v2708_v11 = vld [vmem:[#allocation3 + $0x60] sm:$0xff] }
 0x2ab   : > { %v2659_v0 = vpack.c.bf16 %v2640_v15, %v2639_v22  ;;  %v2707_v12 = vld [vmem:[#allocation3 + $0x58] sm:$0xff] }
 0x2ac   : > { %2677 = vst.msk [vmem:[#allocation3 + $0x70] sm:$0xff] %vm399_vm12, %v2660_v34  ;;  %4330 = vmatprep.mubr.msk.bf16.mxu1 %vm399_vm12, %v2707_v12 }
 0x2ad   : > { %v4760_v36 = vpop.eup %4759  ;;  %2676 = vst.msk [vmem:[#allocation3 + $0x68] sm:$0xff] %vm399_vm12, %v2659_v0  ;;  %4331 = vmatmul.mubr.msk.bf16.gmra.mrb[20].mxu1 %vm399_vm12, %v2708_v11 }
 0x2ae   : > { %v4762_v25 = vpop.eup %4761  ;;  %v2645_v47 = vmul.f32 %v4760_v36, %v6272_v55  ;;  %v2680_v55 = vld [vmem:[#allocation3] sm:$0xff] }
 0x2af   : > { %v4764_v27 = vpop.eup %4763  ;;  %v2643_v35 = vmul.f32 %v4762_v25, %v6276_v51  ;;  %v3207_v51 = vsel %vm1502_vm4, %v6231_v14, 0 }
 0x2b0   : > { %v4766_v39 = vpop.eup %4765  ;;  %v2646_v53 = vmul.f32 %v4764_v27, %v6281_v42 }
 0x2b1   : > { %v2644_v9 = vmul.f32 %v4766_v39, %v6290_v5 }
 0x2b2   : > { %v2662_v52 = vpack.c.bf16 %v2646_v53, %v2645_v47 }
 0x2b3   : > { %v2661_v58 = vpack.c.bf16 %v2644_v9, %v2643_v35  ;;  %v2710_v40 = vld [vmem:[#allocation3 + $0x70] sm:$0xff] }
 0x2b4   : > { %2679 = vst.msk [vmem:[#allocation3 + $0x80] sm:$0xff] %vm399_vm12, %v2662_v52  ;;  %v2709_v57 = vld [vmem:[#allocation3 + $0x68] sm:$0xff] }
 0x2b5   : > { %2678 = vst.msk [vmem:[#allocation3 + $0x78] sm:$0xff] %vm399_vm12, %v2661_v58  ;;  %4334 = vmatprep.mubr.msk.bf16.mxu1 %vm399_vm12, %v2709_v57 }
 0x2b6   : > { %4335 = vmatmul.mubr.msk.bf16.gmra.mrb[24].mxu1 %vm399_vm12, %v2710_v40 }
 0x2bb   : > { %v2712_v42 = vld [vmem:[#allocation3 + $0x80] sm:$0xff] }
 0x2bc   : > { %v2711_v17 = vld [vmem:[#allocation3 + $0x78] sm:$0xff] }
 0x2bd   : > { %4338 = vmatprep.mubr.msk.bf16.mxu1 %vm399_vm12, %v2711_v17 }
 0x2be   : > { %4339 = vmatmul.mubr.msk.bf16.gmra.mrb[28].mxu1 %vm399_vm12, %v2712_v42 }
 0x2bf   : > { %4344 = vmatprep.mubr.msk.bf16.mxu1 %vm399_vm12, %v2680_v55 }
 0x2c6   : > { %4345 = vmatmul.mubr.msk.bf16.vlgmr.msra.gmra.mrb[0].mxu1 %vm399_vm12, %v6221_v23  ;;  %v3155_v23 = vld [vmem:[#allocation3 + $0x88] sm:$0xff] }
 0x2c7   : > { %4377 = vmatpush3.bf16.msra.mxu1 %v3207_v51  ;;  %4348 = vmatprep.mubr.msk.bf16.mxu1 %vm399_vm12, %v6229_v45 }
 0x2ce   : > { %4349 = vmatmul.mubr.msk.bf16.gmra.mrb[4].mxu1 %vm399_vm12, %v6255_v48 }
 0x2cf   : > { %4352 = vmatprep.mubr.msk.bf16.mxu1 %vm399_vm12, %v6263_v4 }
 0x2d6   : > { %4353 = vmatmul.mubr.msk.bf16.gmra.mrb[8].mxu1 %vm399_vm12, %v6286_v62 }
 0x2d7   : > { %4356 = vmatprep.mubr.msk.bf16.mxu1 %vm399_vm12, %v6294_v16 }
 0x2de   : > { %4357 = vmatmul.mubr.msk.bf16.gmra.mrb[12].mxu1 %vm399_vm12, %v6303_v13 }
 0x2df   : > { %4360 = vmatprep.mubr.msk.bf16.mxu1 %vm399_vm12, %v6308_v38 }
 0x2e6   : > { %4361 = vmatmul.mubr.msk.bf16.gmra.mrb[16].mxu1 %vm399_vm12, %v6318_v59 }
 0x2e7   : > { %4364 = vmatprep.mubr.msk.bf16.mxu1 %vm399_vm12, %v6323_v31 }
 0x2ee   : > { %4365 = vmatmul.mubr.msk.bf16.gmra.mrb[20].mxu1 %vm399_vm12, %v2707_v12 }
 0x2ef   : > { %4368 = vmatprep.mubr.msk.bf16.mxu1 %vm399_vm12, %v2708_v11 }
 0x2f6   : > { %4369 = vmatmul.mubr.msk.bf16.gmra.mrb[24].mxu1 %vm399_vm12, %v2709_v57 }
 0x2f7   : > { %4372 = vmatprep.mubr.msk.bf16.mxu1 %vm399_vm12, %v2710_v40 }
 0x2fe   : > { %4373 = vmatmul.mubr.msk.bf16.gmra.mrb[28].mxu1 %vm399_vm12, %v2711_v17 }
 0x2ff   : > { %4378 = vmatprep.mubr.msk.bf16.mxu1 %vm399_vm12, %v6229_v45  ;;  %v6398_v45 = vld [vmem:[#allocation12] ss:$0 sm:$0xff] }
 0x306   : > { %4379 = vmatmul.mubr.msk.bf16.vlgmr.msra.gmra.mrb[0].mxu1 %vm399_vm12, %v6255_v48 }
 0x307   : > { %4382 = vmatprep.mubr.msk.bf16.mxu1 %vm399_vm12, %v6263_v4 }
 0x30e   : > { %4383 = vmatmul.mubr.msk.bf16.gmra.mrb[4].mxu1 %vm399_vm12, %v6286_v62 }
 0x30f   : > { %4386 = vmatprep.mubr.msk.bf16.mxu1 %vm399_vm12, %v6294_v16 }
 0x316   : > { %4387 = vmatmul.mubr.msk.bf16.gmra.mrb[8].mxu1 %vm399_vm12, %v6303_v13 }
 0x317   : > { %4390 = vmatprep.mubr.msk.bf16.mxu1 %vm399_vm12, %v6308_v38 }
 0x31e   : > { %4391 = vmatmul.mubr.msk.bf16.gmra.mrb[12].mxu1 %vm399_vm12, %v6318_v59 }
 0x31f   : > { %4394 = vmatprep.mubr.msk.bf16.mxu1 %vm399_vm12, %v6323_v31 }
 0x326   : > { %4395 = vmatmul.mubr.msk.bf16.gmra.mrb[16].mxu1 %vm399_vm12, %v2707_v12 }
 0x327   : > { %4398 = vmatprep.mubr.msk.bf16.mxu1 %vm399_vm12, %v2708_v11 }
 0x32e   : > { %4399 = vmatmul.mubr.msk.bf16.gmra.mrb[20].mxu1 %vm399_vm12, %v2709_v57 }
 0x32f   : > { %4402 = vmatprep.mubr.msk.bf16.mxu1 %vm399_vm12, %v2710_v40 }
 0x336   : > { %4403 = vmatmul.mubr.msk.bf16.gmra.mrb[24].mxu1 %vm399_vm12, %v2711_v17 }
 0x337   : > { %4406 = vmatprep.mubr.msk.bf16.mxu1 %vm399_vm12, %v2712_v42 }
 0x33e   : > { %4407 = vmatmul.mubr.msk.bf16.gmra.mrb[28].mxu1 %vm399_vm12, %v3155_v23 }
 0x3d9   : > { %v4380_v14 = vpop.f32.mrb[0].mxu1 }
 0x3da   : > { %v6401_v48 = vadd.f32 %v4380_v14, %v6398_v45  ;;  %v3243_v4 = vpop.f32.mrb[1].mxu1 }
 0x3db   : > { %v6404_v62 = vadd.f32 %v6398_v45, %v3243_v4  ;;  %v4381_v5 = vpop.f32.mrb[2].mxu1 }
 0x3dc   : > { %v3443_v16 = vsub.f32 0.0, %v6401_v48  ;;  %v6408_v2 = vadd.f32 %v4381_v5, %v6398_v45  ;;  %v3246_v32 = vpop.f32.mrb[3].mxu1 }
 0x3dd   : > { %v3441_v54 = vsub.f32 0.0, %v6404_v62  ;;  %v6412_v13 = vadd.f32 %v6398_v45, %v3246_v32 }
 0x3de   : > { %v3477_v26 = vmul.f32 1.442695, %v3443_v16  ;;  %v3444_v61 = vsub.f32 0.0, %v6408_v2 }
 0x3df   : > { %v3473_v38 = vmul.f32 1.442695, %v3441_v54  ;;  %v3442_v20 = vsub.f32 0.0, %v6412_v13 }
 0x3e0   : > { %4767 = vpow2.f32 %v3477_v26  ;;  %v3479_v30 = vmul.f32 1.442695, %v3444_v61 }
 0x3e1   : > { %4769 = vpow2.f32 %v3473_v38  ;;  %v3475_v1 = vmul.f32 1.442695, %v3442_v20  ;;  %v4384_v8 = vpop.f32.mrb[4].mxu1 }
 0x3e2   : > { %4771 = vpow2.f32 %v3479_v30  ;;  %v6417_v3 = vadd.f32 %v4384_v8, %v6398_v45  ;;  %v3259_v50 = vpop.f32.mrb[5].mxu1 }
 0x3e3   : > { %4773 = vpow2.f32 %v3475_v1  ;;  %v6420_v29 = vadd.f32 %v6398_v45, %v3259_v50  ;;  %v4385_v10 = vpop.f32.mrb[6].mxu1 }
 0x3e4   : > { %v3447_v37 = vsub.f32 0.0, %v6417_v3  ;;  %v6424_v21 = vadd.f32 %v4385_v10, %v6398_v45  ;;  %v3262_v33 = vpop.f32.mrb[7].mxu1  ;;  %v3635_v10 = vld [vmem:[%s5396_s17 + $0x10] sm:$0xff] }
 0x3e5   : > { %v3445_v56 = vsub.f32 0.0, %v6420_v29  ;;  %v6428_v46 = vadd.f32 %v6398_v45, %v3262_v33 }
 0x3e6   : > { %v3485_v18 = vmul.f32 1.442695, %v3447_v37  ;;  %v3448_v19 = vsub.f32 0.0, %v6424_v21 }
 0x3e7   : > { %v3481_v6 = vmul.f32 1.442695, %v3445_v56  ;;  %v3446_v41 = vsub.f32 0.0, %v6428_v46 }
 0x3e8   : > { %4775 = vpow2.f32 %v3485_v18  ;;  %v3487_v24 = vmul.f32 1.442695, %v3448_v19  ;;  %v3633_v19 = vld [vmem:[%s5396_s17] sm:$0xff] }
 0x3e9   : > { %4777 = vpow2.f32 %v3481_v6  ;;  %v3483_v59 = vmul.f32 1.442695, %v3446_v41  ;;  %v4388_v44 = vpop.f32.mrb[8].mxu1 }
 0x3ea   : > { %v4768_v31 = vpop.eup %4767  ;;  %4779 = vpow2.f32 %v3487_v24  ;;  %v6433_v49 = vadd.f32 %v4388_v44, %v6398_v45  ;;  %v3275_v43 = vpop.f32.mrb[9].mxu1 }
 0x3eb   : > { %v4770_v28 = vpop.eup %4769  ;;  %v3539_v7 = vadd.f32 1.0, %v4768_v31  ;;  %4781 = vpow2.f32 %v3483_v59  ;;  %v6436_v60 = vadd.f32 %v6398_v45, %v3275_v43  ;;  %v4389_v63 = vpop.f32.mrb[10].mxu1  ;;  %v3636_v59 = vld [vmem:[%s5396_s17 + $0x18] sm:$0xff] }
 0x3ec   : > { %v4772_v22 = vpop.eup %4771  ;;  %v3537_v15 = vadd.f32 1.0, %v4770_v28  ;;  %v3451_v34 = vsub.f32 0.0, %v6433_v49  ;;  %v6440_v0 = vadd.f32 %v4389_v63, %v6398_v45  ;;  %v3278_v12 = vpop.f32.mrb[11].mxu1  ;;  %v3634_v63 = vld [vmem:[%s5396_s17 + $0x8] sm:$0xff] }
 0x3ed   : > { %v4774_v11 = vpop.eup %4773  ;;  %4783 = vrcp.f32 %v3539_v7  ;;  %v3540_v36 = vadd.f32 1.0, %v4772_v22  ;;  %v3449_v25 = vsub.f32 0.0, %v6436_v60  ;;  %v6444_v27 = vadd.f32 %v6398_v45, %v3278_v12 }
 0x3ee   : > { %4785 = vrcp.f32 %v3537_v15  ;;  %v3538_v39 = vadd.f32 1.0, %v4774_v11  ;;  %v3493_v47 = vmul.f32 1.442695, %v3451_v34  ;;  %v3452_v53 = vsub.f32 0.0, %v6440_v0 }
 0x3ef   : > { %4787 = vrcp.f32 %v3540_v36  ;;  %v3489_v35 = vmul.f32 1.442695, %v3449_v25  ;;  %v3450_v9 = vsub.f32 0.0, %v6444_v27 }
 0x3f0   : > { %4789 = vrcp.f32 %v3538_v39  ;;  %v3495_v52 = vmul.f32 1.442695, %v3452_v53 }
 0x3f1   : > { %4791 = vpow2.f32 %v3493_v47  ;;  %v3491_v58 = vmul.f32 1.442695, %v3450_v9  ;;  %v4392_v57 = vpop.f32.mrb[12].mxu1 }
 0x3f2   : > { %v4776_v40 = vpop.eup %4775  ;;  %4793 = vpow2.f32 %v3489_v35  ;;  %v6449_v17 = vadd.f32 %v4392_v57, %v6398_v45  ;;  %v3291_v55 = vpop.f32.mrb[13].mxu1 }
 0x3f3   : > { %v4778_v42 = vpop.eup %4777  ;;  %v3543_v51 = vadd.f32 1.0, %v4776_v40  ;;  %4795 = vpow2.f32 %v3495_v52  ;;  %v6452_v23 = vadd.f32 %v6398_v45, %v3291_v55  ;;  %v4393_v14 = vpop.f32.mrb[14].mxu1 }
 0x3f4   : > { %v4780_v4 = vpop.eup %4779  ;;  %v3541_v5 = vadd.f32 1.0, %v4778_v42  ;;  %4797 = vpow2.f32 %v3491_v58  ;;  %v3455_v16 = vsub.f32 0.0, %v6449_v17  ;;  %v6456_v32 = vadd.f32 %v4393_v14, %v6398_v45  ;;  %v3294_v54 = vpop.f32.mrb[15].mxu1 }
 0x3f5   : > { %v4782_v26 = vpop.eup %4781  ;;  %4799 = vrcp.f32 %v3543_v51  ;;  %v3544_v61 = vadd.f32 1.0, %v4780_v4  ;;  %v3453_v38 = vsub.f32 0.0, %v6452_v23  ;;  %v6460_v20 = vadd.f32 %v6398_v45, %v3294_v54  ;;  %v3639_v51 = vld [vmem:[%s5396_s17 + $0x30] sm:$0xff] }
 0x3f6   : > { %4801 = vrcp.f32 %v3541_v5  ;;  %v3542_v30 = vadd.f32 1.0, %v4782_v26  ;;  %v3501_v1 = vmul.f32 1.442695, %v3455_v16  ;;  %v3456_v8 = vsub.f32 0.0, %v6456_v32  ;;  %v3637_v26 = vld [vmem:[%s5396_s17 + $0x20] sm:$0xff] }
 0x3f7   : > { %v4784_v50 = vpop.eup %4783  ;;  %4803 = vrcp.f32 %v3544_v61  ;;  %v3497_v37 = vmul.f32 1.442695, %v3453_v38  ;;  %v3454_v33 = vsub.f32 0.0, %v6460_v20 }
 0x3f8   : > { %v4786_v56 = vpop.eup %4785  ;;  %v3603_v18 = vmul.f32 %v4784_v50, %v6401_v48  ;;  %4805 = vrcp.f32 %v3542_v30  ;;  %v3503_v6 = vmul.f32 1.442695, %v3456_v8 }
 0x3f9   : > { %v4788_v41 = vpop.eup %4787  ;;  %v3601_v24 = vmul.f32 %v4786_v56, %v6404_v62  ;;  %4807 = vpow2.f32 %v3501_v1  ;;  %v3499_v44 = vmul.f32 1.442695, %v3454_v33  ;;  %v4396_v31 = vpop.f32.mrb[16].mxu1  ;;  %v3640_v1 = vld [vmem:[%s5396_s17 + $0x38] sm:$0xff]  ;;  %v3638_v56 = vld [vmem:[%s5396_s17 + $0x28] sm:$0xff] }
 0x3fa   : > { %v4790_v43 = vpop.eup %4789  ;;  %v3667_v28 = vadd.f32 %v3635_v10, %v3603_v18  ;;  %v3604_v7 = vmul.f32 %v4788_v41, %v6408_v2  ;;  %4809 = vpow2.f32 %v3497_v37  ;;  %v6472_v22 = vadd.f32 %v4396_v31, %v6398_v45  ;;  %v3307_v48 = vpop.f32.mrb[17].mxu1 }
 0x3fb   : > { %v4792_v15 = vpop.eup %4791  ;;  %v3665_v34 = vadd.f32 %v3633_v19, %v3601_v24  ;;  %v3602_v12 = vmul.f32 %v4790_v43, %v6412_v13  ;;  %4811 = vpow2.f32 %v3503_v6  ;;  %v6476_v62 = vadd.f32 %v6398_v45, %v3307_v48  ;;  %v4397_v11 = vpop.f32.mrb[18].mxu1 }
 0x3fc   : > { %v4794_v36 = vpop.eup %4793  ;;  %3699 = vst.msk [vmem:[%s6480_s24 + $0x10] sm:$0xff] %vm399_vm12, %v3667_v28  ;;  %v3668_v2 = vadd.f32 %v3636_v59, %v3604_v7  ;;  %v3547_v25 = vadd.f32 1.0, %v4792_v15  ;;  %4813 = vpow2.f32 %v3499_v44  ;;  %v3459_v13 = vsub.f32 0.0, %v6472_v22  ;;  %v3310_v39 = vpop.f32.mrb[19].mxu1 }
 0x3fd   : > { %v4796_v47 = vpop.eup %4795  ;;  %3697 = vst.msk [vmem:[%s6480_s24] sm:$0xff] %vm399_vm12, %v3665_v34  ;;  %v3666_v53 = vadd.f32 %v3634_v63, %v3602_v12  ;;  %v3545_v35 = vadd.f32 1.0, %v4794_v36  ;;  %v3457_v9 = vsub.f32 0.0, %v6476_v62  ;;  %v6489_v52 = vadd.f32 %v4397_v11, %v6398_v45 }
 0x3fe   : > { %v4798_v58 = vpop.eup %4797  ;;  %3700 = vst.msk [vmem:[%s6480_s24 + $0x18] sm:$0xff] %vm399_vm12, %v3668_v2  ;;  %4815 = vrcp.f32 %v3547_v25  ;;  %v3548_v57 = vadd.f32 1.0, %v4796_v47  ;;  %v3509_v40 = vmul.f32 1.442695, %v3459_v13  ;;  %v6494_v55 = vadd.f32 %v6398_v45, %v3310_v39  ;;  %v3643_v13 = vld [vmem:[%s5396_s17 + $0x50] sm:$0xff] }
 0x3ff   : > { %v4800_v42 = vpop.eup %4799  ;;  %3698 = vst.msk [vmem:[%s6480_s24 + $0x8] sm:$0xff] %vm399_vm12, %v3666_v53  ;;  %4817 = vrcp.f32 %v3545_v35  ;;  %v3546_v14 = vadd.f32 1.0, %v4798_v58  ;;  %v3505_v4 = vmul.f32 1.442695, %v3457_v9  ;;  %v3460_v5 = vsub.f32 0.0, %v6489_v52  ;;  %v3641_v9 = vld [vmem:[%s5396_s17 + $0x40] sm:$0xff] }
 0x400   : > { %v4802_v16 = vpop.eup %4801  ;;  %v3607_v54 = vmul.f32 %v4800_v42, %v6417_v3  ;;  %4819 = vrcp.f32 %v3548_v57  ;;  %v3458_v61 = vsub.f32 0.0, %v6494_v55 }
 0x401   : > { %v4804_v38 = vpop.eup %4803  ;;  %v3605_v30 = vmul.f32 %v4802_v16, %v6420_v29  ;;  %4821 = vrcp.f32 %v3546_v14  ;;  %v3511_v8 = vmul.f32 1.442695, %v3460_v5  ;;  %v4400_v50 = vpop.f32.mrb[20].mxu1 }
 0x402   : > { %v4806_v10 = vpop.eup %4805  ;;  %v3671_v37 = vadd.f32 %v3639_v51, %v3607_v54  ;;  %v3608_v33 = vmul.f32 %v4804_v38, %v6424_v21  ;;  %4823 = vpow2.f32 %v3509_v40  ;;  %v3507_v18 = vmul.f32 1.442695, %v3458_v61  ;;  %v3323_v3 = vpop.f32.mrb[21].mxu1  ;;  %v3644_v51 = vld [vmem:[%s5396_s17 + $0x58] sm:$0xff] }
 0x403   : > { %v4808_v19 = vpop.eup %4807  ;;  %v3669_v6 = vadd.f32 %v3637_v26, %v3605_v30  ;;  %v3606_v41 = vmul.f32 %v4806_v10, %v6428_v46  ;;  %4825 = vpow2.f32 %v3505_v4  ;;  %v6509_v29 = vadd.f32 %v4400_v50, %v6398_v45  ;;  %v4401_v24 = vpop.f32.mrb[22].mxu1  ;;  %v3642_v26 = vld [vmem:[%s5396_s17 + $0x48] sm:$0xff] }
 0x404   : > { %v4810_v59 = vpop.eup %4809  ;;  %3703 = vst.msk [vmem:[%s6480_s24 + $0x30] sm:$0xff] %vm399_vm12, %v3671_v37  ;;  %v3672_v44 = vadd.f32 %v3640_v1, %v3608_v33  ;;  %v3551_v21 = vadd.f32 1.0, %v4808_v19  ;;  %4827 = vpow2.f32 %v3511_v8  ;;  %v6514_v31 = vadd.f32 %v6398_v45, %v3323_v3  ;;  %v3326_v43 = vpop.f32.mrb[23].mxu1 }
 0x405   : > { %v4812_v28 = vpop.eup %4811  ;;  %3701 = vst.msk [vmem:[%s6480_s24 + $0x20] sm:$0xff] %vm399_vm12, %v3669_v6  ;;  %v3670_v46 = vadd.f32 %v3638_v56, %v3606_v41  ;;  %v3549_v7 = vadd.f32 1.0, %v4810_v59  ;;  %4829 = vpow2.f32 %v3507_v18  ;;  %v3463_v63 = vsub.f32 0.0, %v6509_v29 }
 0x406   : > { %v4814_v48 = vpop.eup %4813  ;;  %3704 = vst.msk [vmem:[%s6480_s24 + $0x38] sm:$0xff] %vm399_vm12, %v3672_v44  ;;  %4831 = vrcp.f32 %v3551_v21  ;;  %v3552_v15 = vadd.f32 1.0, %v4812_v28  ;;  %v3461_v34 = vsub.f32 0.0, %v6514_v31  ;;  %v6523_v12 = vadd.f32 %v4401_v24, %v6398_v45  ;;  %v3647_v21 = vld [vmem:[%s5396_s17 + $0x70] sm:$0xff] }
 0x407   : > { %3702 = vst.msk [vmem:[%s6480_s24 + $0x28] sm:$0xff] %vm399_vm12, %v3670_v46  ;;  %4833 = vrcp.f32 %v3549_v7  ;;  %v3550_v11 = vadd.f32 1.0, %v4814_v48  ;;  %v3517_v36 = vmul.f32 1.442695, %v3463_v63  ;;  %v6528_v2 = vadd.f32 %v6398_v45, %v3326_v43  ;;  %v3645_v63 = vld [vmem:[%s5396_s17 + $0x60] sm:$0xff] }
 0x408   : > { %v4816_v25 = vpop.eup %4815  ;;  %4835 = vrcp.f32 %v3552_v15  ;;  %v3513_v39 = vmul.f32 1.442695, %v3461_v34  ;;  %v3464_v47 = vsub.f32 0.0, %v6523_v12 }
 0x409   : > { %v4818_v53 = vpop.eup %4817  ;;  %v3611_v35 = vmul.f32 %v4816_v25, %v6433_v49  ;;  %4837 = vrcp.f32 %v3550_v11  ;;  %v3462_v58 = vsub.f32 0.0, %v6528_v2  ;;  %v4404_v57 = vpop.f32.mrb[24].mxu1  ;;  %v3648_v25 = vld [vmem:[%s5396_s17 + $0x78] sm:$0xff] }
 0x40a   : > { %v4820_v40 = vpop.eup %4819  ;;  %v3609_v42 = vmul.f32 %v4818_v53, %v6436_v60  ;;  %4839 = vpow2.f32 %v3517_v36  ;;  %v3519_v14 = vmul.f32 1.442695, %v3464_v47  ;;  %v6538_v4 = vadd.f32 %v4404_v57, %v6398_v45  ;;  %v3339_v5 = vpop.f32.mrb[25].mxu1 }
 0x40b   : > { %v4822_v16 = vpop.eup %4821  ;;  %v3675_v54 = vadd.f32 %v3643_v13, %v3611_v35  ;;  %v3612_v49 = vmul.f32 %v4820_v40, %v6440_v0  ;;  %4841 = vpow2.f32 %v3513_v39  ;;  %v3515_v61 = vmul.f32 1.442695, %v3462_v58  ;;  %v4405_v38 = vpop.f32.mrb[26].mxu1 }
 0x40c   : > { %v4824_v30 = vpop.eup %4823  ;;  %v3673_v1 = vadd.f32 %v3641_v9, %v3609_v42  ;;  %v3610_v60 = vmul.f32 %v4822_v16, %v6444_v27  ;;  %4843 = vpow2.f32 %v3519_v14  ;;  %v3467_v8 = vsub.f32 0.0, %v6538_v4  ;;  %v3342_v50 = vpop.f32.mrb[27].mxu1  ;;  %v3646_v9 = vld [vmem:[%s5396_s17 + $0x68] sm:$0xff] }
 0x40d   : > { %v4826_v10 = vpop.eup %4825  ;;  %3707 = vst.msk [vmem:[%s6480_s24 + $0x50] sm:$0xff] %vm399_vm12, %v3675_v54  ;;  %v3676_v37 = vadd.f32 %v3644_v51, %v3612_v49  ;;  %v3555_v33 = vadd.f32 1.0, %v4824_v30  ;;  %4845 = vpow2.f32 %v3515_v61  ;;  %v6547_v0 = vadd.f32 %v6398_v45, %v3339_v5 }
 0x40e   : > { %v4828_v56 = vpop.eup %4827  ;;  %3705 = vst.msk [vmem:[%s6480_s24 + $0x40] sm:$0xff] %vm399_vm12, %v3673_v1  ;;  %v3674_v27 = vadd.f32 %v3642_v26, %v3610_v60  ;;  %v3553_v18 = vadd.f32 1.0, %v4826_v10  ;;  %v3525_v3 = vmul.f32 1.442695, %v3467_v8  ;;  %v6552_v19 = vadd.f32 %v4405_v38, %v6398_v45 }
 0x40f   : > { %v4830_v6 = vpop.eup %4829  ;;  %3708 = vst.msk [vmem:[%s6480_s24 + $0x58] sm:$0xff] %vm399_vm12, %v3676_v37  ;;  %4847 = vrcp.f32 %v3555_v33  ;;  %v3556_v41 = vadd.f32 1.0, %v4828_v56  ;;  %v3465_v24 = vsub.f32 0.0, %v6547_v0  ;;  %v6558_v59 = vadd.f32 %v6398_v45, %v3342_v50  ;;  %v3651_v37 = vld [vmem:[%s5396_s17 + $0x90] sm:$0xff] }
 0x410   : > { %v4832_v44 = vpop.eup %4831  ;;  %3706 = vst.msk [vmem:[%s6480_s24 + $0x48] sm:$0xff] %vm399_vm12, %v3674_v27  ;;  %4849 = vrcp.f32 %v3553_v18  ;;  %v3554_v43 = vadd.f32 1.0, %v4830_v6  ;;  %v3468_v28 = vsub.f32 0.0, %v6552_v19 }
 0x411   : > { %v4834_v46 = vpop.eup %4833  ;;  %v3615_v7 = vmul.f32 %v4832_v44, %v6449_v17  ;;  %4851 = vrcp.f32 %v3556_v41  ;;  %v3521_v48 = vmul.f32 1.442695, %v3465_v24  ;;  %v3466_v15 = vsub.f32 0.0, %v6558_v59  ;;  %v4408_v34 = vpop.f32.mrb[28].mxu1 }
 0x412   : > { %v4836_v11 = vpop.eup %4835  ;;  %v3613_v36 = vmul.f32 %v4834_v46, %v6452_v23  ;;  %4853 = vrcp.f32 %v3554_v43  ;;  %v3527_v13 = vmul.f32 1.442695, %v3468_v28  ;;  %v6570_v39 = vadd.f32 %v4408_v34, %v6398_v45  ;;  %v3355_v47 = vpop.f32.mrb[29].mxu1  ;;  %v3650_v46 = vld [vmem:[%s5396_s17 + $0x88] sm:$0xff] }
 0x413   : > { %v4838_v53 = vpop.eup %4837  ;;  %v3679_v17 = vadd.f32 %v3647_v21, %v3615_v7  ;;  %v3616_v35 = vmul.f32 %v4836_v11, %v6456_v32  ;;  %4855 = vpow2.f32 %v3525_v3  ;;  %v3523_v58 = vmul.f32 1.442695, %v3466_v15  ;;  %v4409_v57 = vpop.f32.mrb[30].mxu1  ;;  %v3649_v3 = vld [vmem:[%s5396_s17 + $0x80] sm:$0xff] }
 0x414   : > { %v4840_v40 = vpop.eup %4839  ;;  %v3677_v42 = vadd.f32 %v3645_v63, %v3613_v36  ;;  %v3614_v23 = vmul.f32 %v4838_v53, %v6460_v20  ;;  %4857 = vpow2.f32 %v3521_v48  ;;  %v3471_v51 = vsub.f32 0.0, %v6570_v39  ;;  %v3358_v14 = vpop.f32.mrb[31].mxu1 }
 0x415   : > { %v4842_v5 = vpop.eup %4841  ;;  %3711 = vst.msk [vmem:[%s6480_s24 + $0x70] sm:$0xff] %vm399_vm12, %v3679_v17  ;;  %v3680_v16 = vadd.f32 %v3648_v25, %v3616_v35  ;;  %v3559_v32 = vadd.f32 1.0, %v4840_v40  ;;  %4859 = vpow2.f32 %v3527_v13  ;;  %v6579_v54 = vadd.f32 %v6398_v45, %v3355_v47  ;;  %v3655_v47 = vld [vmem:[%s5396_s17 + $0xb0] sm:$0xff]  ;;  %v3656_v40 = vld [vmem:[%s5396_s17 + $0xb8] sm:$0xff] }
 0x416   : > { %v4844_v49 = vpop.eup %4843  ;;  %3709 = vst.msk [vmem:[%s6480_s24 + $0x60] sm:$0xff] %vm399_vm12, %v3677_v42  ;;  %v3678_v20 = vadd.f32 %v3646_v9, %v3614_v23  ;;  %v3557_v26 = vadd.f32 1.0, %v4842_v5  ;;  %4861 = vpow2.f32 %v3523_v58  ;;  %v3533_v61 = vmul.f32 1.442695, %v3471_v51  ;;  %v3653_v9 = vld [vmem:[%s5396_s17 + $0xa0] sm:$0xff] }
 0x417   : > { %v4846_v38 = vpop.eup %4845  ;;  %3712 = vst.msk [vmem:[%s6480_s24 + $0x78] sm:$0xff] %vm399_vm12, %v3680_v16  ;;  %4863 = vrcp.f32 %v3559_v32  ;;  %v3560_v30 = vadd.f32 1.0, %v4844_v49  ;;  %v3469_v1 = vsub.f32 0.0, %v6579_v54  ;;  %v6587_v60 = vadd.f32 %v4409_v57, %v6398_v45 }
 0x418   : > { %3710 = vst.msk [vmem:[%s6480_s24 + $0x68] sm:$0xff] %vm399_vm12, %v3678_v20  ;;  %4865 = vrcp.f32 %v3557_v26  ;;  %v3558_v8 = vadd.f32 1.0, %v4846_v38  ;;  %v6592_v50 = vadd.f32 %v6398_v45, %v3358_v14  ;;  %v3652_v45 = vld [vmem:[%s5396_s17 + $0x98] sm:$0xff]  ;;  %v3654_v14 = vld [vmem:[%s5396_s17 + $0xa8] sm:$0xff] }
 0x419   : > { %v4848_v10 = vpop.eup %4847  ;;  %4867 = vrcp.f32 %v3560_v30  ;;  %v3529_v33 = vmul.f32 1.442695, %v3469_v1  ;;  %v3472_v56 = vsub.f32 0.0, %v6587_v60  ;;  %v3659_v1 = vld [vmem:[%s5396_s17 + $0xd0] sm:$0xff] }
 0x41a   : > { %v4850_v27 = vpop.eup %4849  ;;  %v3619_v18 = vmul.f32 %v4848_v10, %v6472_v22  ;;  %4869 = vrcp.f32 %v3558_v8  ;;  %v3470_v6 = vsub.f32 0.0, %v6592_v50 }
 0x41b   : > { %v4852_v41 = vpop.eup %4851  ;;  %v3617_v24 = vmul.f32 %v4850_v27, %v6476_v62  ;;  %4871 = vpow2.f32 %v3533_v61  ;;  %v3535_v44 = vmul.f32 1.442695, %v3472_v56  ;;  %v3660_v27 = vld [vmem:[%s5396_s17 + $0xd8] sm:$0xff] }
 0x41c   : > { %v4854_v21 = vpop.eup %4853  ;;  %v3683_v43 = vadd.f32 %v3651_v37, %v3619_v18  ;;  %v3620_v28 = vmul.f32 %v4852_v41, %v6489_v52  ;;  %4873 = vpow2.f32 %v3529_v33  ;;  %v3531_v22 = vmul.f32 1.442695, %v3470_v6  ;;  %v3657_v37 = vld [vmem:[%s5396_s17 + $0xc0] sm:$0xff]  ;;  %v3658_v41 = vld [vmem:[%s5396_s17 + $0xc8] sm:$0xff] }
 0x41d   : > { %v4856_v7 = vpop.eup %4855  ;;  %v3681_v63 = vadd.f32 %v3649_v3, %v3617_v24  ;;  %v3618_v48 = vmul.f32 %v4854_v21, %v6494_v55  ;;  %4875 = vpow2.f32 %v3535_v44 }
 0x41e   : > { %v4858_v62 = vpop.eup %4857  ;;  %3715 = vst.msk [vmem:[%s6480_s24 + $0x90] sm:$0xff] %vm399_vm12, %v3683_v43  ;;  %v3684_v15 = vadd.f32 %v3652_v45, %v3620_v28  ;;  %v3563_v34 = vadd.f32 1.0, %v4856_v7  ;;  %4877 = vpow2.f32 %v3531_v22  ;;  %v3661_v28 = vld [vmem:[%s5396_s17 + $0xe0] sm:$0xff]  ;;  %v3664_v22 = vld [vmem:[%s5396_s17 + $0xf8] sm:$0xff] }
 0x41f   : > { %v4860_v11 = vpop.eup %4859  ;;  %3713 = vst.msk [vmem:[%s6480_s24 + $0x80] sm:$0xff] %vm399_vm12, %v3681_v63  ;;  %v3682_v52 = vadd.f32 %v3650_v46, %v3618_v48  ;;  %v3561_v36 = vadd.f32 1.0, %v4858_v62  ;;  %v3662_v62 = vld [vmem:[%s5396_s17 + $0xe8] sm:$0xff] }
 0x420   : > { %v4862_v25 = vpop.eup %4861  ;;  %3716 = vst.msk [vmem:[%s6480_s24 + $0x98] sm:$0xff] %vm399_vm12, %v3684_v15  ;;  %4879 = vrcp.f32 %v3563_v34  ;;  %v3564_v55 = vadd.f32 1.0, %v4860_v11 }
 0x421   : > { %v4864_v13 = vpop.eup %4863  ;;  %3714 = vst.msk [vmem:[%s6480_s24 + $0x88] sm:$0xff] %vm399_vm12, %v3682_v52  ;;  %4881 = vrcp.f32 %v3561_v36  ;;  %v3562_v53 = vadd.f32 1.0, %v4862_v25 }
 0x422   : > { %v4866_v17 = vpop.eup %4865  ;;  %v3623_v35 = vmul.f32 %v4864_v13, %v6509_v29  ;;  %4883 = vrcp.f32 %v3564_v55 }
 0x423   : > { %v4868_v58 = vpop.eup %4867  ;;  %v3621_v57 = vmul.f32 %v4866_v17, %v6514_v31  ;;  %4885 = vrcp.f32 %v3562_v53 }
 0x424   : > { %v4870_v42 = vpop.eup %4869  ;;  %v3687_v23 = vadd.f32 %v3655_v47, %v3623_v35  ;;  %v3624_v51 = vmul.f32 %v4868_v58, %v6523_v12 }
 0x425   : > { %v4872_v5 = vpop.eup %4871  ;;  %v3685_v16 = vadd.f32 %v3653_v9, %v3621_v57  ;;  %v3622_v32 = vmul.f32 %v4870_v42, %v6528_v2 }
 0x426   : > { %v4874_v29 = vpop.eup %4873  ;;  %3719 = vst.msk [vmem:[%s6480_s24 + $0xb0] sm:$0xff] %vm399_vm12, %v3687_v23  ;;  %v3688_v49 = vadd.f32 %v3656_v40, %v3624_v51  ;;  %v3567_v20 = vadd.f32 1.0, %v4872_v5 }
 0x427   : > { %v4876_v31 = vpop.eup %4875  ;;  %3717 = vst.msk [vmem:[%s6480_s24 + $0xa0] sm:$0xff] %vm399_vm12, %v3685_v16  ;;  %v3686_v26 = vadd.f32 %v3654_v14, %v3622_v32  ;;  %v3565_v61 = vadd.f32 1.0, %v4874_v29 }
 0x428   : > { %v4878_v38 = vpop.eup %4877  ;;  %3720 = vst.msk [vmem:[%s6480_s24 + $0xb8] sm:$0xff] %vm399_vm12, %v3688_v49  ;;  %4887 = vrcp.f32 %v3567_v20  ;;  %v3568_v12 = vadd.f32 1.0, %v4876_v31 }
 0x429   : > { %3718 = vst.msk [vmem:[%s6480_s24 + $0xa8] sm:$0xff] %vm399_vm12, %v3686_v26  ;;  %4889 = vrcp.f32 %v3565_v61  ;;  %v3566_v2 = vadd.f32 1.0, %v4878_v38 }
 0x42a   : > { %v4880_v30 = vpop.eup %4879  ;;  %4891 = vrcp.f32 %v3568_v12 }
 0x42b   : > { %v4882_v8 = vpop.eup %4881  ;;  %v3627_v10 = vmul.f32 %v4880_v30, %v6538_v4  ;;  %4893 = vrcp.f32 %v3566_v2 }
 0x42c   : > { %v4884_v33 = vpop.eup %4883  ;;  %v3625_v56 = vmul.f32 %v4882_v8, %v6547_v0 }
 0x42d   : > { %v4886_v18 = vpop.eup %4885  ;;  %v3691_v3 = vadd.f32 %v3659_v1, %v3627_v10  ;;  %v3628_v6 = vmul.f32 %v4884_v33, %v6552_v19  ;;  %v3663_v19 = vld [vmem:[%s5396_s17 + $0xf0] sm:$0xff] }
 0x42e   : > { %v3689_v24 = vadd.f32 %v3657_v37, %v3625_v56  ;;  %v3626_v4 = vmul.f32 %v4886_v18, %v6558_v59 }
 0x42f   : > { %3723 = vst.msk [vmem:[%s6480_s24 + $0xd0] sm:$0xff] %vm399_vm12, %v3691_v3  ;;  %v3692_v45 = vadd.f32 %v3660_v27, %v3628_v6 }
 0x430   : > { %3721 = vst.msk [vmem:[%s6480_s24 + $0xc0] sm:$0xff] %vm399_vm12, %v3689_v24  ;;  %v3690_v44 = vadd.f32 %v3658_v41, %v3626_v4 }
 0x431   : > { %3724 = vst.msk [vmem:[%s6480_s24 + $0xd8] sm:$0xff] %vm399_vm12, %v3692_v45 }
 0x432   : > { %v4888_v0 = vpop.eup %4887  ;;  %3722 = vst.msk [vmem:[%s6480_s24 + $0xc8] sm:$0xff] %vm399_vm12, %v3690_v44 }
 0x433   : > { %v4890_v21 = vpop.eup %4889  ;;  %v3631_v43 = vmul.f32 %v4888_v0, %v6570_v39 }
 0x434   : > { %v4892_v59 = vpop.eup %4891  ;;  %v3629_v46 = vmul.f32 %v4890_v21, %v6579_v54 }
 0x435   : > { %v4894_v7 = vpop.eup %4893  ;;  %v3695_v63 = vadd.f32 %v3663_v19, %v3631_v43  ;;  %v3632_v48 = vmul.f32 %v4892_v59, %v6587_v60 }
 0x436   : > { %v3693_v15 = vadd.f32 %v3661_v28, %v3629_v46  ;;  %v3630_v39 = vmul.f32 %v4894_v7, %v6592_v50 }
 0x437   : > { %3727 = vst.msk [vmem:[%s6480_s24 + $0xf0] sm:$0xff] %vm399_vm12, %v3695_v63  ;;  %v3696_v34 = vadd.f32 %v3664_v22, %v3632_v48 }
 0x438   : > { %3725 = vst.msk [vmem:[%s6480_s24 + $0xe0] sm:$0xff] %vm399_vm12, %v3693_v15  ;;  %v3694_v54 = vadd.f32 %v3662_v62, %v3630_v39 }
 0x439   : > { %3728 = vst.msk [vmem:[%s6480_s24 + $0xf8] sm:$0xff] %vm399_vm12, %v3696_v34 }
 0x43a   : > { %3726 = vst.msk [vmem:[%s6480_s24 + $0xe8] sm:$0xff] %vm399_vm12, %v3694_v54 }
 0x43b   : > { %5073 = shalt.err (!%p5070_p13)
}
 0x43c   : > { %s5074_s16 = scalar_lea.hbm %s6659_s15, 4096  ;;  %s5078_s7 = scalar_lea.hbm %s6716_s5, 8192 }
 0x43d   : > { %p5075_p9 = scmp.ne.s32.totalorder %s6659_s15, %s5074_s16  ;;  %p5079_p6 = scmp.lt.u32.totalorder %s6659_s15, %s6716_s5 }
 0x43e   : > { %p5080_p4 = scmp.lt.u32.totalorder %s5078_s7, %s5074_s16  ;;  %p5082_p3 = scmp.lt.u32.totalorder %s5074_s16, %s6659_s15 }
 0x43f   : > { %p5076_p0 = pnand %p5075_p9, %p5338_p10 }
 0x440   : > { %p5081_p8 = por %p5080_p4, %p5079_p6 }
 0x441   : > { %p5077_p11 = pneg %p5076_p0 }
 0x442   : > { %p5083_p5 = por %p5082_p3, %p5081_p8 }
 0x444   : > { %p5084_p7 = pnand %p5083_p5, %p5077_p11 }
 0x446   : > { %5087 = shalt.err (!%p5084_p7)
}
 0x447   : > { %s5147_s26 = smov 128   ;;  %s5148_s13 = smov 8  }
 0x448   : > { %4562 = dma.vmem_to_hbm [thread:$0]  (%p5338_p10), %s6661_s11, 4096, %s6659_s15, %s3730_s22, %s5147_s26, %s5147_s26, %s5148_s13  }
 0x449 PF: > { %s3758_s8 = sand.u32 1, %s5122_s18   ;;  %p6746_p12 = scmp.ne.s32.totalorder %s6721_s25, 0 }
 0x44a   : > { %p6747_p2 = scmp.ge.s32.totalorder %s5134_s21, 2  ;;  %s3759_s30 = scalar_lea.sflag [#allocation6], %s3758_s8 }
 0x44c   : > { %p4582_p1 = pnand %p6747_p2, %p6746_p12 }
 0x44e   : > { %5117 = dma.done.wait (!%p4582_p1), %s3759_s30, 4096  }
 0x44f   : > { %5119 = vsyncadd (!%p4582_p1), %s3759_s30, 4294963200  ;;  %p20_p13 = scmp.ge.s32.totalorder %s5328_s14, 4   ;;  %s6748_s18 = smov %s5126_s19 }
 0x450   : > { %s6749_s19 = smov %s5130_s20  ;;  %s6750_s20 = smov %s5344_s28 }
 0x451   : > { %s6751_s21 = smov %s5328_s14  ;;  %22 = sbr.rel (!%p20_p13) target bundleno = 7 (0x7), region = 108 }
 0x458   :  { %3764 = vsyncpa [#allocation5], 1 }
 0x459   :  { %3766 = vsyncpa [#allocation5 + $0x1], 1 }
 0x45a   :  { %3767 = vsyncpa [#allocation8], 1 }
 0x45b   :  { %3768 = vsyncpa [#allocation11], 1 }
 0x45c   :  { %3769 = vsyncpa [#allocation6], 1 }
 0x45d   :  { %3771 = vsyncpa [#allocation6 + $0x1], 1 }

</bundles_post_ra>
